<compile_context>
chip_gen: v7x
topology: tpu7x:2x2x1
jax: 0.10.0
libtpu: 0.0.40
codegen_flags: <defaults>
</compile_context>

<pallas_src>
import functools
import math

import jax
import jax.numpy as jnp
from jax.experimental import pallas as pl
from jax.experimental.pallas import tpu as pltpu


# ---------------------------------------------------------------------------
# in-kernel helpers
# ---------------------------------------------------------------------------
def _layer_norm(x, g, b, eps=1e-5):
    mu = jnp.mean(x, axis=-1, keepdims=True)
    var = jnp.mean(jnp.square(x - mu), axis=-1, keepdims=True)
    return (x - mu) * jax.lax.rsqrt(var + eps) * g + b


# ---------------------------------------------------------------------------
# fused decoder-layer kernel (block_b batch elements per grid step)
# ---------------------------------------------------------------------------
def _decoder_layer_kernel(
    tgt_ref, mem_ref, qpos_ref, pos_ref,
    sa_wqk, sa_bqk, sa_wv, sa_bv, sa_wo, sa_bo,
    ca_wq, ca_bq, ca_wk, ca_bk, ca_wv, ca_bv, ca_wo, ca_bo,
    w1, b1, w2, b2,
    g1, be1, g2, be2, g3, be3,
    out_ref, *, nhead):
    bt, T, D = tgt_ref.shape
    S = mem_ref.shape[1]
    hd = D // nhead
    wd = sa_wqk.dtype                      # matmul operand dtype (bf16 or f32)

    # flatten (bt, L, D) -> (bt*L, D): big-M GEMMs, leading-dim merge is free
    x = tgt_ref[...].astype(jnp.float32).reshape(bt * T, D)
    qp = qpos_ref[...].astype(jnp.float32).reshape(bt * T, D)
    m = mem_ref[...].astype(jnp.float32).reshape(bt * S, D)
    pp = pos_ref[...].astype(jnp.float32).reshape(bt * S, D)

    def proj(inp, w_ref, b_ref):
        # cast at the dot boundary only; accumulate in f32 on the MXU
        return jnp.dot(inp.astype(wd), w_ref[...],
                       preferred_element_type=jnp.float32) + b_ref[...]

    def attention(q, k, v, tq, s):
        # q: (bt*tq, D), k/v: (bt*s, D); softmax scale already folded into q.
        qc, kc, vc = q.astype(wd), k.astype(wd), v.astype(wd)
        rows = []
        for b in range(bt):                      # small static batch loop
            qb = qc[b * tq:(b + 1) * tq, :]
            kb = kc[b * s:(b + 1) * s, :]
            vb = vc[b * s:(b + 1) * s, :]
            # head-major stacks (nhead, rows, hd): concat on a new leading dim
            qh = jnp.stack([qb[:, h * hd:(h + 1) * hd] for h in range(nhead)], 0)
            kh = jnp.stack([kb[:, h * hd:(h + 1) * hd] for h in range(nhead)], 0)
            vh = jnp.stack([vb[:, h * hd:(h + 1) * hd] for h in range(nhead)], 0)
            # batched score/context contractions over the head axis
            sc = jnp.einsum('htd,hsd->hts', qh, kh,
                            preferred_element_type=jnp.float32)
            sc = sc - jnp.max(sc, axis=-1, keepdims=True)
            p = jnp.exp(sc)
            p = p * pl.reciprocal(jnp.sum(p, axis=-1, keepdims=True), approx=True)
            ctx = jnp.einsum('hts,hsd->htd', p.astype(wd), vh,
                             preferred_element_type=jnp.float32)
            # merge heads back onto the lane dim (D) for the wide out-proj GEMM
            rows.append(jnp.concatenate([ctx[h] for h in range(nhead)], axis=-1))
        return rows[0] if bt == 1 else jnp.concatenate(rows, axis=0)

    # ---- self-attention: q = k = tgt + query_pos, v = tgt ----------------
    q_in = x + qp
    qk = proj(q_in, sa_wqk, sa_bqk)              # fused Q|K GEMM: (bt*T, 2D)
    v = proj(x, sa_wv, sa_bv)
    att = attention(qk[:, :D], qk[:, D:], v, T, T)
    x = _layer_norm(x + proj(att, sa_wo, sa_bo), g1[...], be1[...])   # norm1

    # ---- cross-attention: q = tgt + query_pos, k = memory + pos, v = memory
    q = proj(x + qp, ca_wq, ca_bq)               # scale folded into ca_wq/bq
    k = proj(m + pp, ca_wk, ca_bk)
    v = proj(m, ca_wv, ca_bv)
    att = attention(q, k, v, T, S)
    x = _layer_norm(x + proj(att, ca_wo, ca_bo), g2[...], be2[...])   # norm2

    # ---- feed-forward: linear2(relu(linear1(x))) --------------------------
    h = jnp.maximum(proj(x, w1, b1), 0.0)
    x = _layer_norm(x + proj(h, w2, b2), g3[...], be3[...])           # norm3

    out_ref[...] = x.reshape(bt, T, D).astype(out_ref.dtype)


_PACKED_ORDER = (
    "sa_wqk", "sa_bqk", "sa_wv", "sa_bv", "sa_wo", "sa_bo",
    "ca_wq", "ca_bq", "ca_wk", "ca_bk", "ca_wv", "ca_bv", "ca_wo", "ca_bo",
    "w1", "b1", "w2", "b2",
    "g1", "be1", "g2", "be2", "g3", "be3",
)


def _pack_params(params, nhead, d_model, matmul_dtype):
    """Fuse self-attn Q|K, fold 1/sqrt(hd) into Q, cast matmul weights."""
    scale = 1.0 / math.sqrt(d_model // nhead)
    wd = matmul_dtype
    f32 = jnp.float32
    packed = {
        "sa_wqk": jnp.concatenate(
            [params["sa_wq"] * scale, params["sa_wk"]], axis=1).astype(wd),
        "sa_bqk": jnp.concatenate(
            [params["sa_bq"] * scale, params["sa_bk"]], axis=1).astype(f32),
        "sa_wv": params["sa_wv"].astype(wd), "sa_bv": params["sa_bv"].astype(f32),
        "sa_wo": params["sa_wo"].astype(wd), "sa_bo": params["sa_bo"].astype(f32),
        "ca_wq": (params["ca_wq"] * scale).astype(wd),
        "ca_bq": (params["ca_bq"] * scale).astype(f32),
        "ca_wk": params["ca_wk"].astype(wd), "ca_bk": params["ca_bk"].astype(f32),
        "ca_wv": params["ca_wv"].astype(wd), "ca_bv": params["ca_bv"].astype(f32),
        "ca_wo": params["ca_wo"].astype(wd), "ca_bo": params["ca_bo"].astype(f32),
        "w1": params["w1"].astype(wd), "b1": params["b1"].astype(f32),
        "w2": params["w2"].astype(wd), "b2": params["b2"].astype(f32),
        "g1": params["g1"].astype(f32), "be1": params["be1"].astype(f32),
        "g2": params["g2"].astype(f32), "be2": params["be2"].astype(f32),
        "g3": params["g3"].astype(f32), "be3": params["be3"].astype(f32),
    }
    return [packed[k] for k in _PACKED_ORDER]


def transformer_decoder_layer(tgt, memory, query_pos, pos, params, *, nhead,
                              block_b=None, matmul_dtype=jnp.bfloat16):
    B, T, D = tgt.shape
    S = memory.shape[1]
    if block_b is None:
        block_b = next(c for c in (8, 4, 2, 1) if B % c == 0)
    assert B % block_b == 0, "block_b must divide batch"

    weights = _pack_params(params, nhead, D, matmul_dtype)

    def seq_spec(L):
        return pl.BlockSpec((block_b, L, D), lambda b: (b, 0, 0))

    def w_spec(arr):
        # constant index_map: weights stay resident in VMEM across the grid.
        return pl.BlockSpec(arr.shape, lambda b: (0, 0))

    in_specs = ([seq_spec(T), seq_spec(S), seq_spec(T), seq_spec(S)]
                + [w_spec(w) for w in weights])

    kernel = functools.partial(_decoder_layer_kernel, nhead=nhead)
    return pl.pallas_call(
        kernel,
        out_shape=jax.ShapeDtypeStruct((B, T, D), tgt.dtype),
        grid=(B // block_b,),
        in_specs=in_specs,
        out_specs=pl.BlockSpec((block_b, T, D), lambda b: (b, 0, 0)),
        compiler_params=pltpu.CompilerParams(
            # batch blocks are independent -> shard across v7x's 2 TensorCores
            dimension_semantics=("parallel",),
            # headroom for large d_model / dim_feedforward weight sets
            vmem_limit_bytes=64 * 1024 * 1024),
    )(tgt, memory, query_pos, pos, *weights)


# ---------------------------------------------------------------------------
# deterministic parameter construction (mirrors the nn.Module's shapes)
# ---------------------------------------------------------------------------
def init_params(key, d_model, nhead, dim_feedforward):
    ks = jax.random.split(key, 12)

    def lin(k, n_in, n_out, scale=0.1):
        kw, kb = jax.random.split(k)
        w = jax.random.normal(kw, (n_in, n_out), jnp.float32) * scale
        b = jax.random.normal(kb, (1, n_out), jnp.float32) * scale
        return w, b

    p = {}
    for prefix, (k_in, k_out) in (("sa", (ks[0], ks[1])), ("ca", (ks[2], ks[3]))):
        wq, bq = lin(jax.random.fold_in(k_in, 0), d_model, d_model)
        wk, bk = lin(jax.random.fold_in(k_in, 1), d_model, d_model)
        wv, bv = lin(jax.random.fold_in(k_in, 2), d_model, d_model)
        wo, bo = lin(k_out, d_model, d_model)
        p.update({f"{prefix}_wq": wq, f"{prefix}_wk": wk, f"{prefix}_wv": wv,
                  f"{prefix}_bq": bq, f"{prefix}_bk": bk, f"{prefix}_bv": bv,
                  f"{prefix}_wo": wo, f"{prefix}_bo": bo})
    p["w1"], p["b1"] = lin(ks[4], d_model, dim_feedforward)
    p["w2"], p["b2"] = lin(ks[5], dim_feedforward, d_model)
    for name in ("1", "2", "3"):
        p[f"g{name}"] = jnp.ones((1, d_model), jnp.float32)
        p[f"be{name}"] = jnp.zeros((1, d_model), jnp.float32)
    return p


# ---------------------------------------------------------------------------
# pure-JAX f32 reference for correctness check
# ---------------------------------------------------------------------------
def reference(tgt, memory, query_pos, pos, p, nhead):
    def ln(x, g, b):
        mu = x.mean(-1, keepdims=True)
        var = ((x - mu) ** 2).mean(-1, keepdims=True)
        return (x - mu) / jnp.sqrt(var + 1e-5) * g + b

    def mha(q_in, k_in, v_in, wq, bq, wk, bk, wv, bv, wo, bo):
        B, T, D = q_in.shape
        S = k_in.shape[1]
        hd = D // nhead
        q = (q_in @ wq + bq).reshape(B, T, nhead, hd) / math.sqrt(hd)
        k = (k_in @ wk + bk).reshape(B, S, nhead, hd)
        v = (v_in @ wv + bv).reshape(B, S, nhead, hd)
        s = jnp.einsum("bthd,bshd->bhts", q, k)
        a = jax.nn.softmax(s, axis=-1)
        o = jnp.einsum("bhts,bshd->bthd", a, v).reshape(B, T, D)
        return o @ wo + bo

    x = tgt
    t2 = mha(x + query_pos, x + query_pos, x,
             p["sa_wq"], p["sa_bq"], p["sa_wk"], p["sa_bk"],
             p["sa_wv"], p["sa_bv"], p["sa_wo"], p["sa_bo"])
    x = ln(x + t2, p["g1"], p["be1"])
    t2 = mha(x + query_pos, memory + pos, memory,
             p["ca_wq"], p["ca_bq"], p["ca_wk"], p["ca_bk"],
             p["ca_wv"], p["ca_bv"], p["ca_wo"], p["ca_bo"])
    x = ln(x + t2, p["g2"], p["be2"])
    h = jnp.maximum(x @ p["w1"] + p["b1"], 0.0)
    t2 = h @ p["w2"] + p["b2"]
    x = ln(x + t2, p["g3"], p["be3"])
    return x


# TODO(synk): attn_mask / key_padding_mask branches (None in this config) and
# train-mode dropout are not implemented; kernel matches eval-mode forward_post.

if __name__ == "__main__":
    B, T, S = 4, 8, 16            # batch, num queries, memory length
    D, NHEAD, FF = 32, 4, 64      # d_model, nhead, dim_feedforward
    # NOTE: demo shapes; for production DETR keep D a multiple of 128 and pad
    # T/S to multiples of 8 (f32) / 16 (bf16) to stay lane/sublane dense.

    key = jax.random.PRNGKey(0)
    k_t, k_m, k_qp, k_p, k_w = jax.random.split(key, 5)
    tgt = jax.random.normal(k_t, (B, T, D), jnp.float32)
    memory = jax.random.normal(k_m, (B, S, D), jnp.float32)
    query_pos = jax.random.normal(k_qp, (B, T, D), jnp.float32)
    pos = jax.random.normal(k_p, (B, S, D), jnp.float32)
    params = init_params(k_w, D, NHEAD, FF)

    ref = reference(tgt, memory, query_pos, pos, params, NHEAD)

    # f32-matmul path: near-exact check (only approx-reciprocal differs)
    out_f32 = transformer_decoder_layer(tgt, memory, query_pos, pos, params,
                                        nhead=NHEAD, block_b=2,
                                        matmul_dtype=jnp.float32)
    out_f32 = jax.block_until_ready(out_f32)
    assert out_f32.shape == (B, T, D)
    assert jnp.allclose(out_f32, ref, rtol=5e-3, atol=5e-3), (
        float(jnp.max(jnp.abs(out_f32 - ref))))

    # bf16-matmul path (production perf path): looser tolerance vs f32 reference
    out_bf16 = transformer_decoder_layer(tgt, memory, query_pos, pos, params,
                                         nhead=NHEAD, block_b=2,
                                         matmul_dtype=jnp.bfloat16)
    out_bf16 = jax.block_until_ready(out_bf16)
    assert jnp.allclose(out_bf16, ref, rtol=5e-2, atol=5e-2), (
        float(jnp.max(jnp.abs(out_bf16 - ref))))

    print("KERNEL_OK")
</pallas_src>

<mosaic_0001>
module attributes {stable_mosaic.version = 11 : i64} {
  func.func @_decoder_layer_kernel(%arg0: i32, %arg1: memref<2x8x32xf32, #tpu.memory_space<vmem>>, %arg2: memref<2x16x32xf32, #tpu.memory_space<vmem>>, %arg3: memref<2x8x32xf32, #tpu.memory_space<vmem>>, %arg4: memref<2x16x32xf32, #tpu.memory_space<vmem>>, %arg5: memref<32x64xf32, #tpu.memory_space<vmem>>, %arg6: memref<1x64xf32, #tpu.memory_space<vmem>>, %arg7: memref<32x32xf32, #tpu.memory_space<vmem>>, %arg8: memref<1x32xf32, #tpu.memory_space<vmem>>, %arg9: memref<32x32xf32, #tpu.memory_space<vmem>>, %arg10: memref<1x32xf32, #tpu.memory_space<vmem>>, %arg11: memref<32x32xf32, #tpu.memory_space<vmem>>, %arg12: memref<1x32xf32, #tpu.memory_space<vmem>>, %arg13: memref<32x32xf32, #tpu.memory_space<vmem>>, %arg14: memref<1x32xf32, #tpu.memory_space<vmem>>, %arg15: memref<32x32xf32, #tpu.memory_space<vmem>>, %arg16: memref<1x32xf32, #tpu.memory_space<vmem>>, %arg17: memref<32x32xf32, #tpu.memory_space<vmem>>, %arg18: memref<1x32xf32, #tpu.memory_space<vmem>>, %arg19: memref<32x64xf32, #tpu.memory_space<vmem>>, %arg20: memref<1x64xf32, #tpu.memory_space<vmem>>, %arg21: memref<64x32xf32, #tpu.memory_space<vmem>>, %arg22: memref<1x32xf32, #tpu.memory_space<vmem>>, %arg23: memref<1x32xf32, #tpu.memory_space<vmem>>, %arg24: memref<1x32xf32, #tpu.memory_space<vmem>>, %arg25: memref<1x32xf32, #tpu.memory_space<vmem>>, %arg26: memref<1x32xf32, #tpu.memory_space<vmem>>, %arg27: memref<1x32xf32, #tpu.memory_space<vmem>>, %arg28: memref<1x32xf32, #tpu.memory_space<vmem>>, %arg29: memref<2x8x32xf32, #tpu.memory_space<vmem>>) attributes {dimension_semantics = [#tpu.dimension_semantics<parallel>], iteration_bounds = array<i64: 2>, scalar_prefetch = 0 : i64, scratch_operands = 0 : i64, tpu.core_type = #tpu.core_type<tc>, window_params = [{transform_indices = @transform_0, window_bounds = array<i64: 2, 8, 32>}, {transform_indices = @transform_1, window_bounds = array<i64: 2, 16, 32>}, {transform_indices = @transform_2, window_bounds = array<i64: 2, 8, 32>}, {transform_indices = @transform_3, window_bounds = array<i64: 2, 16, 32>}, {pipeline_mode = #tpu.pipeline_mode<synchronous>, transform_indices = @transform_4, window_bounds = array<i64: 32, 64>}, {pipeline_mode = #tpu.pipeline_mode<synchronous>, transform_indices = @transform_5, window_bounds = array<i64: 1, 64>}, {pipeline_mode = #tpu.pipeline_mode<synchronous>, transform_indices = @transform_6, window_bounds = array<i64: 32, 32>}, {pipeline_mode = #tpu.pipeline_mode<synchronous>, transform_indices = @transform_7, window_bounds = array<i64: 1, 32>}, {pipeline_mode = #tpu.pipeline_mode<synchronous>, transform_indices = @transform_8, window_bounds = array<i64: 32, 32>}, {pipeline_mode = #tpu.pipeline_mode<synchronous>, transform_indices = @transform_9, window_bounds = array<i64: 1, 32>}, {pipeline_mode = #tpu.pipeline_mode<synchronous>, transform_indices = @transform_10, window_bounds = array<i64: 32, 32>}, {pipeline_mode = #tpu.pipeline_mode<synchronous>, transform_indices = @transform_11, window_bounds = array<i64: 1, 32>}, {pipeline_mode = #tpu.pipeline_mode<synchronous>, transform_indices = @transform_12, window_bounds = array<i64: 32, 32>}, {pipeline_mode = #tpu.pipeline_mode<synchronous>, transform_indices = @transform_13, window_bounds = array<i64: 1, 32>}, {pipeline_mode = #tpu.pipeline_mode<synchronous>, transform_indices = @transform_14, window_bounds = array<i64: 32, 32>}, {pipeline_mode = #tpu.pipeline_mode<synchronous>, transform_indices = @transform_15, window_bounds = array<i64: 1, 32>}, {pipeline_mode = #tpu.pipeline_mode<synchronous>, transform_indices = @transform_16, window_bounds = array<i64: 32, 32>}, {pipeline_mode = #tpu.pipeline_mode<synchronous>, transform_indices = @transform_17, window_bounds = array<i64: 1, 32>}, {pipeline_mode = #tpu.pipeline_mode<synchronous>, transform_indices = @transform_18, window_bounds = array<i64: 32, 64>}, {pipeline_mode = #tpu.pipeline_mode<synchronous>, transform_indices = @transform_19, window_bounds = array<i64: 1, 64>}, {pipeline_mode = #tpu.pipeline_mode<synchronous>, transform_indices = @transform_20, window_bounds = array<i64: 64, 32>}, {pipeline_mode = #tpu.pipeline_mode<synchronous>, transform_indices = @transform_21, window_bounds = array<i64: 1, 32>}, {pipeline_mode = #tpu.pipeline_mode<synchronous>, transform_indices = @transform_22, window_bounds = array<i64: 1, 32>}, {pipeline_mode = #tpu.pipeline_mode<synchronous>, transform_indices = @transform_23, window_bounds = array<i64: 1, 32>}, {pipeline_mode = #tpu.pipeline_mode<synchronous>, transform_indices = @transform_24, window_bounds = array<i64: 1, 32>}, {pipeline_mode = #tpu.pipeline_mode<synchronous>, transform_indices = @transform_25, window_bounds = array<i64: 1, 32>}, {pipeline_mode = #tpu.pipeline_mode<synchronous>, transform_indices = @transform_26, window_bounds = array<i64: 1, 32>}, {pipeline_mode = #tpu.pipeline_mode<synchronous>, transform_indices = @transform_27, window_bounds = array<i64: 1, 32>}, {transform_indices = @transform_28, window_bounds = array<i64: 2, 8, 32>}]} {
    %c0 = arith.constant 0 : index
    %c0_0 = arith.constant 0 : index
    %c0_1 = arith.constant 0 : index
    %0 = vector.load %arg1[%c0, %c0_0, %c0_1] : memref<2x8x32xf32, #tpu.memory_space<vmem>>, vector<2x8x32xf32>
    %1 = vector.shape_cast %0 : vector<2x8x32xf32> to vector<16x32xf32>
    %c0_2 = arith.constant 0 : index
    %c0_3 = arith.constant 0 : index
    %c0_4 = arith.constant 0 : index
    %2 = vector.load %arg3[%c0_2, %c0_3, %c0_4] : memref<2x8x32xf32, #tpu.memory_space<vmem>>, vector<2x8x32xf32>
    %3 = vector.shape_cast %2 : vector<2x8x32xf32> to vector<16x32xf32>
    %c0_5 = arith.constant 0 : index
    %c0_6 = arith.constant 0 : index
    %c0_7 = arith.constant 0 : index
    %4 = vector.load %arg2[%c0_5, %c0_6, %c0_7] : memref<2x16x32xf32, #tpu.memory_space<vmem>>, vector<2x16x32xf32>
    %5 = vector.shape_cast %4 : vector<2x16x32xf32> to vector<32x32xf32>
    %c0_8 = arith.constant 0 : index
    %c0_9 = arith.constant 0 : index
    %c0_10 = arith.constant 0 : index
    %6 = vector.load %arg4[%c0_8, %c0_9, %c0_10] : memref<2x16x32xf32, #tpu.memory_space<vmem>>, vector<2x16x32xf32>
    %7 = vector.shape_cast %6 : vector<2x16x32xf32> to vector<32x32xf32>
    %8 = arith.addf %1, %3 : vector<16x32xf32>
    %c0_11 = arith.constant 0 : index
    %c0_12 = arith.constant 0 : index
    %9 = vector.load %arg5[%c0_11, %c0_12] : memref<32x64xf32, #tpu.memory_space<vmem>>, vector<32x64xf32>
    %cst = arith.constant dense<0.000000e+00> : vector<16x64xf32>
    %10 = tpu.matmul %8, %9, %cst {dimension_numbers = #tpu.dot_dimension_numbers<[1], [0], [0], [1], [0, 0, 1, 1], [], []>} : vector<16x32xf32>, vector<32x64xf32>, vector<16x64xf32> -> vector<16x64xf32>
    %c0_13 = arith.constant 0 : index
    %c0_14 = arith.constant 0 : index
    %11 = vector.load %arg6[%c0_13, %c0_14] : memref<1x64xf32, #tpu.memory_space<vmem>>, vector<1x64xf32>
    %12 = vector.broadcast %11 : vector<1x64xf32> to vector<16x64xf32>
    %13 = arith.addf %10, %12 : vector<16x64xf32>
    %c0_15 = arith.constant 0 : index
    %c0_16 = arith.constant 0 : index
    %14 = vector.load %arg7[%c0_15, %c0_16] : memref<32x32xf32, #tpu.memory_space<vmem>>, vector<32x32xf32>
    %cst_17 = arith.constant dense<0.000000e+00> : vector<16x32xf32>
    %15 = tpu.matmul %1, %14, %cst_17 {dimension_numbers = #tpu.dot_dimension_numbers<[1], [0], [0], [1], [0, 0, 1, 1], [], []>} : vector<16x32xf32>, vector<32x32xf32>, vector<16x32xf32> -> vector<16x32xf32>
    %c0_18 = arith.constant 0 : index
    %c0_19 = arith.constant 0 : index
    %16 = vector.load %arg8[%c0_18, %c0_19] : memref<1x32xf32, #tpu.memory_space<vmem>>, vector<1x32xf32>
    %17 = vector.broadcast %16 : vector<1x32xf32> to vector<16x32xf32>
    %18 = arith.addf %15, %17 : vector<16x32xf32>
    %19 = vector.extract_strided_slice %13 {offsets = [0, 0], sizes = [16, 32], strides = [1, 1]} : vector<16x64xf32> to vector<16x32xf32>
    %20 = vector.extract_strided_slice %13 {offsets = [0, 32], sizes = [16, 32], strides = [1, 1]} : vector<16x64xf32> to vector<16x32xf32>
    %21 = vector.extract_strided_slice %19 {offsets = [0, 0], sizes = [8, 32], strides = [1, 1]} : vector<16x32xf32> to vector<8x32xf32>
    %22 = vector.extract_strided_slice %20 {offsets = [0, 0], sizes = [8, 32], strides = [1, 1]} : vector<16x32xf32> to vector<8x32xf32>
    %23 = vector.extract_strided_slice %18 {offsets = [0, 0], sizes = [8, 32], strides = [1, 1]} : vector<16x32xf32> to vector<8x32xf32>
    %24 = vector.extract_strided_slice %21 {offsets = [0, 0], sizes = [8, 8], strides = [1, 1]} : vector<8x32xf32> to vector<8x8xf32>
    %25 = vector.extract_strided_slice %21 {offsets = [0, 8], sizes = [8, 8], strides = [1, 1]} : vector<8x32xf32> to vector<8x8xf32>
    %26 = vector.extract_strided_slice %21 {offsets = [0, 16], sizes = [8, 8], strides = [1, 1]} : vector<8x32xf32> to vector<8x8xf32>
    %27 = vector.extract_strided_slice %21 {offsets = [0, 24], sizes = [8, 8], strides = [1, 1]} : vector<8x32xf32> to vector<8x8xf32>
    %28 = vector.shape_cast %24 : vector<8x8xf32> to vector<1x8x8xf32>
    %29 = vector.shape_cast %25 : vector<8x8xf32> to vector<1x8x8xf32>
    %30 = vector.shape_cast %26 : vector<8x8xf32> to vector<1x8x8xf32>
    %31 = vector.shape_cast %27 : vector<8x8xf32> to vector<1x8x8xf32>
    %32 = tpu.concatenate %28, %29, %30, %31 in 0 : vector<1x8x8xf32>, vector<1x8x8xf32>, vector<1x8x8xf32>, vector<1x8x8xf32> -> vector<4x8x8xf32>
    %33 = vector.extract_strided_slice %22 {offsets = [0, 0], sizes = [8, 8], strides = [1, 1]} : vector<8x32xf32> to vector<8x8xf32>
    %34 = vector.extract_strided_slice %22 {offsets = [0, 8], sizes = [8, 8], strides = [1, 1]} : vector<8x32xf32> to vector<8x8xf32>
    %35 = vector.extract_strided_slice %22 {offsets = [0, 16], sizes = [8, 8], strides = [1, 1]} : vector<8x32xf32> to vector<8x8xf32>
    %36 = vector.extract_strided_slice %22 {offsets = [0, 24], sizes = [8, 8], strides = [1, 1]} : vector<8x32xf32> to vector<8x8xf32>
    %37 = vector.shape_cast %33 : vector<8x8xf32> to vector<1x8x8xf32>
    %38 = vector.shape_cast %34 : vector<8x8xf32> to vector<1x8x8xf32>
    %39 = vector.shape_cast %35 : vector<8x8xf32> to vector<1x8x8xf32>
    %40 = vector.shape_cast %36 : vector<8x8xf32> to vector<1x8x8xf32>
    %41 = tpu.concatenate %37, %38, %39, %40 in 0 : vector<1x8x8xf32>, vector<1x8x8xf32>, vector<1x8x8xf32>, vector<1x8x8xf32> -> vector<4x8x8xf32>
    %42 = vector.extract_strided_slice %23 {offsets = [0, 0], sizes = [8, 8], strides = [1, 1]} : vector<8x32xf32> to vector<8x8xf32>
    %43 = vector.extract_strided_slice %23 {offsets = [0, 8], sizes = [8, 8], strides = [1, 1]} : vector<8x32xf32> to vector<8x8xf32>
    %44 = vector.extract_strided_slice %23 {offsets = [0, 16], sizes = [8, 8], strides = [1, 1]} : vector<8x32xf32> to vector<8x8xf32>
    %45 = vector.extract_strided_slice %23 {offsets = [0, 24], sizes = [8, 8], strides = [1, 1]} : vector<8x32xf32> to vector<8x8xf32>
    %46 = vector.shape_cast %42 : vector<8x8xf32> to vector<1x8x8xf32>
    %47 = vector.shape_cast %43 : vector<8x8xf32> to vector<1x8x8xf32>
    %48 = vector.shape_cast %44 : vector<8x8xf32> to vector<1x8x8xf32>
    %49 = vector.shape_cast %45 : vector<8x8xf32> to vector<1x8x8xf32>
    %50 = tpu.concatenate %46, %47, %48, %49 in 0 : vector<1x8x8xf32>, vector<1x8x8xf32>, vector<1x8x8xf32>, vector<1x8x8xf32> -> vector<4x8x8xf32>
    "tpu.trace_start"() <{level = 10 : i32, message = "htd,hsd->hts"}> : () -> ()
    %cst_20 = arith.constant dense<0.000000e+00> : vector<4x8x8xf32>
    %51 = tpu.matmul %32, %41, %cst_20 {dimension_numbers = #tpu.dot_dimension_numbers<[2], [2], [1], [1], [0, 0, 0, 1, 1, 1], [0], [0]>} : vector<4x8x8xf32>, vector<4x8x8xf32>, vector<4x8x8xf32> -> vector<4x8x8xf32>
    "tpu.trace_stop"() : () -> ()
    %cst_21 = arith.constant dense<0xFF800000> : vector<4x8xf32>
    %52 = vector.multi_reduction <maximumf>, %51, %cst_21 [2] : vector<4x8x8xf32> to vector<4x8xf32>
    %53 = vector.shape_cast %52 : vector<4x8xf32> to vector<4x8x1xf32>
    %54 = vector.broadcast %53 : vector<4x8x1xf32> to vector<4x8x8xf32>
    %55 = arith.subf %51, %54 : vector<4x8x8xf32>
    %56 = math.exp %55 : vector<4x8x8xf32>
    %cst_22 = arith.constant dense<0.000000e+00> : vector<4x8xf32>
    %57 = vector.multi_reduction <add>, %56, %cst_22 [2] : vector<4x8x8xf32> to vector<4x8xf32>
    %58 = vector.shape_cast %57 : vector<4x8xf32> to vector<4x8x1xf32>
    %59 = tpu.reciprocal %58 {approx = true} : vector<4x8x1xf32> -> vector<4x8x1xf32>
    %60 = vector.broadcast %59 : vector<4x8x1xf32> to vector<4x8x8xf32>
    %61 = arith.mulf %56, %60 : vector<4x8x8xf32>
    "tpu.trace_start"() <{level = 10 : i32, message = "hts,hsd->htd"}> : () -> ()
    %cst_23 = arith.constant dense<0.000000e+00> : vector<4x8x8xf32>
    %62 = tpu.matmul %61, %50, %cst_23 {dimension_numbers = #tpu.dot_dimension_numbers<[2], [1], [1], [2], [0, 0, 0, 1, 1, 2], [0], [0]>} : vector<4x8x8xf32>, vector<4x8x8xf32>, vector<4x8x8xf32> -> vector<4x8x8xf32>
    "tpu.trace_stop"() : () -> ()
    %63 = vector.extract_strided_slice %62 {offsets = [0, 0, 0], sizes = [1, 8, 8], strides = [1, 1, 1]} : vector<4x8x8xf32> to vector<1x8x8xf32>
    %64 = vector.shape_cast %63 : vector<1x8x8xf32> to vector<8x8xf32>
    %65 = vector.extract_strided_slice %62 {offsets = [1, 0, 0], sizes = [1, 8, 8], strides = [1, 1, 1]} : vector<4x8x8xf32> to vector<1x8x8xf32>
    %66 = vector.shape_cast %65 : vector<1x8x8xf32> to vector<8x8xf32>
    %67 = vector.extract_strided_slice %62 {offsets = [2, 0, 0], sizes = [1, 8, 8], strides = [1, 1, 1]} : vector<4x8x8xf32> to vector<1x8x8xf32>
    %68 = vector.shape_cast %67 : vector<1x8x8xf32> to vector<8x8xf32>
    %69 = vector.extract_strided_slice %62 {offsets = [3, 0, 0], sizes = [1, 8, 8], strides = [1, 1, 1]} : vector<4x8x8xf32> to vector<1x8x8xf32>
    %70 = vector.shape_cast %69 : vector<1x8x8xf32> to vector<8x8xf32>
    %71 = tpu.concatenate %64, %66, %68, %70 in 1 : vector<8x8xf32>, vector<8x8xf32>, vector<8x8xf32>, vector<8x8xf32> -> vector<8x32xf32>
    %72 = vector.extract_strided_slice %19 {offsets = [8, 0], sizes = [8, 32], strides = [1, 1]} : vector<16x32xf32> to vector<8x32xf32>
    %73 = vector.extract_strided_slice %20 {offsets = [8, 0], sizes = [8, 32], strides = [1, 1]} : vector<16x32xf32> to vector<8x32xf32>
    %74 = vector.extract_strided_slice %18 {offsets = [8, 0], sizes = [8, 32], strides = [1, 1]} : vector<16x32xf32> to vector<8x32xf32>
    %75 = vector.extract_strided_slice %72 {offsets = [0, 0], sizes = [8, 8], strides = [1, 1]} : vector<8x32xf32> to vector<8x8xf32>
    %76 = vector.extract_strided_slice %72 {offsets = [0, 8], sizes = [8, 8], strides = [1, 1]} : vector<8x32xf32> to vector<8x8xf32>
    %77 = vector.extract_strided_slice %72 {offsets = [0, 16], sizes = [8, 8], strides = [1, 1]} : vector<8x32xf32> to vector<8x8xf32>
    %78 = vector.extract_strided_slice %72 {offsets = [0, 24], sizes = [8, 8], strides = [1, 1]} : vector<8x32xf32> to vector<8x8xf32>
    %79 = vector.shape_cast %75 : vector<8x8xf32> to vector<1x8x8xf32>
    %80 = vector.shape_cast %76 : vector<8x8xf32> to vector<1x8x8xf32>
    %81 = vector.shape_cast %77 : vector<8x8xf32> to vector<1x8x8xf32>
    %82 = vector.shape_cast %78 : vector<8x8xf32> to vector<1x8x8xf32>
    %83 = tpu.concatenate %79, %80, %81, %82 in 0 : vector<1x8x8xf32>, vector<1x8x8xf32>, vector<1x8x8xf32>, vector<1x8x8xf32> -> vector<4x8x8xf32>
    %84 = vector.extract_strided_slice %73 {offsets = [0, 0], sizes = [8, 8], strides = [1, 1]} : vector<8x32xf32> to vector<8x8xf32>
    %85 = vector.extract_strided_slice %73 {offsets = [0, 8], sizes = [8, 8], strides = [1, 1]} : vector<8x32xf32> to vector<8x8xf32>
    %86 = vector.extract_strided_slice %73 {offsets = [0, 16], sizes = [8, 8], strides = [1, 1]} : vector<8x32xf32> to vector<8x8xf32>
    %87 = vector.extract_strided_slice %73 {offsets = [0, 24], sizes = [8, 8], strides = [1, 1]} : vector<8x32xf32> to vector<8x8xf32>
    %88 = vector.shape_cast %84 : vector<8x8xf32> to vector<1x8x8xf32>
    %89 = vector.shape_cast %85 : vector<8x8xf32> to vector<1x8x8xf32>
    %90 = vector.shape_cast %86 : vector<8x8xf32> to vector<1x8x8xf32>
    %91 = vector.shape_cast %87 : vector<8x8xf32> to vector<1x8x8xf32>
    %92 = tpu.concatenate %88, %89, %90, %91 in 0 : vector<1x8x8xf32>, vector<1x8x8xf32>, vector<1x8x8xf32>, vector<1x8x8xf32> -> vector<4x8x8xf32>
    %93 = vector.extract_strided_slice %74 {offsets = [0, 0], sizes = [8, 8], strides = [1, 1]} : vector<8x32xf32> to vector<8x8xf32>
    %94 = vector.extract_strided_slice %74 {offsets = [0, 8], sizes = [8, 8], strides = [1, 1]} : vector<8x32xf32> to vector<8x8xf32>
    %95 = vector.extract_strided_slice %74 {offsets = [0, 16], sizes = [8, 8], strides = [1, 1]} : vector<8x32xf32> to vector<8x8xf32>
    %96 = vector.extract_strided_slice %74 {offsets = [0, 24], sizes = [8, 8], strides = [1, 1]} : vector<8x32xf32> to vector<8x8xf32>
    %97 = vector.shape_cast %93 : vector<8x8xf32> to vector<1x8x8xf32>
    %98 = vector.shape_cast %94 : vector<8x8xf32> to vector<1x8x8xf32>
    %99 = vector.shape_cast %95 : vector<8x8xf32> to vector<1x8x8xf32>
    %100 = vector.shape_cast %96 : vector<8x8xf32> to vector<1x8x8xf32>
    %101 = tpu.concatenate %97, %98, %99, %100 in 0 : vector<1x8x8xf32>, vector<1x8x8xf32>, vector<1x8x8xf32>, vector<1x8x8xf32> -> vector<4x8x8xf32>
    "tpu.trace_start"() <{level = 10 : i32, message = "htd,hsd->hts"}> : () -> ()
    %cst_24 = arith.constant dense<0.000000e+00> : vector<4x8x8xf32>
    %102 = tpu.matmul %83, %92, %cst_24 {dimension_numbers = #tpu.dot_dimension_numbers<[2], [2], [1], [1], [0, 0, 0, 1, 1, 1], [0], [0]>} : vector<4x8x8xf32>, vector<4x8x8xf32>, vector<4x8x8xf32> -> vector<4x8x8xf32>
    "tpu.trace_stop"() : () -> ()
    %cst_25 = arith.constant dense<0xFF800000> : vector<4x8xf32>
    %103 = vector.multi_reduction <maximumf>, %102, %cst_25 [2] : vector<4x8x8xf32> to vector<4x8xf32>
    %104 = vector.shape_cast %103 : vector<4x8xf32> to vector<4x8x1xf32>
    %105 = vector.broadcast %104 : vector<4x8x1xf32> to vector<4x8x8xf32>
    %106 = arith.subf %102, %105 : vector<4x8x8xf32>
    %107 = math.exp %106 : vector<4x8x8xf32>
    %cst_26 = arith.constant dense<0.000000e+00> : vector<4x8xf32>
    %108 = vector.multi_reduction <add>, %107, %cst_26 [2] : vector<4x8x8xf32> to vector<4x8xf32>
    %109 = vector.shape_cast %108 : vector<4x8xf32> to vector<4x8x1xf32>
    %110 = tpu.reciprocal %109 {approx = true} : vector<4x8x1xf32> -> vector<4x8x1xf32>
    %111 = vector.broadcast %110 : vector<4x8x1xf32> to vector<4x8x8xf32>
    %112 = arith.mulf %107, %111 : vector<4x8x8xf32>
    "tpu.trace_start"() <{level = 10 : i32, message = "hts,hsd->htd"}> : () -> ()
    %cst_27 = arith.constant dense<0.000000e+00> : vector<4x8x8xf32>
    %113 = tpu.matmul %112, %101, %cst_27 {dimension_numbers = #tpu.dot_dimension_numbers<[2], [1], [1], [2], [0, 0, 0, 1, 1, 2], [0], [0]>} : vector<4x8x8xf32>, vector<4x8x8xf32>, vector<4x8x8xf32> -> vector<4x8x8xf32>
    "tpu.trace_stop"() : () -> ()
    %114 = vector.extract_strided_slice %113 {offsets = [0, 0, 0], sizes = [1, 8, 8], strides = [1, 1, 1]} : vector<4x8x8xf32> to vector<1x8x8xf32>
    %115 = vector.shape_cast %114 : vector<1x8x8xf32> to vector<8x8xf32>
    %116 = vector.extract_strided_slice %113 {offsets = [1, 0, 0], sizes = [1, 8, 8], strides = [1, 1, 1]} : vector<4x8x8xf32> to vector<1x8x8xf32>
    %117 = vector.shape_cast %116 : vector<1x8x8xf32> to vector<8x8xf32>
    %118 = vector.extract_strided_slice %113 {offsets = [2, 0, 0], sizes = [1, 8, 8], strides = [1, 1, 1]} : vector<4x8x8xf32> to vector<1x8x8xf32>
    %119 = vector.shape_cast %118 : vector<1x8x8xf32> to vector<8x8xf32>
    %120 = vector.extract_strided_slice %113 {offsets = [3, 0, 0], sizes = [1, 8, 8], strides = [1, 1, 1]} : vector<4x8x8xf32> to vector<1x8x8xf32>
    %121 = vector.shape_cast %120 : vector<1x8x8xf32> to vector<8x8xf32>
    %122 = tpu.concatenate %115, %117, %119, %121 in 1 : vector<8x8xf32>, vector<8x8xf32>, vector<8x8xf32>, vector<8x8xf32> -> vector<8x32xf32>
    %123 = tpu.concatenate %71, %122 in 0 : vector<8x32xf32>, vector<8x32xf32> -> vector<16x32xf32>
    %c0_28 = arith.constant 0 : index
    %c0_29 = arith.constant 0 : index
    %124 = vector.load %arg9[%c0_28, %c0_29] : memref<32x32xf32, #tpu.memory_space<vmem>>, vector<32x32xf32>
    %cst_30 = arith.constant dense<0.000000e+00> : vector<16x32xf32>
    %125 = tpu.matmul %123, %124, %cst_30 {dimension_numbers = #tpu.dot_dimension_numbers<[1], [0], [0], [1], [0, 0, 1, 1], [], []>} : vector<16x32xf32>, vector<32x32xf32>, vector<16x32xf32> -> vector<16x32xf32>
    %c0_31 = arith.constant 0 : index
    %c0_32 = arith.constant 0 : index
    %126 = vector.load %arg10[%c0_31, %c0_32] : memref<1x32xf32, #tpu.memory_space<vmem>>, vector<1x32xf32>
    %127 = vector.broadcast %126 : vector<1x32xf32> to vector<16x32xf32>
    %128 = arith.addf %125, %127 : vector<16x32xf32>
    %129 = arith.addf %1, %128 : vector<16x32xf32>
    %c0_33 = arith.constant 0 : index
    %c0_34 = arith.constant 0 : index
    %130 = vector.load %arg23[%c0_33, %c0_34] : memref<1x32xf32, #tpu.memory_space<vmem>>, vector<1x32xf32>
    %c0_35 = arith.constant 0 : index
    %c0_36 = arith.constant 0 : index
    %131 = vector.load %arg24[%c0_35, %c0_36] : memref<1x32xf32, #tpu.memory_space<vmem>>, vector<1x32xf32>
    %cst_37 = arith.constant dense<0.000000e+00> : vector<16xf32>
    %132 = vector.multi_reduction <add>, %129, %cst_37 [1] : vector<16x32xf32> to vector<16xf32>
    %133 = vector.shape_cast %132 : vector<16xf32> to vector<16x1xf32>
    %cst_38 = arith.constant 3.200000e+01 : f32
    %134 = vector.broadcast %cst_38 : f32 to vector<16x1xf32>
    %135 = arith.divf %133, %134 : vector<16x1xf32>
    %136 = vector.broadcast %135 : vector<16x1xf32> to vector<16x32xf32>
    %137 = arith.subf %129, %136 : vector<16x32xf32>
    %138 = arith.mulf %137, %137 : vector<16x32xf32>
    %cst_39 = arith.constant dense<0.000000e+00> : vector<16xf32>
    %139 = vector.multi_reduction <add>, %138, %cst_39 [1] : vector<16x32xf32> to vector<16xf32>
    %140 = vector.shape_cast %139 : vector<16xf32> to vector<16x1xf32>
    %cst_40 = arith.constant 3.200000e+01 : f32
    %141 = vector.broadcast %cst_40 : f32 to vector<16x1xf32>
    %142 = arith.divf %140, %141 : vector<16x1xf32>
    %143 = vector.broadcast %135 : vector<16x1xf32> to vector<16x32xf32>
    %144 = arith.subf %129, %143 : vector<16x32xf32>
    %cst_41 = arith.constant 9.99999974E-6 : f32
    %145 = vector.broadcast %cst_41 : f32 to vector<16x1xf32>
    %146 = arith.addf %142, %145 : vector<16x1xf32>
    %147 = math.rsqrt %146 : vector<16x1xf32>
    %148 = vector.broadcast %147 : vector<16x1xf32> to vector<16x32xf32>
    %149 = arith.mulf %144, %148 : vector<16x32xf32>
    %150 = vector.broadcast %130 : vector<1x32xf32> to vector<16x32xf32>
    %151 = arith.mulf %149, %150 : vector<16x32xf32>
    %152 = vector.broadcast %131 : vector<1x32xf32> to vector<16x32xf32>
    %153 = arith.addf %151, %152 : vector<16x32xf32>
    %154 = arith.addf %153, %3 : vector<16x32xf32>
    %c0_42 = arith.constant 0 : index
    %c0_43 = arith.constant 0 : index
    %155 = vector.load %arg11[%c0_42, %c0_43] : memref<32x32xf32, #tpu.memory_space<vmem>>, vector<32x32xf32>
    %cst_44 = arith.constant dense<0.000000e+00> : vector<16x32xf32>
    %156 = tpu.matmul %154, %155, %cst_44 {dimension_numbers = #tpu.dot_dimension_numbers<[1], [0], [0], [1], [0, 0, 1, 1], [], []>} : vector<16x32xf32>, vector<32x32xf32>, vector<16x32xf32> -> vector<16x32xf32>
    %c0_45 = arith.constant 0 : index
    %c0_46 = arith.constant 0 : index
    %157 = vector.load %arg12[%c0_45, %c0_46] : memref<1x32xf32, #tpu.memory_space<vmem>>, vector<1x32xf32>
    %158 = vector.broadcast %157 : vector<1x32xf32> to vector<16x32xf32>
    %159 = arith.addf %156, %158 : vector<16x32xf32>
    %160 = arith.addf %5, %7 : vector<32x32xf32>
    %c0_47 = arith.constant 0 : index
    %c0_48 = arith.constant 0 : index
    %161 = vector.load %arg13[%c0_47, %c0_48] : memref<32x32xf32, #tpu.memory_space<vmem>>, vector<32x32xf32>
    %cst_49 = arith.constant dense<0.000000e+00> : vector<32x32xf32>
    %162 = tpu.matmul %160, %161, %cst_49 {dimension_numbers = #tpu.dot_dimension_numbers<[1], [0], [0], [1], [0, 0, 1, 1], [], []>} : vector<32x32xf32>, vector<32x32xf32>, vector<32x32xf32> -> vector<32x32xf32>
    %c0_50 = arith.constant 0 : index
    %c0_51 = arith.constant 0 : index
    %163 = vector.load %arg14[%c0_50, %c0_51] : memref<1x32xf32, #tpu.memory_space<vmem>>, vector<1x32xf32>
    %164 = vector.broadcast %163 : vector<1x32xf32> to vector<32x32xf32>
    %165 = arith.addf %162, %164 : vector<32x32xf32>
    %c0_52 = arith.constant 0 : index
    %c0_53 = arith.constant 0 : index
    %166 = vector.load %arg15[%c0_52, %c0_53] : memref<32x32xf32, #tpu.memory_space<vmem>>, vector<32x32xf32>
    %cst_54 = arith.constant dense<0.000000e+00> : vector<32x32xf32>
    %167 = tpu.matmul %5, %166, %cst_54 {dimension_numbers = #tpu.dot_dimension_numbers<[1], [0], [0], [1], [0, 0, 1, 1], [], []>} : vector<32x32xf32>, vector<32x32xf32>, vector<32x32xf32> -> vector<32x32xf32>
    %c0_55 = arith.constant 0 : index
    %c0_56 = arith.constant 0 : index
    %168 = vector.load %arg16[%c0_55, %c0_56] : memref<1x32xf32, #tpu.memory_space<vmem>>, vector<1x32xf32>
    %169 = vector.broadcast %168 : vector<1x32xf32> to vector<32x32xf32>
    %170 = arith.addf %167, %169 : vector<32x32xf32>
    %171 = vector.extract_strided_slice %159 {offsets = [0, 0], sizes = [8, 32], strides = [1, 1]} : vector<16x32xf32> to vector<8x32xf32>
    %172 = vector.extract_strided_slice %165 {offsets = [0, 0], sizes = [16, 32], strides = [1, 1]} : vector<32x32xf32> to vector<16x32xf32>
    %173 = vector.extract_strided_slice %170 {offsets = [0, 0], sizes = [16, 32], strides = [1, 1]} : vector<32x32xf32> to vector<16x32xf32>
    %174 = vector.extract_strided_slice %171 {offsets = [0, 0], sizes = [8, 8], strides = [1, 1]} : vector<8x32xf32> to vector<8x8xf32>
    %175 = vector.extract_strided_slice %171 {offsets = [0, 8], sizes = [8, 8], strides = [1, 1]} : vector<8x32xf32> to vector<8x8xf32>
    %176 = vector.extract_strided_slice %171 {offsets = [0, 16], sizes = [8, 8], strides = [1, 1]} : vector<8x32xf32> to vector<8x8xf32>
    %177 = vector.extract_strided_slice %171 {offsets = [0, 24], sizes = [8, 8], strides = [1, 1]} : vector<8x32xf32> to vector<8x8xf32>
    %178 = vector.shape_cast %174 : vector<8x8xf32> to vector<1x8x8xf32>
    %179 = vector.shape_cast %175 : vector<8x8xf32> to vector<1x8x8xf32>
    %180 = vector.shape_cast %176 : vector<8x8xf32> to vector<1x8x8xf32>
    %181 = vector.shape_cast %177 : vector<8x8xf32> to vector<1x8x8xf32>
    %182 = tpu.concatenate %178, %179, %180, %181 in 0 : vector<1x8x8xf32>, vector<1x8x8xf32>, vector<1x8x8xf32>, vector<1x8x8xf32> -> vector<4x8x8xf32>
    %183 = vector.extract_strided_slice %172 {offsets = [0, 0], sizes = [16, 8], strides = [1, 1]} : vector<16x32xf32> to vector<16x8xf32>
    %184 = vector.extract_strided_slice %172 {offsets = [0, 8], sizes = [16, 8], strides = [1, 1]} : vector<16x32xf32> to vector<16x8xf32>
    %185 = vector.extract_strided_slice %172 {offsets = [0, 16], sizes = [16, 8], strides = [1, 1]} : vector<16x32xf32> to vector<16x8xf32>
    %186 = vector.extract_strided_slice %172 {offsets = [0, 24], sizes = [16, 8], strides = [1, 1]} : vector<16x32xf32> to vector<16x8xf32>
    %187 = vector.shape_cast %183 : vector<16x8xf32> to vector<1x16x8xf32>
    %188 = vector.shape_cast %184 : vector<16x8xf32> to vector<1x16x8xf32>
    %189 = vector.shape_cast %185 : vector<16x8xf32> to vector<1x16x8xf32>
    %190 = vector.shape_cast %186 : vector<16x8xf32> to vector<1x16x8xf32>
    %191 = tpu.concatenate %187, %188, %189, %190 in 0 : vector<1x16x8xf32>, vector<1x16x8xf32>, vector<1x16x8xf32>, vector<1x16x8xf32> -> vector<4x16x8xf32>
    %192 = vector.extract_strided_slice %173 {offsets = [0, 0], sizes = [16, 8], strides = [1, 1]} : vector<16x32xf32> to vector<16x8xf32>
    %193 = vector.extract_strided_slice %173 {offsets = [0, 8], sizes = [16, 8], strides = [1, 1]} : vector<16x32xf32> to vector<16x8xf32>
    %194 = vector.extract_strided_slice %173 {offsets = [0, 16], sizes = [16, 8], strides = [1, 1]} : vector<16x32xf32> to vector<16x8xf32>
    %195 = vector.extract_strided_slice %173 {offsets = [0, 24], sizes = [16, 8], strides = [1, 1]} : vector<16x32xf32> to vector<16x8xf32>
    %196 = vector.shape_cast %192 : vector<16x8xf32> to vector<1x16x8xf32>
    %197 = vector.shape_cast %193 : vector<16x8xf32> to vector<1x16x8xf32>
    %198 = vector.shape_cast %194 : vector<16x8xf32> to vector<1x16x8xf32>
    %199 = vector.shape_cast %195 : vector<16x8xf32> to vector<1x16x8xf32>
    %200 = tpu.concatenate %196, %197, %198, %199 in 0 : vector<1x16x8xf32>, vector<1x16x8xf32>, vector<1x16x8xf32>, vector<1x16x8xf32> -> vector<4x16x8xf32>
    "tpu.trace_start"() <{level = 10 : i32, message = "htd,hsd->hts"}> : () -> ()
    %cst_57 = arith.constant dense<0.000000e+00> : vector<4x8x16xf32>
    %201 = tpu.matmul %182, %191, %cst_57 {dimension_numbers = #tpu.dot_dimension_numbers<[2], [2], [1], [1], [0, 0, 0, 1, 1, 1], [0], [0]>} : vector<4x8x8xf32>, vector<4x16x8xf32>, vector<4x8x16xf32> -> vector<4x8x16xf32>
    "tpu.trace_stop"() : () -> ()
    %cst_58 = arith.constant dense<0xFF800000> : vector<4x8xf32>
    %202 = vector.multi_reduction <maximumf>, %201, %cst_58 [2] : vector<4x8x16xf32> to vector<4x8xf32>
    %203 = vector.shape_cast %202 : vector<4x8xf32> to vector<4x8x1xf32>
    %204 = vector.broadcast %203 : vector<4x8x1xf32> to vector<4x8x16xf32>
    %205 = arith.subf %201, %204 : vector<4x8x16xf32>
    %206 = math.exp %205 : vector<4x8x16xf32>
    %cst_59 = arith.constant dense<0.000000e+00> : vector<4x8xf32>
    %207 = vector.multi_reduction <add>, %206, %cst_59 [2] : vector<4x8x16xf32> to vector<4x8xf32>
    %208 = vector.shape_cast %207 : vector<4x8xf32> to vector<4x8x1xf32>
    %209 = tpu.reciprocal %208 {approx = true} : vector<4x8x1xf32> -> vector<4x8x1xf32>
    %210 = vector.broadcast %209 : vector<4x8x1xf32> to vector<4x8x16xf32>
    %211 = arith.mulf %206, %210 : vector<4x8x16xf32>
    "tpu.trace_start"() <{level = 10 : i32, message = "hts,hsd->htd"}> : () -> ()
    %cst_60 = arith.constant dense<0.000000e+00> : vector<4x8x8xf32>
    %212 = tpu.matmul %211, %200, %cst_60 {dimension_numbers = #tpu.dot_dimension_numbers<[2], [1], [1], [2], [0, 0, 0, 1, 1, 2], [0], [0]>} : vector<4x8x16xf32>, vector<4x16x8xf32>, vector<4x8x8xf32> -> vector<4x8x8xf32>
    "tpu.trace_stop"() : () -> ()
    %213 = vector.extract_strided_slice %212 {offsets = [0, 0, 0], sizes = [1, 8, 8], strides = [1, 1, 1]} : vector<4x8x8xf32> to vector<1x8x8xf32>
    %214 = vector.shape_cast %213 : vector<1x8x8xf32> to vector<8x8xf32>
    %215 = vector.extract_strided_slice %212 {offsets = [1, 0, 0], sizes = [1, 8, 8], strides = [1, 1, 1]} : vector<4x8x8xf32> to vector<1x8x8xf32>
    %216 = vector.shape_cast %215 : vector<1x8x8xf32> to vector<8x8xf32>
    %217 = vector.extract_strided_slice %212 {offsets = [2, 0, 0], sizes = [1, 8, 8], strides = [1, 1, 1]} : vector<4x8x8xf32> to vector<1x8x8xf32>
    %218 = vector.shape_cast %217 : vector<1x8x8xf32> to vector<8x8xf32>
    %219 = vector.extract_strided_slice %212 {offsets = [3, 0, 0], sizes = [1, 8, 8], strides = [1, 1, 1]} : vector<4x8x8xf32> to vector<1x8x8xf32>
    %220 = vector.shape_cast %219 : vector<1x8x8xf32> to vector<8x8xf32>
    %221 = tpu.concatenate %214, %216, %218, %220 in 1 : vector<8x8xf32>, vector<8x8xf32>, vector<8x8xf32>, vector<8x8xf32> -> vector<8x32xf32>
    %222 = vector.extract_strided_slice %159 {offsets = [8, 0], sizes = [8, 32], strides = [1, 1]} : vector<16x32xf32> to vector<8x32xf32>
    %223 = vector.extract_strided_slice %165 {offsets = [16, 0], sizes = [16, 32], strides = [1, 1]} : vector<32x32xf32> to vector<16x32xf32>
    %224 = vector.extract_strided_slice %170 {offsets = [16, 0], sizes = [16, 32], strides = [1, 1]} : vector<32x32xf32> to vector<16x32xf32>
    %225 = vector.extract_strided_slice %222 {offsets = [0, 0], sizes = [8, 8], strides = [1, 1]} : vector<8x32xf32> to vector<8x8xf32>
    %226 = vector.extract_strided_slice %222 {offsets = [0, 8], sizes = [8, 8], strides = [1, 1]} : vector<8x32xf32> to vector<8x8xf32>
    %227 = vector.extract_strided_slice %222 {offsets = [0, 16], sizes = [8, 8], strides = [1, 1]} : vector<8x32xf32> to vector<8x8xf32>
    %228 = vector.extract_strided_slice %222 {offsets = [0, 24], sizes = [8, 8], strides = [1, 1]} : vector<8x32xf32> to vector<8x8xf32>
    %229 = vector.shape_cast %225 : vector<8x8xf32> to vector<1x8x8xf32>
    %230 = vector.shape_cast %226 : vector<8x8xf32> to vector<1x8x8xf32>
    %231 = vector.shape_cast %227 : vector<8x8xf32> to vector<1x8x8xf32>
    %232 = vector.shape_cast %228 : vector<8x8xf32> to vector<1x8x8xf32>
    %233 = tpu.concatenate %229, %230, %231, %232 in 0 : vector<1x8x8xf32>, vector<1x8x8xf32>, vector<1x8x8xf32>, vector<1x8x8xf32> -> vector<4x8x8xf32>
    %234 = vector.extract_strided_slice %223 {offsets = [0, 0], sizes = [16, 8], strides = [1, 1]} : vector<16x32xf32> to vector<16x8xf32>
    %235 = vector.extract_strided_slice %223 {offsets = [0, 8], sizes = [16, 8], strides = [1, 1]} : vector<16x32xf32> to vector<16x8xf32>
    %236 = vector.extract_strided_slice %223 {offsets = [0, 16], sizes = [16, 8], strides = [1, 1]} : vector<16x32xf32> to vector<16x8xf32>
    %237 = vector.extract_strided_slice %223 {offsets = [0, 24], sizes = [16, 8], strides = [1, 1]} : vector<16x32xf32> to vector<16x8xf32>
    %238 = vector.shape_cast %234 : vector<16x8xf32> to vector<1x16x8xf32>
    %239 = vector.shape_cast %235 : vector<16x8xf32> to vector<1x16x8xf32>
    %240 = vector.shape_cast %236 : vector<16x8xf32> to vector<1x16x8xf32>
    %241 = vector.shape_cast %237 : vector<16x8xf32> to vector<1x16x8xf32>
    %242 = tpu.concatenate %238, %239, %240, %241 in 0 : vector<1x16x8xf32>, vector<1x16x8xf32>, vector<1x16x8xf32>, vector<1x16x8xf32> -> vector<4x16x8xf32>
    %243 = vector.extract_strided_slice %224 {offsets = [0, 0], sizes = [16, 8], strides = [1, 1]} : vector<16x32xf32> to vector<16x8xf32>
    %244 = vector.extract_strided_slice %224 {offsets = [0, 8], sizes = [16, 8], strides = [1, 1]} : vector<16x32xf32> to vector<16x8xf32>
    %245 = vector.extract_strided_slice %224 {offsets = [0, 16], sizes = [16, 8], strides = [1, 1]} : vector<16x32xf32> to vector<16x8xf32>
    %246 = vector.extract_strided_slice %224 {offsets = [0, 24], sizes = [16, 8], strides = [1, 1]} : vector<16x32xf32> to vector<16x8xf32>
    %247 = vector.shape_cast %243 : vector<16x8xf32> to vector<1x16x8xf32>
    %248 = vector.shape_cast %244 : vector<16x8xf32> to vector<1x16x8xf32>
    %249 = vector.shape_cast %245 : vector<16x8xf32> to vector<1x16x8xf32>
    %250 = vector.shape_cast %246 : vector<16x8xf32> to vector<1x16x8xf32>
    %251 = tpu.concatenate %247, %248, %249, %250 in 0 : vector<1x16x8xf32>, vector<1x16x8xf32>, vector<1x16x8xf32>, vector<1x16x8xf32> -> vector<4x16x8xf32>
    "tpu.trace_start"() <{level = 10 : i32, message = "htd,hsd->hts"}> : () -> ()
    %cst_61 = arith.constant dense<0.000000e+00> : vector<4x8x16xf32>
    %252 = tpu.matmul %233, %242, %cst_61 {dimension_numbers = #tpu.dot_dimension_numbers<[2], [2], [1], [1], [0, 0, 0, 1, 1, 1], [0], [0]>} : vector<4x8x8xf32>, vector<4x16x8xf32>, vector<4x8x16xf32> -> vector<4x8x16xf32>
    "tpu.trace_stop"() : () -> ()
    %cst_62 = arith.constant dense<0xFF800000> : vector<4x8xf32>
    %253 = vector.multi_reduction <maximumf>, %252, %cst_62 [2] : vector<4x8x16xf32> to vector<4x8xf32>
    %254 = vector.shape_cast %253 : vector<4x8xf32> to vector<4x8x1xf32>
    %255 = vector.broadcast %254 : vector<4x8x1xf32> to vector<4x8x16xf32>
    %256 = arith.subf %252, %255 : vector<4x8x16xf32>
    %257 = math.exp %256 : vector<4x8x16xf32>
    %cst_63 = arith.constant dense<0.000000e+00> : vector<4x8xf32>
    %258 = vector.multi_reduction <add>, %257, %cst_63 [2] : vector<4x8x16xf32> to vector<4x8xf32>
    %259 = vector.shape_cast %258 : vector<4x8xf32> to vector<4x8x1xf32>
    %260 = tpu.reciprocal %259 {approx = true} : vector<4x8x1xf32> -> vector<4x8x1xf32>
    %261 = vector.broadcast %260 : vector<4x8x1xf32> to vector<4x8x16xf32>
    %262 = arith.mulf %257, %261 : vector<4x8x16xf32>
    "tpu.trace_start"() <{level = 10 : i32, message = "hts,hsd->htd"}> : () -> ()
    %cst_64 = arith.constant dense<0.000000e+00> : vector<4x8x8xf32>
    %263 = tpu.matmul %262, %251, %cst_64 {dimension_numbers = #tpu.dot_dimension_numbers<[2], [1], [1], [2], [0, 0, 0, 1, 1, 2], [0], [0]>} : vector<4x8x16xf32>, vector<4x16x8xf32>, vector<4x8x8xf32> -> vector<4x8x8xf32>
    "tpu.trace_stop"() : () -> ()
    %264 = vector.extract_strided_slice %263 {offsets = [0, 0, 0], sizes = [1, 8, 8], strides = [1, 1, 1]} : vector<4x8x8xf32> to vector<1x8x8xf32>
    %265 = vector.shape_cast %264 : vector<1x8x8xf32> to vector<8x8xf32>
    %266 = vector.extract_strided_slice %263 {offsets = [1, 0, 0], sizes = [1, 8, 8], strides = [1, 1, 1]} : vector<4x8x8xf32> to vector<1x8x8xf32>
    %267 = vector.shape_cast %266 : vector<1x8x8xf32> to vector<8x8xf32>
    %268 = vector.extract_strided_slice %263 {offsets = [2, 0, 0], sizes = [1, 8, 8], strides = [1, 1, 1]} : vector<4x8x8xf32> to vector<1x8x8xf32>
    %269 = vector.shape_cast %268 : vector<1x8x8xf32> to vector<8x8xf32>
    %270 = vector.extract_strided_slice %263 {offsets = [3, 0, 0], sizes = [1, 8, 8], strides = [1, 1, 1]} : vector<4x8x8xf32> to vector<1x8x8xf32>
    %271 = vector.shape_cast %270 : vector<1x8x8xf32> to vector<8x8xf32>
    %272 = tpu.concatenate %265, %267, %269, %271 in 1 : vector<8x8xf32>, vector<8x8xf32>, vector<8x8xf32>, vector<8x8xf32> -> vector<8x32xf32>
    %273 = tpu.concatenate %221, %272 in 0 : vector<8x32xf32>, vector<8x32xf32> -> vector<16x32xf32>
    %c0_65 = arith.constant 0 : index
    %c0_66 = arith.constant 0 : index
    %274 = vector.load %arg17[%c0_65, %c0_66] : memref<32x32xf32, #tpu.memory_space<vmem>>, vector<32x32xf32>
    %cst_67 = arith.constant dense<0.000000e+00> : vector<16x32xf32>
    %275 = tpu.matmul %273, %274, %cst_67 {dimension_numbers = #tpu.dot_dimension_numbers<[1], [0], [0], [1], [0, 0, 1, 1], [], []>} : vector<16x32xf32>, vector<32x32xf32>, vector<16x32xf32> -> vector<16x32xf32>
    %c0_68 = arith.constant 0 : index
    %c0_69 = arith.constant 0 : index
    %276 = vector.load %arg18[%c0_68, %c0_69] : memref<1x32xf32, #tpu.memory_space<vmem>>, vector<1x32xf32>
    %277 = vector.broadcast %276 : vector<1x32xf32> to vector<16x32xf32>
    %278 = arith.addf %275, %277 : vector<16x32xf32>
    %279 = arith.addf %153, %278 : vector<16x32xf32>
    %c0_70 = arith.constant 0 : index
    %c0_71 = arith.constant 0 : index
    %280 = vector.load %arg25[%c0_70, %c0_71] : memref<1x32xf32, #tpu.memory_space<vmem>>, vector<1x32xf32>
    %c0_72 = arith.constant 0 : index
    %c0_73 = arith.constant 0 : index
    %281 = vector.load %arg26[%c0_72, %c0_73] : memref<1x32xf32, #tpu.memory_space<vmem>>, vector<1x32xf32>
    %cst_74 = arith.constant dense<0.000000e+00> : vector<16xf32>
    %282 = vector.multi_reduction <add>, %279, %cst_74 [1] : vector<16x32xf32> to vector<16xf32>
    %283 = vector.shape_cast %282 : vector<16xf32> to vector<16x1xf32>
    %cst_75 = arith.constant 3.200000e+01 : f32
    %284 = vector.broadcast %cst_75 : f32 to vector<16x1xf32>
    %285 = arith.divf %283, %284 : vector<16x1xf32>
    %286 = vector.broadcast %285 : vector<16x1xf32> to vector<16x32xf32>
    %287 = arith.subf %279, %286 : vector<16x32xf32>
    %288 = arith.mulf %287, %287 : vector<16x32xf32>
    %cst_76 = arith.constant dense<0.000000e+00> : vector<16xf32>
    %289 = vector.multi_reduction <add>, %288, %cst_76 [1] : vector<16x32xf32> to vector<16xf32>
    %290 = vector.shape_cast %289 : vector<16xf32> to vector<16x1xf32>
    %cst_77 = arith.constant 3.200000e+01 : f32
    %291 = vector.broadcast %cst_77 : f32 to vector<16x1xf32>
    %292 = arith.divf %290, %291 : vector<16x1xf32>
    %293 = vector.broadcast %285 : vector<16x1xf32> to vector<16x32xf32>
    %294 = arith.subf %279, %293 : vector<16x32xf32>
    %cst_78 = arith.constant 9.99999974E-6 : f32
    %295 = vector.broadcast %cst_78 : f32 to vector<16x1xf32>
    %296 = arith.addf %292, %295 : vector<16x1xf32>
    %297 = math.rsqrt %296 : vector<16x1xf32>
    %298 = vector.broadcast %297 : vector<16x1xf32> to vector<16x32xf32>
    %299 = arith.mulf %294, %298 : vector<16x32xf32>
    %300 = vector.broadcast %280 : vector<1x32xf32> to vector<16x32xf32>
    %301 = arith.mulf %299, %300 : vector<16x32xf32>
    %302 = vector.broadcast %281 : vector<1x32xf32> to vector<16x32xf32>
    %303 = arith.addf %301, %302 : vector<16x32xf32>
    %c0_79 = arith.constant 0 : index
    %c0_80 = arith.constant 0 : index
    %304 = vector.load %arg19[%c0_79, %c0_80] : memref<32x64xf32, #tpu.memory_space<vmem>>, vector<32x64xf32>
    %cst_81 = arith.constant dense<0.000000e+00> : vector<16x64xf32>
    %305 = tpu.matmul %303, %304, %cst_81 {dimension_numbers = #tpu.dot_dimension_numbers<[1], [0], [0], [1], [0, 0, 1, 1], [], []>} : vector<16x32xf32>, vector<32x64xf32>, vector<16x64xf32> -> vector<16x64xf32>
    %c0_82 = arith.constant 0 : index
    %c0_83 = arith.constant 0 : index
    %306 = vector.load %arg20[%c0_82, %c0_83] : memref<1x64xf32, #tpu.memory_space<vmem>>, vector<1x64xf32>
    %307 = vector.broadcast %306 : vector<1x64xf32> to vector<16x64xf32>
    %308 = arith.addf %305, %307 : vector<16x64xf32>
    %cst_84 = arith.constant 0.000000e+00 : f32
    %309 = vector.broadcast %cst_84 : f32 to vector<16x64xf32>
    %310 = arith.maximumf %308, %309 : vector<16x64xf32>
    %c0_85 = arith.constant 0 : index
    %c0_86 = arith.constant 0 : index
    %311 = vector.load %arg21[%c0_85, %c0_86] : memref<64x32xf32, #tpu.memory_space<vmem>>, vector<64x32xf32>
    %cst_87 = arith.constant dense<0.000000e+00> : vector<16x32xf32>
    %312 = tpu.matmul %310, %311, %cst_87 {dimension_numbers = #tpu.dot_dimension_numbers<[1], [0], [0], [1], [0, 0, 1, 1], [], []>} : vector<16x64xf32>, vector<64x32xf32>, vector<16x32xf32> -> vector<16x32xf32>
    %c0_88 = arith.constant 0 : index
    %c0_89 = arith.constant 0 : index
    %313 = vector.load %arg22[%c0_88, %c0_89] : memref<1x32xf32, #tpu.memory_space<vmem>>, vector<1x32xf32>
    %314 = vector.broadcast %313 : vector<1x32xf32> to vector<16x32xf32>
    %315 = arith.addf %312, %314 : vector<16x32xf32>
    %316 = arith.addf %303, %315 : vector<16x32xf32>
    %c0_90 = arith.constant 0 : index
    %c0_91 = arith.constant 0 : index
    %317 = vector.load %arg27[%c0_90, %c0_91] : memref<1x32xf32, #tpu.memory_space<vmem>>, vector<1x32xf32>
    %c0_92 = arith.constant 0 : index
    %c0_93 = arith.constant 0 : index
    %318 = vector.load %arg28[%c0_92, %c0_93] : memref<1x32xf32, #tpu.memory_space<vmem>>, vector<1x32xf32>
    %cst_94 = arith.constant dense<0.000000e+00> : vector<16xf32>
    %319 = vector.multi_reduction <add>, %316, %cst_94 [1] : vector<16x32xf32> to vector<16xf32>
    %320 = vector.shape_cast %319 : vector<16xf32> to vector<16x1xf32>
    %cst_95 = arith.constant 3.200000e+01 : f32
    %321 = vector.broadcast %cst_95 : f32 to vector<16x1xf32>
    %322 = arith.divf %320, %321 : vector<16x1xf32>
    %323 = vector.broadcast %322 : vector<16x1xf32> to vector<16x32xf32>
    %324 = arith.subf %316, %323 : vector<16x32xf32>
    %325 = arith.mulf %324, %324 : vector<16x32xf32>
    %cst_96 = arith.constant dense<0.000000e+00> : vector<16xf32>
    %326 = vector.multi_reduction <add>, %325, %cst_96 [1] : vector<16x32xf32> to vector<16xf32>
    %327 = vector.shape_cast %326 : vector<16xf32> to vector<16x1xf32>
    %cst_97 = arith.constant 3.200000e+01 : f32
    %328 = vector.broadcast %cst_97 : f32 to vector<16x1xf32>
    %329 = arith.divf %327, %328 : vector<16x1xf32>
    %330 = vector.broadcast %322 : vector<16x1xf32> to vector<16x32xf32>
    %331 = arith.subf %316, %330 : vector<16x32xf32>
    %cst_98 = arith.constant 9.99999974E-6 : f32
    %332 = vector.broadcast %cst_98 : f32 to vector<16x1xf32>
    %333 = arith.addf %329, %332 : vector<16x1xf32>
    %334 = math.rsqrt %333 : vector<16x1xf32>
    %335 = vector.broadcast %334 : vector<16x1xf32> to vector<16x32xf32>
    %336 = arith.mulf %331, %335 : vector<16x32xf32>
    %337 = vector.broadcast %317 : vector<1x32xf32> to vector<16x32xf32>
    %338 = arith.mulf %336, %337 : vector<16x32xf32>
    %339 = vector.broadcast %318 : vector<1x32xf32> to vector<16x32xf32>
    %340 = arith.addf %338, %339 : vector<16x32xf32>
    %341 = vector.shape_cast %340 : vector<16x32xf32> to vector<2x8x32xf32>
    %c0_99 = arith.constant 0 : index
    %c0_100 = arith.constant 0 : index
    %c0_101 = arith.constant 0 : index
    %342 = vector.load %arg29[%c0_99, %c0_100, %c0_101] : memref<2x8x32xf32, #tpu.memory_space<vmem>>, vector<2x8x32xf32>
    tpu.vector_store %arg29[%c0_99, %c0_100, %c0_101], %341 {strides = array<i32>} : memref<2x8x32xf32, #tpu.memory_space<vmem>>, vector<2x8x32xf32>,
    return
  }
  func.func @transform_0(%arg0: i32) -> (i32, i32, i32) {
    %c0_i32 = arith.constant 0 : i32
    %c0_i32_0 = arith.constant 0 : i32
    %c0_i32_1 = arith.constant 0 : i32
    return %arg0, %c0_i32, %c0_i32_0 : i32, i32, i32
  }
  func.func @transform_1(%arg0: i32) -> (i32, i32, i32) {
    %c0_i32 = arith.constant 0 : i32
    %c0_i32_0 = arith.constant 0 : i32
    %c0_i32_1 = arith.constant 0 : i32
    return %arg0, %c0_i32, %c0_i32_0 : i32, i32, i32
  }
  func.func @transform_2(%arg0: i32) -> (i32, i32, i32) {
    %c0_i32 = arith.constant 0 : i32
    %c0_i32_0 = arith.constant 0 : i32
    %c0_i32_1 = arith.constant 0 : i32
    return %arg0, %c0_i32, %c0_i32_0 : i32, i32, i32
  }
  func.func @transform_3(%arg0: i32) -> (i32, i32, i32) {
    %c0_i32 = arith.constant 0 : i32
    %c0_i32_0 = arith.constant 0 : i32
    %c0_i32_1 = arith.constant 0 : i32
    return %arg0, %c0_i32, %c0_i32_0 : i32, i32, i32
  }
  func.func @transform_4(%arg0: i32) -> (i32, i32) {
    %c0_i32 = arith.constant 0 : i32
    %c0_i32_0 = arith.constant 0 : i32
    %c0_i32_1 = arith.constant 0 : i32
    return %c0_i32, %c0_i32_0 : i32, i32
  }
  func.func @transform_5(%arg0: i32) -> (i32, i32) {
    %c0_i32 = arith.constant 0 : i32
    %c0_i32_0 = arith.constant 0 : i32
    %c0_i32_1 = arith.constant 0 : i32
    return %c0_i32, %c0_i32_0 : i32, i32
  }
  func.func @transform_6(%arg0: i32) -> (i32, i32) {
    %c0_i32 = arith.constant 0 : i32
    %c0_i32_0 = arith.constant 0 : i32
    %c0_i32_1 = arith.constant 0 : i32
    return %c0_i32, %c0_i32_0 : i32, i32
  }
  func.func @transform_7(%arg0: i32) -> (i32, i32) {
    %c0_i32 = arith.constant 0 : i32
    %c0_i32_0 = arith.constant 0 : i32
    %c0_i32_1 = arith.constant 0 : i32
    return %c0_i32, %c0_i32_0 : i32, i32
  }
  func.func @transform_8(%arg0: i32) -> (i32, i32) {
    %c0_i32 = arith.constant 0 : i32
    %c0_i32_0 = arith.constant 0 : i32
    %c0_i32_1 = arith.constant 0 : i32
    return %c0_i32, %c0_i32_0 : i32, i32
  }
  func.func @transform_9(%arg0: i32) -> (i32, i32) {
    %c0_i32 = arith.constant 0 : i32
    %c0_i32_0 = arith.constant 0 : i32
    %c0_i32_1 = arith.constant 0 : i32
    return %c0_i32, %c0_i32_0 : i32, i32
  }
  func.func @transform_10(%arg0: i32) -> (i32, i32) {
    %c0_i32 = arith.constant 0 : i32
    %c0_i32_0 = arith.constant 0 : i32
    %c0_i32_1 = arith.constant 0 : i32
    return %c0_i32, %c0_i32_0 : i32, i32
  }
  func.func @transform_11(%arg0: i32) -> (i32, i32) {
    %c0_i32 = arith.constant 0 : i32
    %c0_i32_0 = arith.constant 0 : i32
    %c0_i32_1 = arith.constant 0 : i32
    return %c0_i32, %c0_i32_0 : i32, i32
  }
  func.func @transform_12(%arg0: i32) -> (i32, i32) {
    %c0_i32 = arith.constant 0 : i32
    %c0_i32_0 = arith.constant 0 : i32
    %c0_i32_1 = arith.constant 0 : i32
    return %c0_i32, %c0_i32_0 : i32, i32
  }
  func.func @transform_13(%arg0: i32) -> (i32, i32) {
    %c0_i32 = arith.constant 0 : i32
    %c0_i32_0 = arith.constant 0 : i32
    %c0_i32_1 = arith.constant 0 : i32
    return %c0_i32, %c0_i32_0 : i32, i32
  }
  func.func @transform_14(%arg0: i32) -> (i32, i32) {
    %c0_i32 = arith.constant 0 : i32
    %c0_i32_0 = arith.constant 0 : i32
    %c0_i32_1 = arith.constant 0 : i32
    return %c0_i32, %c0_i32_0 : i32, i32
  }
  func.func @transform_15(%arg0: i32) -> (i32, i32) {
    %c0_i32 = arith.constant 0 : i32
    %c0_i32_0 = arith.constant 0 : i32
    %c0_i32_1 = arith.constant 0 : i32
    return %c0_i32, %c0_i32_0 : i32, i32
  }
  func.func @transform_16(%arg0: i32) -> (i32, i32) {
    %c0_i32 = arith.constant 0 : i32
    %c0_i32_0 = arith.constant 0 : i32
    %c0_i32_1 = arith.constant 0 : i32
    return %c0_i32, %c0_i32_0 : i32, i32
  }
  func.func @transform_17(%arg0: i32) -> (i32, i32) {
    %c0_i32 = arith.constant 0 : i32
    %c0_i32_0 = arith.constant 0 : i32
    %c0_i32_1 = arith.constant 0 : i32
    return %c0_i32, %c0_i32_0 : i32, i32
  }
  func.func @transform_18(%arg0: i32) -> (i32, i32) {
    %c0_i32 = arith.constant 0 : i32
    %c0_i32_0 = arith.constant 0 : i32
    %c0_i32_1 = arith.constant 0 : i32
    return %c0_i32, %c0_i32_0 : i32, i32
  }
  func.func @transform_19(%arg0: i32) -> (i32, i32) {
    %c0_i32 = arith.constant 0 : i32
    %c0_i32_0 = arith.constant 0 : i32
    %c0_i32_1 = arith.constant 0 : i32
    return %c0_i32, %c0_i32_0 : i32, i32
  }
  func.func @transform_20(%arg0: i32) -> (i32, i32) {
    %c0_i32 = arith.constant 0 : i32
    %c0_i32_0 = arith.constant 0 : i32
    %c0_i32_1 = arith.constant 0 : i32
    return %c0_i32, %c0_i32_0 : i32, i32
  }
  func.func @transform_21(%arg0: i32) -> (i32, i32) {
    %c0_i32 = arith.constant 0 : i32
    %c0_i32_0 = arith.constant 0 : i32
    %c0_i32_1 = arith.constant 0 : i32
    return %c0_i32, %c0_i32_0 : i32, i32
  }
  func.func @transform_22(%arg0: i32) -> (i32, i32) {
    %c0_i32 = arith.constant 0 : i32
    %c0_i32_0 = arith.constant 0 : i32
    %c0_i32_1 = arith.constant 0 : i32
    return %c0_i32, %c0_i32_0 : i32, i32
  }
  func.func @transform_23(%arg0: i32) -> (i32, i32) {
    %c0_i32 = arith.constant 0 : i32
    %c0_i32_0 = arith.constant 0 : i32
    %c0_i32_1 = arith.constant 0 : i32
    return %c0_i32, %c0_i32_0 : i32, i32
  }
  func.func @transform_24(%arg0: i32) -> (i32, i32) {
    %c0_i32 = arith.constant 0 : i32
    %c0_i32_0 = arith.constant 0 : i32
    %c0_i32_1 = arith.constant 0 : i32
    return %c0_i32, %c0_i32_0 : i32, i32
  }
  func.func @transform_25(%arg0: i32) -> (i32, i32) {
    %c0_i32 = arith.constant 0 : i32
    %c0_i32_0 = arith.constant 0 : i32
    %c0_i32_1 = arith.constant 0 : i32
    return %c0_i32, %c0_i32_0 : i32, i32
  }
  func.func @transform_26(%arg0: i32) -> (i32, i32) {
    %c0_i32 = arith.constant 0 : i32
    %c0_i32_0 = arith.constant 0 : i32
    %c0_i32_1 = arith.constant 0 : i32
    return %c0_i32, %c0_i32_0 : i32, i32
  }
  func.func @transform_27(%arg0: i32) -> (i32, i32) {
    %c0_i32 = arith.constant 0 : i32
    %c0_i32_0 = arith.constant 0 : i32
    %c0_i32_1 = arith.constant 0 : i32
    return %c0_i32, %c0_i32_0 : i32, i32
  }
  func.func @transform_28(%arg0: i32) -> (i32, i32, i32) {
    %c0_i32 = arith.constant 0 : i32
    %c0_i32_0 = arith.constant 0 : i32
    %c0_i32_1 = arith.constant 0 : i32
    return %arg0, %c0_i32, %c0_i32_0 : i32, i32, i32
  }
}

</mosaic_0001>

<bundles_post_ra>
// kernel: tpu_custom_call.1
= control target key start
LH: loop header
LB: loop body
LE: loop exit
PB: predicated region body
PF: predicated region fallthrough
CT: control target
= control target key end

     0   :  { %s9031_s0 = inlined_call_operand.hbm [shape: f32[4,8,32], index: 0, kind: input, shape index: {}]   ;;  %s9032_s1 = inlined_call_operand.hbm [shape: f32[4,16,32], index: 1, kind: input, shape index: {}]   ;;  %s9033_s2 = inlined_call_operand.hbm [shape: f32[4,8,32], index: 2, kind: input, shape index: {}]   ;;  %s9034_s3 = inlined_call_operand.hbm [shape: f32[4,16,32], index: 3, kind: input, shape index: {}]   ;;  %s9035_s4 = inlined_call_operand.hbm [shape: f32[32,64], index: 4, kind: input, shape index: {}]   ;;  %s9036_s5 = inlined_call_operand.hbm [shape: f32[1,64], index: 5, kind: input, shape index: {}]   ;;  %s9037_s6 = inlined_call_operand.hbm [shape: f32[32,32], index: 6, kind: input, shape index: {}]   ;;  %s9038_s7 = inlined_call_operand.hbm [shape: f32[1,32], index: 7, kind: input, shape index: {}]   ;;  %s9039_s8 = inlined_call_operand.hbm [shape: f32[32,32], index: 8, kind: input, shape index: {}]   ;;  %s9040_s9 = inlined_call_operand.hbm [shape: f32[1,32], index: 9, kind: input, shape index: {}]   ;;  %s9041_s10 = inlined_call_operand.hbm [shape: f32[32,32], index: 10, kind: input, shape index: {}]   ;;  %s9042_s11 = inlined_call_operand.hbm [shape: f32[1,32], index: 11, kind: input, shape index: {}]   ;;  %s9043_s12 = inlined_call_operand.hbm [shape: f32[32,32], index: 12, kind: input, shape index: {}]   ;;  %s9044_s13 = inlined_call_operand.hbm [shape: f32[1,32], index: 13, kind: input, shape index: {}]   ;;  %s9045_s14 = inlined_call_operand.hbm [shape: f32[32,32], index: 14, kind: input, shape index: {}]   ;;  %s9046_s15 = inlined_call_operand.hbm [shape: f32[1,32], index: 15, kind: input, shape index: {}]   ;;  %s9047_s16 = inlined_call_operand.hbm [shape: f32[32,32], index: 16, kind: input, shape index: {}]   ;;  %s9048_s17 = inlined_call_operand.hbm [shape: f32[1,32], index: 17, kind: input, shape index: {}]   ;;  %s9049_s18 = inlined_call_operand.hbm [shape: f32[32,64], index: 18, kind: input, shape index: {}]   ;;  %s9050_s19 = inlined_call_operand.hbm [shape: f32[1,64], index: 19, kind: input, shape index: {}]   ;;  %s9051_s20 = inlined_call_operand.hbm [shape: f32[64,32], index: 20, kind: input, shape index: {}]   ;;  %s9052_s21 = inlined_call_operand.hbm [shape: f32[1,32], index: 21, kind: input, shape index: {}]   ;;  %s9053_s22 = inlined_call_operand.hbm [shape: f32[1,32], index: 22, kind: input, shape index: {}]   ;;  %s9054_s23 = inlined_call_operand.hbm [shape: f32[1,32], index: 23, kind: input, shape index: {}]   ;;  %s9055_s24 = inlined_call_operand.hbm [shape: f32[1,32], index: 24, kind: input, shape index: {}]   ;;  %s9056_s25 = inlined_call_operand.hbm [shape: f32[1,32], index: 25, kind: input, shape index: {}]   ;;  %s9057_s26 = inlined_call_operand.hbm [shape: f32[1,32], index: 26, kind: input, shape index: {}]   ;;  %s9058_s27 = inlined_call_operand.hbm [shape: f32[1,32], index: 27, kind: input, shape index: {}]   ;;  %s9059_s28 = inlined_call_operand.hbm [shape: f32[4,8,32], index: 28, kind: output, shape index: {}]  }
   0x1   :  { %9125 = sst [smem:[#allocation72_spill]] %s9031_s0 }
   0x2   :  { %9126 = sst [smem:[#allocation73_spill]] %s9032_s1 }
   0x3   :  { %9127 = sst [smem:[#allocation74_spill]] %s9033_s2 }
   0x4   :  { %9128 = sst [smem:[#allocation75_spill]] %s9034_s3 }
   0x5   :  { %9129 = sst [smem:[#allocation76_spill]] %s9035_s4 }
   0x6   :  { %9130 = sst [smem:[#allocation77_spill]] %s9036_s5 }
   0x7   :  { %9131 = sst [smem:[#allocation78_spill]] %s9037_s6 }
   0x8   :  { %9132 = sst [smem:[#allocation79_spill]] %s9038_s7 }
   0x9   :  { %9133 = sst [smem:[#allocation80_spill]] %s9039_s8 }
   0xa   :  { %9134 = sst [smem:[#allocation81_spill]] %s9040_s9 }
   0xb   :  { %9135 = sst [smem:[#allocation82_spill]] %s9041_s10 }
   0xc   :  { %9136 = sst [smem:[#allocation83_spill]] %s9042_s11 }
   0xd   :  { %9137 = sst [smem:[#allocation84_spill]] %s9043_s12 }
   0xe   :  { %9138 = sst [smem:[#allocation85_spill]] %s9044_s13 }
   0xf   :  { %9139 = sst [smem:[#allocation86_spill]] %s9045_s14 }
  0x10   :  { %9140 = sst [smem:[#allocation87_spill]] %s9046_s15 }
  0x11   :  { %9141 = sst [smem:[#allocation88_spill]] %s9047_s16 }
  0x12   :  { %9142 = sst [smem:[#allocation89_spill]] %s9048_s17 }
  0x13   :  { %9143 = sst [smem:[#allocation90_spill]] %s9049_s18 }
  0x14   :  { %9144 = sst [smem:[#allocation91_spill]] %s9050_s19 }
  0x15   :  { %9145 = sst [smem:[#allocation92_spill]] %s9051_s20 }
  0x16   :  { %9146 = sst [smem:[#allocation93_spill]] %s9052_s21 }
  0x17   :  { %9147 = sst [smem:[#allocation94_spill]] %s9053_s22 }
  0x18   :  { %9148 = sst [smem:[#allocation95_spill]] %s9054_s23 }
  0x19   :  { %9149 = sst [smem:[#allocation96_spill]] %s9055_s24 }
  0x1a   :  { %9150 = sst [smem:[#allocation97_spill]] %s9056_s25 }
  0x1b   :  { %9151 = sst [smem:[#allocation98_spill]] %s9057_s26 }
  0x1c   :  { %9152 = sst [smem:[#allocation99_spill]] %s9058_s27 }
  0x1d   :  { %9153 = sst [smem:[#allocation100_spill]] %s9059_s28 }
  0x1e   :  { %33 = vsyncpa [#allocation3], 0 }
  0x1f   :  { %35 = vsyncpa [#allocation3 + $0x1], 0 }
  0x20   :  { %36 = vsyncpa [#allocation6], 0 }
  0x21   :  { %38 = vsyncpa [#allocation6 + $0x1], 0 }
  0x22   :  { %39 = vsyncpa [#allocation9], 0 }
  0x23   :  { %41 = vsyncpa [#allocation9 + $0x1], 0 }
  0x24   :  { %42 = vsyncpa [#allocation12], 0 }
  0x25   :  { %43 = vsyncpa [#allocation15], 0 }
  0x26   :  { %44 = vsyncpa [#allocation18], 0 }
  0x27   :  { %45 = vsyncpa [#allocation21], 0 }
  0x28   :  { %46 = vsyncpa [#allocation24], 0 }
  0x29   :  { %47 = vsyncpa [#allocation27], 0 }
  0x2a   :  { %48 = vsyncpa [#allocation30], 0 }
  0x2b   :  { %49 = vsyncpa [#allocation33], 0 }
  0x2c   :  { %50 = vsyncpa [#allocation36], 0 }
  0x2d   :  { %51 = vsyncpa [#allocation39], 0 }
  0x2e   :  { %52 = vsyncpa [#allocation42], 0 }
  0x2f   :  { %53 = vsyncpa [#allocation45], 0 }
  0x30   :  { %54 = vsyncpa [#allocation4], 0 }
  0x31   :  { %56 = vsyncpa [#allocation4 + $0x1], 0  ;;  %s7772_s8 = smov 0   ;;  %s7774_s5 = smov 0  }
  0x32   :  { %s7776_s9 = smov 0   ;;  %s7778_s30 = smov 0  }
  0x33 LB: > { %9154 = sst [smem:[#allocation64_spill]] %s7571_s8  ;;  %s7585_s3 = smov [#allocation10]   ;;  %s7583_s30 = sphi %s7778_s30, %s9251_s30   ;;  %s7579_s9 = sphi %s7776_s9, %s9253_s9   ;;  %s7575_s5 = sphi %s7774_s5, %s9255_s5   ;;  %s7571_s8 = sphi %s7772_s8, %s9254_s8  }
  0x34   : > { %9155 = sst [smem:[#allocation65_spill]] %s7579_s9  ;;  %s713_s6 = sshll.u32 %s7585_s3, 4  ;;  %s7798_s6 = int_to_ptr.vmem [resolvable:$true] %s713_s6 }
  0x35   : > { %s7793_s10 = sadd.s32 4294967295, %s7583_s30   ;;  %p5456_p0 = scmp.ge.s32.totalorder %s7583_s30, 1 }
  0x36   : > { %9156 = sst [smem:[#allocation66_spill]] %s7793_s10  ;;  %p9087_p1 = scmp.eq.s32.totalorder %s7793_s10, 0 }
  0x37   : > { %p701_p2 = scmp.lt.s32.totalorder %s7583_s30, 3  ;;  %s7586_s11 = smov [#allocation11]  }
  0x38   : > { %s727_s29 = sshll.u32 %s7586_s11, 4  ;;  %s7587_s7 = smov [#allocation14]   ;;  %s7813_s29 = int_to_ptr.vmem [resolvable:$true] %s727_s29 }
  0x39   : > { %p7800_p3 = pnand %p5456_p0, %p701_p2  ;;  %s751_s12 = sshll.u32 %s7587_s7, 4  ;;  %s7815_s12 = int_to_ptr.vmem [resolvable:$true] %s751_s12 }
  0x3a   : > { %s9160_s3 = sld [smem:[#allocation76_spill]] }
  0x3b   : > { %s9157_s0 = scalar_select %p7800_p3, 1, 0 }
  0x3c   : > { %p6320_p5 = pneg %p7800_p3 }
  0x3d   : > { %9158 = sst [smem:[#allocation67_spill]] %s9157_s0 }
  0x3e   : > { %p7809_p6 = pnand %p6320_p5, %p9087_p1 }
  0x40   : > { %s9159_s2 = scalar_select %p7809_p6, 1, 0 }
  0x41   : > { %s6665_s28 = scalar_lea.hbm %s9160_s3, 512  ;;  %p7825_p8 = pneg %p7809_p6 }
  0x42   : > { %p6666_p7 = scmp.ne.s32.totalorder %s9160_s3, %s6665_s28  ;;  %p6672_p11 = scmp.lt.u32.totalorder %s6665_s28, %s9160_s3 }
  0x43   : > { %s9161_s11 = scalar_select %p7825_p8, 1, 0 }
  0x44   : > { %p6668_p9 = pnand %p7825_p8, %p6666_p7 }
  0x46   : > { %p6669_p10 = pneg %p6668_p9 }
  0x48   : > { %p6674_p12 = pnand %p6672_p11, %p6669_p10 }
  0x4a   : > { %6677 = shalt.err (!%p6674_p12)
}
  0x4b   : > { %s6678_s27 = scalar_lea.vmem %s7798_s6, 512  ;;  %p6686_p5 = scmp.lt.s32.totalorder %s7798_s6, %s7798_s6 }
  0x4c   : > { %p6679_p13 = scmp.ne.s32.totalorder %s7798_s6, %s6678_s27  ;;  %p6687_p4 = scmp.lt.s32.totalorder %s6678_s27, %s6678_s27 }
  0x4e   : > { %p6681_p0 = pnand %p6679_p13, %p7825_p8  ;;  %p6688_p7 = por %p6687_p4, %p6686_p5 }
  0x50   : > { %p6682_p2 = pneg %p6681_p0 }
  0x52   : > { %p6689_p9 = pnand %p6688_p7, %p6682_p2 }
  0x54   : > { %6692 = shalt.err (!%p6689_p9)
}
  0x55   : > { %s9082_s0 = smov 128   ;;  %s9084_s26 = smov 8  }
  0x56   : > { %6323 = dma.hbm_to_vmem [thread:$0]  (!%p7809_p6), %s9160_s3, 512, %s7798_s6, [#allocation9], %s9082_s0, %s9082_s0, %s9084_s26  }
  0x57   : > { %s9162_s24 = sld [smem:[#allocation77_spill]] }
  0x5d   : > { %s6693_s27 = scalar_lea.hbm %s9162_s24, 16 }
  0x5e   : > { %p6694_p4 = scmp.ne.s32.totalorder %s9162_s24, %s6693_s27  ;;  %p6700_p12 = scmp.lt.u32.totalorder %s6693_s27, %s9162_s24 }
  0x60   : > { %p6696_p10 = pnand %p6694_p4, %p7825_p8 }
  0x62   : > { %p6697_p11 = pneg %p6696_p10 }
  0x64   : > { %p6702_p13 = pnand %p6700_p12, %p6697_p11 }
  0x66   : > { %6705 = shalt.err (!%p6702_p13)
}
  0x67   : > { %s6706_s6 = scalar_lea.vmem %s7813_s29, 16  ;;  %s6713_s20 = scalar_lea.vmem %s7813_s29, 32 }
  0x68   : > { %p6707_p0 = scmp.ne.s32.totalorder %s7813_s29, %s6706_s6  ;;  %p6714_p7 = scmp.lt.s32.totalorder %s7813_s29, %s7813_s29 }
  0x69   : > { %p6715_p9 = scmp.lt.s32.totalorder %s6713_s20, %s6706_s6 }
  0x6a   : > { %p6709_p2 = pnand %p6707_p0, %p7825_p8 }
  0x6b   : > { %p6716_p4 = por %p6715_p9, %p6714_p7 }
  0x6c   : > { %p6710_p5 = pneg %p6709_p2 }
  0x6e   : > { %p6717_p10 = pnand %p6716_p4, %p6710_p5 }
  0x70   : > { %6720 = shalt.err (!%p6717_p10)
}
  0x71   : > { %6326 = dma.hbm_to_vmem [thread:$0]  (!%p7809_p6), %s9162_s24, 16, %s7813_s29, [#allocation12]  }
  0x72   : > { %s9163_s1 = sld [smem:[#allocation79_spill]] }
  0x78   : > { %s6721_s4 = scalar_lea.hbm %s9163_s1, 16 }
  0x79   : > { %p6722_p11 = scmp.ne.s32.totalorder %s9163_s1, %s6721_s4  ;;  %p6728_p0 = scmp.lt.u32.totalorder %s6721_s4, %s9163_s1 }
  0x7b   : > { %p6724_p12 = pnand %p6722_p11, %p7825_p8 }
  0x7d   : > { %p6725_p13 = pneg %p6724_p12 }
  0x7f   : > { %p6730_p2 = pnand %p6728_p0, %p6725_p13 }
  0x81   : > { %6733 = shalt.err (!%p6730_p2)
}
  0x82   : > { %s6734_s29 = scalar_lea.vmem %s7815_s12, 16  ;;  %s6741_s16 = scalar_lea.vmem %s7815_s12, 32 }
  0x83   : > { %p6735_p5 = scmp.ne.s32.totalorder %s7815_s12, %s6734_s29  ;;  %p6742_p4 = scmp.lt.s32.totalorder %s7815_s12, %s7815_s12 }
  0x84   : > { %p6743_p10 = scmp.lt.s32.totalorder %s6741_s16, %s6734_s29 }
  0x85   : > { %p6737_p7 = pnand %p6735_p5, %p7825_p8 }
  0x86   : > { %p6744_p11 = por %p6743_p10, %p6742_p4 }
  0x87   : > { %p6738_p9 = pneg %p6737_p7 }
  0x89   : > { %p6745_p12 = pnand %p6744_p11, %p6738_p9 }
  0x8b   : > { %6748 = shalt.err (!%p6745_p12)
}
  0x8c   : > { %6332 = dma.hbm_to_vmem [thread:$0]  (!%p7809_p6), %s9163_s1, 16, %s7815_s12, [#allocation15]  }
  0x8d   : > { %s7590_s28 = smov [#allocation17]   ;;  %s7591_s7 = smov [#allocation20]  }
  0x8e   : > { %s775_s4 = sshll.u32 %s7590_s28, 4  ;;  %s799_s27 = sshll.u32 %s7591_s7, 4  ;;  %s776_s4 = int_to_ptr.vmem [resolvable:$true] %s775_s4  ;;  %s800_s27 = int_to_ptr.vmem [resolvable:$true] %s799_s27 }
  0x8f   : > { %s9164_s0 = sld [smem:[#allocation81_spill]] }
  0x95   : > { %s6749_s29 = scalar_lea.hbm %s9164_s0, 16 }
  0x96   : > { %p6750_p13 = scmp.ne.s32.totalorder %s9164_s0, %s6749_s29  ;;  %p6756_p5 = scmp.lt.u32.totalorder %s6749_s29, %s9164_s0 }
  0x98   : > { %p6752_p0 = pnand %p6750_p13, %p7825_p8 }
  0x9a   : > { %p6753_p2 = pneg %p6752_p0 }
  0x9c   : > { %p6758_p7 = pnand %p6756_p5, %p6753_p2 }
  0x9e   : > { %6761 = shalt.err (!%p6758_p7)
}
  0x9f   : > { %s6762_s12 = scalar_lea.vmem %s776_s4, 16  ;;  %s6769_s22 = scalar_lea.vmem %s776_s4, 32 }
  0xa0   : > { %p6763_p9 = scmp.ne.s32.totalorder %s776_s4, %s6762_s12  ;;  %p6770_p11 = scmp.lt.s32.totalorder %s776_s4, %s776_s4 }
  0xa1   : > { %p6771_p12 = scmp.lt.s32.totalorder %s6769_s22, %s6762_s12 }
  0xa2   : > { %p6765_p4 = pnand %p6763_p9, %p7825_p8 }
  0xa3   : > { %p6772_p1 = por %p6771_p12, %p6770_p11 }
  0xa4   : > { %p6766_p10 = pneg %p6765_p4 }
  0xa6   : > { %p6773_p3 = pnand %p6772_p1, %p6766_p10 }
  0xa8   : > { %6776 = shalt.err (!%p6773_p3)
}
  0xa9   : > { %6338 = dma.hbm_to_vmem [thread:$0]  (!%p7809_p6), %s9164_s0, 16, %s776_s4, [#allocation18]  }
  0xaa   : > { %s9165_s6 = sld [smem:[#allocation83_spill]] }
  0xb0   : > { %s6777_s20 = scalar_lea.hbm %s9165_s6, 16 }
  0xb1   : > { %p6778_p13 = scmp.ne.s32.totalorder %s9165_s6, %s6777_s20  ;;  %p6784_p3 = scmp.lt.u32.totalorder %s6777_s20, %s9165_s6 }
  0xb3   : > { %p6780_p0 = pnand %p6778_p13, %p7825_p8 }
  0xb5   : > { %p6781_p1 = pneg %p6780_p0 }
  0xb7   : > { %p6786_p2 = pnand %p6784_p3, %p6781_p1 }
  0xb9   : > { %6789 = shalt.err (!%p6786_p2)
}
  0xba   : > { %s6790_s22 = scalar_lea.vmem %s800_s27, 16  ;;  %s6797_s4 = scalar_lea.vmem %s800_s27, 32 }
  0xbb   : > { %p6791_p5 = scmp.ne.s32.totalorder %s800_s27, %s6790_s22  ;;  %p6798_p4 = scmp.lt.s32.totalorder %s800_s27, %s800_s27 }
  0xbc   : > { %p6799_p10 = scmp.lt.s32.totalorder %s6797_s4, %s6790_s22 }
  0xbd   : > { %p6793_p7 = pnand %p6791_p5, %p7825_p8 }
  0xbe   : > { %p6800_p11 = por %p6799_p10, %p6798_p4 }
  0xbf   : > { %p6794_p9 = pneg %p6793_p7 }
  0xc1   : > { %p6801_p12 = pnand %p6800_p11, %p6794_p9 }
  0xc3   : > { %6804 = shalt.err (!%p6801_p12)
}
  0xc4   : > { %6344 = dma.hbm_to_vmem [thread:$0]  (!%p7809_p6), %s9165_s6, 16, %s800_s27, [#allocation21]  }
  0xc5   : > { %s7592_s3 = smov [#allocation23]   ;;  %s7593_s20 = smov [#allocation26]  }
  0xc6   : > { %s823_s7 = sshll.u32 %s7592_s3, 4  ;;  %s847_s29 = sshll.u32 %s7593_s20, 4  ;;  %s824_s7 = int_to_ptr.vmem [resolvable:$true] %s823_s7  ;;  %s848_s29 = int_to_ptr.vmem [resolvable:$true] %s847_s29 }
  0xc7   : > { %s9166_s13 = sld [smem:[#allocation85_spill]] }
  0xcd   : > { %s6805_s12 = scalar_lea.hbm %s9166_s13, 16 }
  0xce   : > { %p6806_p13 = scmp.ne.s32.totalorder %s9166_s13, %s6805_s12  ;;  %p6812_p3 = scmp.lt.u32.totalorder %s6805_s12, %s9166_s13 }
  0xd0   : > { %p6808_p0 = pnand %p6806_p13, %p7825_p8 }
  0xd2   : > { %p6809_p1 = pneg %p6808_p0 }
  0xd4   : > { %p6814_p2 = pnand %p6812_p3, %p6809_p1 }
  0xd6   : > { %6817 = shalt.err (!%p6814_p2)
}
  0xd7   : > { %s6818_s27 = scalar_lea.vmem %s824_s7, 16  ;;  %s6825_s28 = scalar_lea.vmem %s824_s7, 32 }
  0xd8   : > { %p6819_p5 = scmp.ne.s32.totalorder %s824_s7, %s6818_s27  ;;  %p6826_p4 = scmp.lt.s32.totalorder %s824_s7, %s824_s7 }
  0xd9   : > { %p6827_p10 = scmp.lt.s32.totalorder %s6825_s28, %s6818_s27 }
  0xda   : > { %p6821_p7 = pnand %p6819_p5, %p7825_p8 }
  0xdb   : > { %p6828_p11 = por %p6827_p10, %p6826_p4 }
  0xdc   : > { %p6822_p9 = pneg %p6821_p7 }
  0xde   : > { %p6829_p12 = pnand %p6828_p11, %p6822_p9 }
  0xe0   : > { %6832 = shalt.err (!%p6829_p12)
}
  0xe1   : > { %6350 = dma.hbm_to_vmem [thread:$0]  (!%p7809_p6), %s9166_s13, 16, %s824_s7, [#allocation24]  }
  0xe2   : > { %s9167_s15 = sld [smem:[#allocation87_spill]] }
  0xe8   : > { %s6833_s18 = scalar_lea.hbm %s9167_s15, 16 }
  0xe9   : > { %p6834_p13 = scmp.ne.s32.totalorder %s9167_s15, %s6833_s18  ;;  %p6840_p3 = scmp.lt.u32.totalorder %s6833_s18, %s9167_s15 }
  0xeb   : > { %p6836_p0 = pnand %p6834_p13, %p7825_p8 }
  0xed   : > { %p6837_p1 = pneg %p6836_p0 }
  0xef   : > { %p6842_p2 = pnand %p6840_p3, %p6837_p1 }
  0xf1   : > { %6845 = shalt.err (!%p6842_p2)
}
  0xf2   : > { %s6846_s27 = scalar_lea.vmem %s848_s29, 16  ;;  %s6853_s7 = scalar_lea.vmem %s848_s29, 32 }
  0xf3   : > { %p6847_p5 = scmp.ne.s32.totalorder %s848_s29, %s6846_s27  ;;  %p6854_p4 = scmp.lt.s32.totalorder %s848_s29, %s848_s29 }
  0xf4   : > { %p6855_p10 = scmp.lt.s32.totalorder %s6853_s7, %s6846_s27 }
  0xf5   : > { %p6849_p7 = pnand %p6847_p5, %p7825_p8 }
  0xf6   : > { %p6856_p11 = por %p6855_p10, %p6854_p4 }
  0xf7   : > { %p6850_p9 = pneg %p6849_p7 }
  0xf9   : > { %p6857_p12 = pnand %p6856_p11, %p6850_p9 }
  0xfb   : > { %6860 = shalt.err (!%p6857_p12)
}
  0xfc   : > { %6356 = dma.hbm_to_vmem [thread:$0]  (!%p7809_p6), %s9167_s15, 16, %s848_s29, [#allocation27]  }
  0xfd   : > { %s7594_s20 = smov [#allocation29]   ;;  %s7595_s16 = smov [#allocation32]  }
  0xfe   : > { %s871_s0 = sshll.u32 %s7594_s20, 4  ;;  %s895_s18 = sshll.u32 %s7595_s16, 4  ;;  %s872_s0 = int_to_ptr.vmem [resolvable:$true] %s871_s0  ;;  %s896_s18 = int_to_ptr.vmem [resolvable:$true] %s895_s18 }
  0xff   : > { %s9168_s17 = sld [smem:[#allocation89_spill]] }
 0x105   : > { %s6861_s4 = scalar_lea.hbm %s9168_s17, 16 }
 0x106   : > { %p6862_p13 = scmp.ne.s32.totalorder %s9168_s17, %s6861_s4  ;;  %p6868_p3 = scmp.lt.u32.totalorder %s6861_s4, %s9168_s17 }
 0x108   : > { %p6864_p0 = pnand %p6862_p13, %p7825_p8 }
 0x10a   : > { %p6865_p1 = pneg %p6864_p0 }
 0x10c   : > { %p6870_p2 = pnand %p6868_p3, %p6865_p1 }
 0x10e   : > { %6873 = shalt.err (!%p6870_p2)
}
 0x10f   : > { %s6874_s29 = scalar_lea.vmem %s872_s0, 16  ;;  %s6881_s3 = scalar_lea.vmem %s872_s0, 32 }
 0x110   : > { %p6875_p5 = scmp.ne.s32.totalorder %s872_s0, %s6874_s29  ;;  %p6882_p4 = scmp.lt.s32.totalorder %s872_s0, %s872_s0 }
 0x111   : > { %p6883_p10 = scmp.lt.s32.totalorder %s6881_s3, %s6874_s29 }
 0x112   : > { %p6877_p7 = pnand %p6875_p5, %p7825_p8 }
 0x113   : > { %p6884_p11 = por %p6883_p10, %p6882_p4 }
 0x114   : > { %p6878_p9 = pneg %p6877_p7 }
 0x116   : > { %p6885_p12 = pnand %p6884_p11, %p6878_p9 }
 0x118   : > { %6888 = shalt.err (!%p6885_p12)
}
 0x119   : > { %6362 = dma.hbm_to_vmem [thread:$0]  (!%p7809_p6), %s9168_s17, 16, %s872_s0, [#allocation30]  }
 0x11a   : > { %s9169_s19 = sld [smem:[#allocation91_spill]] }
 0x120   : > { %s6889_s4 = scalar_lea.hbm %s9169_s19, 16 }
 0x121   : > { %p6890_p13 = scmp.ne.s32.totalorder %s9169_s19, %s6889_s4  ;;  %p6896_p3 = scmp.lt.u32.totalorder %s6889_s4, %s9169_s19 }
 0x123   : > { %p6892_p0 = pnand %p6890_p13, %p7825_p8 }
 0x125   : > { %p6893_p1 = pneg %p6892_p0 }
 0x127   : > { %p6898_p2 = pnand %p6896_p3, %p6893_p1 }
 0x129   : > { %6901 = shalt.err (!%p6898_p2)
}
 0x12a   : > { %s6902_s29 = scalar_lea.vmem %s896_s18, 16  ;;  %s6909_s0 = scalar_lea.vmem %s896_s18, 32 }
 0x12b   : > { %p6903_p5 = scmp.ne.s32.totalorder %s896_s18, %s6902_s29  ;;  %p6910_p4 = scmp.lt.s32.totalorder %s896_s18, %s896_s18 }
 0x12c   : > { %p6911_p10 = scmp.lt.s32.totalorder %s6909_s0, %s6902_s29 }
 0x12d   : > { %p6905_p7 = pnand %p6903_p5, %p7825_p8 }
 0x12e   : > { %p6912_p11 = por %p6911_p10, %p6910_p4 }
 0x12f   : > { %p6906_p9 = pneg %p6905_p7 }
 0x131   : > { %p6913_p12 = pnand %p6912_p11, %p6906_p9 }
 0x133   : > { %6916 = shalt.err (!%p6913_p12)
}
 0x134   : > { %6368 = dma.hbm_to_vmem [thread:$0]  (!%p7809_p6), %s9169_s19, 16, %s896_s18, [#allocation33]  }
 0x135   : > { %s7596_s16 = smov [#allocation35]   ;;  %s7597_s22 = smov [#allocation38]  }
 0x136   : > { %s919_s12 = sshll.u32 %s7596_s16, 4  ;;  %s941_s4 = sshll.u32 %s7597_s22, 4  ;;  %s920_s12 = int_to_ptr.vmem [resolvable:$true] %s919_s12  ;;  %s942_s4 = int_to_ptr.vmem [resolvable:$true] %s941_s4 }
 0x137   : > { %s9170_s21 = sld [smem:[#allocation93_spill]] }
 0x13d   : > { %s6917_s7 = scalar_lea.hbm %s9170_s21, 16 }
 0x13e   : > { %p6918_p13 = scmp.ne.s32.totalorder %s9170_s21, %s6917_s7  ;;  %p6924_p3 = scmp.lt.u32.totalorder %s6917_s7, %s9170_s21 }
 0x140   : > { %p6920_p0 = pnand %p6918_p13, %p7825_p8 }
 0x142   : > { %p6921_p1 = pneg %p6920_p0 }
 0x144   : > { %p6926_p2 = pnand %p6924_p3, %p6921_p1 }
 0x146   : > { %6929 = shalt.err (!%p6926_p2)
}
 0x147   : > { %s6930_s18 = scalar_lea.vmem %s920_s12, 16  ;;  %s6937_s20 = scalar_lea.vmem %s920_s12, 32 }
 0x148   : > { %p6931_p5 = scmp.ne.s32.totalorder %s920_s12, %s6930_s18  ;;  %p6938_p4 = scmp.lt.s32.totalorder %s920_s12, %s920_s12 }
 0x149   : > { %p6939_p10 = scmp.lt.s32.totalorder %s6937_s20, %s6930_s18 }
 0x14a   : > { %p6933_p7 = pnand %p6931_p5, %p7825_p8 }
 0x14b   : > { %p6940_p11 = por %p6939_p10, %p6938_p4 }
 0x14c   : > { %p6934_p9 = pneg %p6933_p7 }
 0x14e   : > { %p6941_p12 = pnand %p6940_p11, %p6934_p9 }
 0x150   : > { %6944 = shalt.err (!%p6941_p12)
}
 0x151   : > { %6374 = dma.hbm_to_vmem [thread:$0]  (!%p7809_p6), %s9170_s21, 16, %s920_s12, [#allocation36]  }
 0x152   : > { %s9171_s23 = sld [smem:[#allocation95_spill]] }
 0x158   : > { %s6945_s7 = scalar_lea.hbm %s9171_s23, 16 }
 0x159   : > { %p6946_p13 = scmp.ne.s32.totalorder %s9171_s23, %s6945_s7  ;;  %p6952_p3 = scmp.lt.u32.totalorder %s6945_s7, %s9171_s23 }
 0x15b   : > { %p6948_p0 = pnand %p6946_p13, %p7825_p8 }
 0x15d   : > { %p6949_p1 = pneg %p6948_p0 }
 0x15f   : > { %p6954_p2 = pnand %p6952_p3, %p6949_p1 }
 0x161   : > { %6957 = shalt.err (!%p6954_p2)
}
 0x162   : > { %s6958_s18 = scalar_lea.vmem %s942_s4, 16  ;;  %s6965_s12 = scalar_lea.vmem %s942_s4, 32 }
 0x163   : > { %p6959_p5 = scmp.ne.s32.totalorder %s942_s4, %s6958_s18  ;;  %p6966_p4 = scmp.lt.s32.totalorder %s942_s4, %s942_s4 }
 0x164   : > { %p6967_p10 = scmp.lt.s32.totalorder %s6965_s12, %s6958_s18 }
 0x165   : > { %p6961_p7 = pnand %p6959_p5, %p7825_p8 }
 0x166   : > { %p6968_p11 = por %p6967_p10, %p6966_p4 }
 0x167   : > { %p6962_p9 = pneg %p6961_p7 }
 0x169   : > { %p6969_p12 = pnand %p6968_p11, %p6962_p9 }
 0x16b   : > { %6972 = shalt.err (!%p6969_p12)
}
 0x16c   : > { %6380 = dma.hbm_to_vmem [thread:$0]  (!%p7809_p6), %s9171_s23, 16, %s942_s4, [#allocation39]  }
 0x16d   : > { %s7598_s22 = smov [#allocation41]   ;;  %s9172_s25 = sld [smem:[#allocation97_spill]] }
 0x16e   : > { %s963_s26 = sshll.u32 %s7598_s22, 4  ;;  %s964_s26 = int_to_ptr.vmem [resolvable:$true] %s963_s26 }
 0x173   : > { %s6973_s28 = scalar_lea.hbm %s9172_s25, 16 }
 0x174   : > { %p6974_p13 = scmp.ne.s32.totalorder %s9172_s25, %s6973_s28  ;;  %p6980_p3 = scmp.lt.u32.totalorder %s6973_s28, %s9172_s25 }
 0x176   : > { %p6976_p0 = pnand %p6974_p13, %p7825_p8 }
 0x178   : > { %p6977_p1 = pneg %p6976_p0 }
 0x17a   : > { %p6982_p2 = pnand %p6980_p3, %p6977_p1 }
 0x17c   : > { %6985 = shalt.err (!%p6982_p2)
}
 0x17d   : > { %s6986_s4 = scalar_lea.vmem %s964_s26, 16  ;;  %s6993_s12 = scalar_lea.vmem %s964_s26, 32 }
 0x17e   : > { %p6987_p5 = scmp.ne.s32.totalorder %s964_s26, %s6986_s4  ;;  %p6994_p4 = scmp.lt.s32.totalorder %s964_s26, %s964_s26 }
 0x17f   : > { %p6995_p10 = scmp.lt.s32.totalorder %s6993_s12, %s6986_s4 }
 0x180   : > { %p6989_p7 = pnand %p6987_p5, %p7825_p8 }
 0x181   : > { %p6996_p11 = por %p6995_p10, %p6994_p4 }
 0x182   : > { %p6990_p9 = pneg %p6989_p7 }
 0x184   : > { %p6997_p12 = pnand %p6996_p11, %p6990_p9 }
 0x186   : > { %7000 = shalt.err (!%p6997_p12)
}
 0x187   : > { %6386 = dma.hbm_to_vmem [thread:$0]  (!%p7809_p6), %s9172_s25, 16, %s964_s26, [#allocation42]  }
 0x188   : > { %s5455_s22 = sadd.s32 4294967294, %s7583_s30   ;;  %s8061_s27 = sadd.s32 1, %s7583_s30  }
 0x189   : > { %9173 = sst [smem:[#allocation68_spill]] %s8061_s27  ;;  %s66_s7 = ssub.s32 %s7583_s30, %s8061_s27 }
 0x18a   : > { %s69_s28 = sadd.s32 1, %s7579_s9  ;;  %p67_p13 = scmp.eq.s32.totalorder %s66_s7, 0 }
 0x18b   : > { %p76_p0 = scmp.ne.s32.totalorder %s7579_s9, %s7575_s5  ;;  %p77_p1 = scmp.eq.s32.totalorder %s7583_s30, 0 }
 0x18c   : > { %p82_p3 = scmp.ne.s32.totalorder %s7575_s5, %s7571_s8  ;;  %p9175_p5 = scmp.eq.s32.totalorder %s7793_s10, 0 }
 0x18d   : > { %s8072_s29 = scalar_select %p67_p13, %s7579_s9, %s69_s28  }
 0x18e   : > { %p78_p2 = por %p77_p1, %p76_p0  ;;  %p8076_p7 = por %p9175_p5, %p82_p3 }
 0x18f   : > { %9174 = sst [smem:[#allocation69_spill]] %s8072_s29  ;;  %p688_p9 = scmp.eq.s32.totalorder %s7793_s10, 1 }
 0x190   : > { %s9176_s26 = scalar_select %p8076_p7, 1, 0 }
 0x191   : > { %p694_p4 = scmp.eq.s32.totalorder %s5455_s22, 1  ;;  %p6434_p10 = scmp.lt.s32.totalorder %s7583_s30, 2 }
 0x192   : > { %s8083_s0 = sand.u32 1, %s7579_s9   ;;  %p8085_p11 = por %p688_p9, %p76_p0 }
 0x193   : > { %p8089_p12 = por %p694_p4, %p82_p3  ;;  %p8093_p13 = pnand %p6434_p10, %p78_p2 }
 0x194   : > { %s9177_s3 = scalar_select %p8085_p11, 1, 0 }
 0x195   : > { %s9179_s18 = scalar_select %p8089_p12, 1, 0 }
 0x196   : > { %9178 = sst [smem:[#allocation70_spill]] %s9177_s3  ;;  %s9095_s12 = sand.u32 1, %s7583_s30  }
 0x197   : > { %9180 = sst [smem:[#allocation71_spill]] %s9179_s18  ;;  %s9092_s20 = sshll.u32 %s8083_s0, 5 }
 0x198   : > { %s9181_s4 = scalar_select %p8093_p13, 1, 0 }
 0x199   : > { %s9093_s16 = sshll.u32 %s7583_s30, 9  ;;  %s1021_s22 = scalar_lea.vmem [#allocation5], %s9092_s20 }
 0x19a   : > { %s1029_s7 = sshll.u32 %s1021_s22, 4  ;;  %s9182_s6 = sld [smem:[#allocation73_spill]]  ;;  %s8109_s7 = int_to_ptr.vmem [resolvable:$true] %s1029_s7 }
 0x19b   : > { %s8113_s15 = scalar_lea.sflag [#allocation6], %s9095_s12  ;;  %p8119_p1 = pneg %p8093_p13 }
 0x19d   : > { %s9183_s22 = scalar_select %p8119_p1, 1, 0 }
 0x1a0   : > { %s8107_s13 = scalar_lea.hbm %s9182_s6, %s9093_s16  ;;  %s7006_s20 = scalar_lea.hbm %s9182_s6, 1024 }
 0x1a1   : > { %s7001_s17 = scalar_lea.hbm %s8107_s13, 512  ;;  %p7007_p5 = scmp.lt.u32.totalorder %s8107_s13, %s9182_s6 }
 0x1a2   : > { %p7002_p0 = scmp.ne.s32.totalorder %s8107_s13, %s7001_s17  ;;  %p7008_p9 = scmp.lt.u32.totalorder %s7006_s20, %s7001_s17 }
 0x1a3   : > { %p7010_p10 = scmp.lt.u32.totalorder %s7001_s17, %s8107_s13 }
 0x1a4   : > { %p7004_p3 = pnand %p8119_p1, %p7002_p0  ;;  %p7009_p4 = por %p7008_p9, %p7007_p5 }
 0x1a6   : > { %p7005_p2 = pneg %p7004_p3  ;;  %p7011_p12 = por %p7010_p10, %p7009_p4 }
 0x1a8   : > { %p7012_p11 = pnand %p7011_p12, %p7005_p2 }
 0x1aa   : > { %7015 = shalt.err (!%p7012_p11)
}
 0x1ab   : > { %s7016_s12 = scalar_lea.vmem %s8109_s7, 512  ;;  %s7599_s1 = smov [#allocation5]  }
 0x1ac   : > { %p7017_p0 = scmp.ne.s32.totalorder %s8109_s7, %s7016_s12  ;;  %s7021_s28 = sshll.u32 %s7599_s1, 4  ;;  %s7022_s28 = int_to_ptr.vmem [resolvable:$false] %s7021_s28 }
 0x1ad   : > { %s7023_s19 = scalar_lea.vmem %s7022_s28, 1024  ;;  %p7024_p6 = scmp.lt.s32.totalorder %s8109_s7, %s7022_s28 }
 0x1ae   : > { %p7019_p3 = pnand %p7017_p0, %p8119_p1  ;;  %p7025_p8 = scmp.lt.s32.totalorder %s7023_s19, %s7016_s12 }
 0x1b0   : > { %p7020_p7 = pneg %p7019_p3  ;;  %p7026_p5 = por %p7025_p8, %p7024_p6 }
 0x1b2   : > { %p7027_p9 = pnand %p7026_p5, %p7020_p7 }
 0x1b4   : > { %7030 = shalt.err (!%p7027_p9)
}
 0x1b5   : > { %s9184_s17 = smov 8   ;;  %s9185_s20 = smov 128  }
 0x1b6   : > { %6399 = dma.hbm_to_vmem [thread:$0]  (!%p8093_p13), %s8107_s13, 512, %s8109_s7, %s8113_s15, %s9185_s20, %s9185_s20, %s9184_s17  }
 0x1b7   : > { %s9186_s16 = sshll.u32 %s7583_s30, 9  ;;  %s9187_s28 = sld [smem:[#allocation75_spill]] }
 0x1b8   : > { %s9188_s19 = sshll.u32 %s8083_s0, 5  ;;  %s7600_s24 = smov [#allocation13]  }
 0x1b9   : > { %s8155_s21 = scalar_lea.vmem [#allocation8], %s9188_s19  ;;  %s737_s25 = sshll.u32 %s7600_s24, 4  ;;  %s738_s25 = int_to_ptr.vmem [resolvable:$true] %s737_s25 }
 0x1ba   : > { %s7601_s29 = smov [#allocation16]   ;;  %s9189_s8 = sld [smem:[#allocation78_spill]] }
 0x1bb   : > { %s761_s9 = sshll.u32 %s7601_s29, 4  ;;  %p9191_p8 = scmp.ne.s32.totalorder %s9161_s11, 0  ;;  %s762_s9 = int_to_ptr.vmem [resolvable:$true] %s761_s9 }
 0x1bd   : > { %s8151_s12 = scalar_lea.hbm %s9187_s28, %s9186_s16 }
 0x1c0   : > { %s9190_s3 = smov %s9189_s8  ;;  %s7031_s13 = scalar_lea.hbm %s9189_s8, 512 }
 0x1c1   : > { %p7032_p6 = scmp.ne.s32.totalorder %s9190_s3, %s7031_s13  ;;  %p7038_p12 = scmp.lt.u32.totalorder %s7031_s13, %s9190_s3 }
 0x1c3   : > { %p7034_p7 = pnand %p7032_p6, %p9191_p8 }
 0x1c5   : > { %p7035_p11 = pneg %p7034_p7 }
 0x1c7   : > { %p7040_p2 = pnand %p7038_p12, %p7035_p11 }
 0x1c9   : > { %7043 = shalt.err (!%p7040_p2)
}
 0x1ca   : > { %s7044_s24 = scalar_lea.vmem %s738_s25, 512  ;;  %p7052_p3 = scmp.lt.s32.totalorder %s738_s25, %s738_s25 }
 0x1cb   : > { %p7045_p4 = scmp.ne.s32.totalorder %s738_s25, %s7044_s24  ;;  %p7053_p5 = scmp.lt.s32.totalorder %s7044_s24, %s7044_s24 }
 0x1cd   : > { %p7047_p10 = pnand %p7045_p4, %p9191_p8  ;;  %p7054_p9 = por %p7053_p5, %p7052_p3 }
 0x1cf   : > { %p7048_p0 = pneg %p7047_p10 }
 0x1d1   : > { %p7055_p13 = pnand %p7054_p9, %p7048_p0 }
 0x1d3   : > { %7058 = shalt.err (!%p7055_p13)
}
 0x1d4   : > { %p9192_p6 = scmp.ne.s32.totalorder %s9159_s2, 0  ;;  %s9193_s18 = sld [smem:[#allocation80_spill]] }
 0x1d6   : > { %6329 = dma.hbm_to_vmem [thread:$0]  (!%p9192_p6), %s9190_s3, 512, %s738_s25, [#allocation12], %s9185_s20, %s9185_s20, %s9184_s17  }
 0x1da   : > { %s7059_s1 = scalar_lea.hbm %s9193_s18, 512 }
 0x1db   : > { %p7060_p7 = scmp.ne.s32.totalorder %s9193_s18, %s7059_s1  ;;  %p7066_p12 = scmp.lt.u32.totalorder %s7059_s1, %s9193_s18 }
 0x1dd   : > { %p7062_p13 = pnand %p7060_p7, %p9191_p8 }
 0x1df   : > { %p7063_p11 = pneg %p7062_p13 }
 0x1e1   : > { %p7068_p2 = pnand %p7066_p12, %p7063_p11 }
 0x1e3   : > { %7071 = shalt.err (!%p7068_p2)
}
 0x1e4   : > { %s7072_s16 = scalar_lea.vmem %s762_s9, 512  ;;  %p7080_p3 = scmp.lt.s32.totalorder %s762_s9, %s762_s9 }
 0x1e5   : > { %p7073_p4 = scmp.ne.s32.totalorder %s762_s9, %s7072_s16  ;;  %p7081_p5 = scmp.lt.s32.totalorder %s7072_s16, %s7072_s16 }
 0x1e7   : > { %p7075_p10 = pnand %p7073_p4, %p9191_p8  ;;  %p7082_p9 = por %p7081_p5, %p7080_p3 }
 0x1e9   : > { %p7076_p0 = pneg %p7075_p10 }
 0x1eb   : > { %p7083_p1 = pnand %p7082_p9, %p7076_p0 }
 0x1ed   : > { %7086 = shalt.err (!%p7083_p1)
}
 0x1ee   : > { %6335 = dma.hbm_to_vmem [thread:$0]  (!%p9192_p6), %s9193_s18, 512, %s762_s9, [#allocation15], %s9185_s20, %s9185_s20, %s9184_s17  }
 0x1ef   : > { %s7602_s8 = smov [#allocation19]   ;;  %s7603_s27 = smov [#allocation22]  }
 0x1f0   : > { %s785_s10 = sshll.u32 %s7602_s8, 4  ;;  %s809_s29 = sshll.u32 %s7603_s27, 4  ;;  %s786_s10 = int_to_ptr.vmem [resolvable:$true] %s785_s10  ;;  %s810_s29 = int_to_ptr.vmem [resolvable:$true] %s809_s29 }
 0x1f1   : > { %s9194_s13 = sld [smem:[#allocation82_spill]] }
 0x1f7   : > { %s7087_s7 = scalar_lea.hbm %s9194_s13, 512 }
 0x1f8   : > { %p7088_p1 = scmp.ne.s32.totalorder %s9194_s13, %s7087_s7  ;;  %p7094_p11 = scmp.lt.u32.totalorder %s7087_s7, %s9194_s13 }
 0x1fa   : > { %p7090_p7 = pnand %p7088_p1, %p9191_p8 }
 0x1fc   : > { %p7091_p13 = pneg %p7090_p7 }
 0x1fe   : > { %p7096_p12 = pnand %p7094_p11, %p7091_p13 }
 0x200   : > { %7099 = shalt.err (!%p7096_p12)
}
 0x201   : > { %s7100_s9 = scalar_lea.vmem %s786_s10, 512  ;;  %p7108_p0 = scmp.lt.s32.totalorder %s786_s10, %s786_s10 }
 0x202   : > { %p7101_p2 = scmp.ne.s32.totalorder %s786_s10, %s7100_s9  ;;  %p7109_p3 = scmp.lt.s32.totalorder %s7100_s9, %s7100_s9 }
 0x204   : > { %p7103_p4 = pnand %p7101_p2, %p9191_p8  ;;  %p7110_p5 = por %p7109_p3, %p7108_p0 }
 0x206   : > { %p7104_p10 = pneg %p7103_p4 }
 0x208   : > { %p7111_p9 = pnand %p7110_p5, %p7104_p10 }
 0x20a   : > { %7114 = shalt.err (!%p7111_p9)
}
 0x20b   : > { %6341 = dma.hbm_to_vmem [thread:$0]  (!%p9192_p6), %s9194_s13, 512, %s786_s10, [#allocation18], %s9185_s20, %s9185_s20, %s9184_s17  }
 0x20c   : > { %s9195_s1 = sld [smem:[#allocation84_spill]] }
 0x212   : > { %s7115_s19 = scalar_lea.hbm %s9195_s1, 512 }
 0x213   : > { %p7116_p1 = scmp.ne.s32.totalorder %s9195_s1, %s7115_s19  ;;  %p7122_p11 = scmp.lt.u32.totalorder %s7115_s19, %s9195_s1 }
 0x215   : > { %p7118_p7 = pnand %p7116_p1, %p9191_p8 }
 0x217   : > { %p7119_p13 = pneg %p7118_p7 }
 0x219   : > { %p7124_p12 = pnand %p7122_p11, %p7119_p13 }
 0x21b   : > { %7127 = shalt.err (!%p7124_p12)
}
 0x21c   : > { %s7128_s9 = scalar_lea.vmem %s810_s29, 512  ;;  %p7136_p0 = scmp.lt.s32.totalorder %s810_s29, %s810_s29 }
 0x21d   : > { %p7129_p2 = scmp.ne.s32.totalorder %s810_s29, %s7128_s9  ;;  %p7137_p3 = scmp.lt.s32.totalorder %s7128_s9, %s7128_s9 }
 0x21f   : > { %p7131_p4 = pnand %p7129_p2, %p9191_p8  ;;  %p7138_p5 = por %p7137_p3, %p7136_p0 }
 0x221   : > { %p7132_p10 = pneg %p7131_p4 }
 0x223   : > { %p7139_p9 = pnand %p7138_p5, %p7132_p10 }
 0x225   : > { %7142 = shalt.err (!%p7139_p9)
}
 0x226   : > { %6347 = dma.hbm_to_vmem [thread:$0]  (!%p9192_p6), %s9195_s1, 512, %s810_s29, [#allocation21], %s9185_s20, %s9185_s20, %s9184_s17  }
 0x227   : > { %s7604_s24 = smov [#allocation25]   ;;  %s7605_s27 = smov [#allocation28]  }
 0x228   : > { %s833_s8 = sshll.u32 %s7604_s24, 4  ;;  %s857_s19 = sshll.u32 %s7605_s27, 4  ;;  %s834_s8 = int_to_ptr.vmem [resolvable:$true] %s833_s8  ;;  %s858_s19 = int_to_ptr.vmem [resolvable:$true] %s857_s19 }
 0x229   : > { %s9196_s14 = sld [smem:[#allocation86_spill]] }
 0x22f   : > { %s7143_s16 = scalar_lea.hbm %s9196_s14, 512 }
 0x230   : > { %p7144_p1 = scmp.ne.s32.totalorder %s9196_s14, %s7143_s16  ;;  %p7150_p11 = scmp.lt.u32.totalorder %s7143_s16, %s9196_s14 }
 0x232   : > { %p7146_p7 = pnand %p7144_p1, %p9191_p8 }
 0x234   : > { %p7147_p13 = pneg %p7146_p7 }
 0x236   : > { %p7152_p12 = pnand %p7150_p11, %p7147_p13 }
 0x238   : > { %7155 = shalt.err (!%p7152_p12)
}
 0x239   : > { %s7156_s29 = scalar_lea.vmem %s834_s8, 512  ;;  %p7164_p0 = scmp.lt.s32.totalorder %s834_s8, %s834_s8 }
 0x23a   : > { %p7157_p2 = scmp.ne.s32.totalorder %s834_s8, %s7156_s29  ;;  %p7165_p3 = scmp.lt.s32.totalorder %s7156_s29, %s7156_s29 }
 0x23c   : > { %p7159_p4 = pnand %p7157_p2, %p9191_p8  ;;  %p7166_p5 = por %p7165_p3, %p7164_p0 }
 0x23e   : > { %p7160_p10 = pneg %p7159_p4 }
 0x240   : > { %p7167_p9 = pnand %p7166_p5, %p7160_p10 }
 0x242   : > { %7170 = shalt.err (!%p7167_p9)
}
 0x243   : > { %6353 = dma.hbm_to_vmem [thread:$0]  (!%p9192_p6), %s9196_s14, 512, %s834_s8, [#allocation24], %s9185_s20, %s9185_s20, %s9184_s17  }
 0x244   : > { %s9197_s7 = sld [smem:[#allocation88_spill]] }
 0x24a   : > { %s7171_s6 = scalar_lea.hbm %s9197_s7, 512 }
 0x24b   : > { %p7172_p1 = scmp.ne.s32.totalorder %s9197_s7, %s7171_s6  ;;  %p7178_p11 = scmp.lt.u32.totalorder %s7171_s6, %s9197_s7 }
 0x24d   : > { %p7174_p7 = pnand %p7172_p1, %p9191_p8 }
 0x24f   : > { %p7175_p13 = pneg %p7174_p7 }
 0x251   : > { %p7180_p12 = pnand %p7178_p11, %p7175_p13 }
 0x253   : > { %7183 = shalt.err (!%p7180_p12)
}
 0x254   : > { %s7184_s29 = scalar_lea.vmem %s858_s19, 512  ;;  %p7192_p0 = scmp.lt.s32.totalorder %s858_s19, %s858_s19 }
 0x255   : > { %p7185_p2 = scmp.ne.s32.totalorder %s858_s19, %s7184_s29  ;;  %p7193_p3 = scmp.lt.s32.totalorder %s7184_s29, %s7184_s29 }
 0x257   : > { %p7187_p4 = pnand %p7185_p2, %p9191_p8  ;;  %p7194_p5 = por %p7193_p3, %p7192_p0 }
 0x259   : > { %p7188_p10 = pneg %p7187_p4 }
 0x25b   : > { %p7195_p9 = pnand %p7194_p5, %p7188_p10 }
 0x25d   : > { %7198 = shalt.err (!%p7195_p9)
}
 0x25e   : > { %6359 = dma.hbm_to_vmem [thread:$0]  (!%p9192_p6), %s9197_s7, 512, %s858_s19, [#allocation27], %s9185_s20, %s9185_s20, %s9184_s17  }
 0x25f   : > { %s7606_s23 = smov [#allocation31]   ;;  %s7607_s27 = smov [#allocation34]  }
 0x260   : > { %s881_s24 = sshll.u32 %s7606_s23, 4  ;;  %s905_s6 = sshll.u32 %s7607_s27, 4  ;;  %s882_s24 = int_to_ptr.vmem [resolvable:$true] %s881_s24  ;;  %s906_s6 = int_to_ptr.vmem [resolvable:$true] %s905_s6 }
 0x261   : > { %s9198_s9 = sld [smem:[#allocation90_spill]] }
 0x267   : > { %s9199_s10 = smov %s9198_s9  ;;  %s7199_s29 = scalar_lea.hbm %s9198_s9, 512 }
 0x268   : > { %p7200_p1 = scmp.ne.s32.totalorder %s9199_s10, %s7199_s29  ;;  %p7206_p11 = scmp.lt.u32.totalorder %s7199_s29, %s9199_s10 }
 0x26a   : > { %p7202_p7 = pnand %p7200_p1, %p9191_p8 }
 0x26c   : > { %p7203_p13 = pneg %p7202_p7 }
 0x26e   : > { %p7208_p12 = pnand %p7206_p11, %p7203_p13 }
 0x270   : > { %7211 = shalt.err (!%p7208_p12)
}
 0x271   : > { %s7212_s19 = scalar_lea.vmem %s882_s24, 512  ;;  %p7220_p0 = scmp.lt.s32.totalorder %s882_s24, %s882_s24 }
 0x272   : > { %p7213_p2 = scmp.ne.s32.totalorder %s882_s24, %s7212_s19  ;;  %p7221_p3 = scmp.lt.s32.totalorder %s7212_s19, %s7212_s19 }
 0x274   : > { %p7215_p4 = pnand %p7213_p2, %p9191_p8  ;;  %p7222_p5 = por %p7221_p3, %p7220_p0 }
 0x276   : > { %p7216_p10 = pneg %p7215_p4 }
 0x278   : > { %p7223_p9 = pnand %p7222_p5, %p7216_p10 }
 0x27a   : > { %7226 = shalt.err (!%p7223_p9)
}
 0x27b   : > { %6365 = dma.hbm_to_vmem [thread:$0]  (!%p9192_p6), %s9199_s10, 512, %s882_s24, [#allocation30], %s9185_s20, %s9185_s20, %s9184_s17  }
 0x27c   : > { %s9200_s23 = sld [smem:[#allocation92_spill]] }
 0x282   : > { %s7227_s27 = scalar_lea.hbm %s9200_s23, 1024 }
 0x283   : > { %p7228_p1 = scmp.ne.s32.totalorder %s9200_s23, %s7227_s27  ;;  %p7234_p11 = scmp.lt.u32.totalorder %s7227_s27, %s9200_s23 }
 0x285   : > { %p7230_p7 = pnand %p7228_p1, %p9191_p8 }
 0x287   : > { %p7231_p13 = pneg %p7230_p7 }
 0x289   : > { %p7236_p12 = pnand %p7234_p11, %p7231_p13 }
 0x28b   : > { %7239 = shalt.err (!%p7236_p12)
}
 0x28c   : > { %s7240_s8 = scalar_lea.vmem %s906_s6, 1024  ;;  %p7248_p0 = scmp.lt.s32.totalorder %s906_s6, %s906_s6 }
 0x28d   : > { %p7241_p2 = scmp.ne.s32.totalorder %s906_s6, %s7240_s8  ;;  %p7249_p3 = scmp.lt.s32.totalorder %s7240_s8, %s7240_s8 }
 0x28f   : > { %p7243_p4 = pnand %p7241_p2, %p9191_p8  ;;  %p7250_p5 = por %p7249_p3, %p7248_p0 }
 0x291   : > { %p7244_p10 = pneg %p7243_p4 }
 0x293   : > { %p7251_p9 = pnand %p7250_p5, %p7244_p10 }
 0x295   : > { %7254 = shalt.err (!%p7251_p9)
}
 0x296   : > { %6371 = dma.hbm_to_vmem [thread:$0]  (!%p9192_p6), %s9200_s23, 1024, %s906_s6, [#allocation33], %s9185_s20, %s9185_s20, %s9184_s17  }
 0x297   : > { %s7608_s14 = smov [#allocation37]   ;;  %s7609_s1 = smov [#allocation40]  }
 0x298   : > { %s930_s13 = sshll.u32 %s7608_s14, 4  ;;  %s952_s3 = sshll.u32 %s7609_s1, 4  ;;  %s931_s13 = int_to_ptr.vmem [resolvable:$true] %s930_s13  ;;  %s953_s3 = int_to_ptr.vmem [resolvable:$true] %s952_s3 }
 0x299   : > { %s9201_s25 = sld [smem:[#allocation94_spill]] }
 0x29f   : > { %s7255_s9 = scalar_lea.hbm %s9201_s25, 16 }
 0x2a0   : > { %p7256_p1 = scmp.ne.s32.totalorder %s9201_s25, %s7255_s9  ;;  %p7262_p11 = scmp.lt.u32.totalorder %s7255_s9, %s9201_s25 }
 0x2a2   : > { %p7258_p7 = pnand %p7256_p1, %p9191_p8 }
 0x2a4   : > { %p7259_p13 = pneg %p7258_p7 }
 0x2a6   : > { %p7264_p12 = pnand %p7262_p11, %p7259_p13 }
 0x2a8   : > { %7267 = shalt.err (!%p7264_p12)
}
 0x2a9   : > { %s7268_s6 = scalar_lea.vmem %s931_s13, 16  ;;  %s7275_s19 = scalar_lea.vmem %s931_s13, 32 }
 0x2aa   : > { %p7269_p2 = scmp.ne.s32.totalorder %s931_s13, %s7268_s6  ;;  %p7276_p0 = scmp.lt.s32.totalorder %s931_s13, %s931_s13 }
 0x2ab   : > { %p7277_p3 = scmp.lt.s32.totalorder %s7275_s19, %s7268_s6 }
 0x2ac   : > { %p7271_p4 = pnand %p7269_p2, %p9191_p8 }
 0x2ad   : > { %p7278_p5 = por %p7277_p3, %p7276_p0 }
 0x2ae   : > { %p7272_p10 = pneg %p7271_p4 }
 0x2b0   : > { %p7279_p9 = pnand %p7278_p5, %p7272_p10 }
 0x2b2   : > { %7282 = shalt.err (!%p7279_p9)
}
 0x2b3   : > { %6377 = dma.hbm_to_vmem [thread:$0]  (!%p9192_p6), %s9201_s25, 16, %s931_s13, [#allocation36]  }
 0x2b4   : > { %s9202_s16 = sld [smem:[#allocation96_spill]] }
 0x2ba   : > { %s7283_s9 = scalar_lea.hbm %s9202_s16, 16 }
 0x2bb   : > { %p7284_p1 = scmp.ne.s32.totalorder %s9202_s16, %s7283_s9  ;;  %p7290_p11 = scmp.lt.u32.totalorder %s7283_s9, %s9202_s16 }
 0x2bd   : > { %p7286_p7 = pnand %p7284_p1, %p9191_p8 }
 0x2bf   : > { %p7287_p13 = pneg %p7286_p7 }
 0x2c1   : > { %p7292_p12 = pnand %p7290_p11, %p7287_p13 }
 0x2c3   : > { %7295 = shalt.err (!%p7292_p12)
}
 0x2c4   : > { %s7296_s19 = scalar_lea.vmem %s953_s3, 16  ;;  %s7303_s13 = scalar_lea.vmem %s953_s3, 32 }
 0x2c5   : > { %p7297_p2 = scmp.ne.s32.totalorder %s953_s3, %s7296_s19  ;;  %p7304_p0 = scmp.lt.s32.totalorder %s953_s3, %s953_s3 }
 0x2c6   : > { %p7305_p3 = scmp.lt.s32.totalorder %s7303_s13, %s7296_s19 }
 0x2c7   : > { %p7299_p4 = pnand %p7297_p2, %p9191_p8 }
 0x2c8   : > { %p7306_p5 = por %p7305_p3, %p7304_p0 }
 0x2c9   : > { %p7300_p10 = pneg %p7299_p4 }
 0x2cb   : > { %p7307_p9 = pnand %p7306_p5, %p7300_p10 }
 0x2cd   : > { %7310 = shalt.err (!%p7307_p9)
}
 0x2ce   : > { %6383 = dma.hbm_to_vmem [thread:$0]  (!%p9192_p6), %s9202_s16, 16, %s953_s3, [#allocation39]  }
 0x2cf   : > { %s7610_s7 = smov [#allocation43]   ;;  %s7611_s9 = smov [#allocation44]  }
 0x2d0   : > { %s974_s27 = sshll.u32 %s7610_s7, 4  ;;  %s985_s29 = sshll.u32 %s7611_s9, 4  ;;  %s975_s27 = int_to_ptr.vmem [resolvable:$true] %s974_s27  ;;  %s986_s29 = int_to_ptr.vmem [resolvable:$true] %s985_s29 }
 0x2d1   : > { %s9203_s6 = sld [smem:[#allocation98_spill]] }
 0x2d7   : > { %s7311_s10 = scalar_lea.hbm %s9203_s6, 16 }
 0x2d8   : > { %p7312_p1 = scmp.ne.s32.totalorder %s9203_s6, %s7311_s10  ;;  %p7318_p11 = scmp.lt.u32.totalorder %s7311_s10, %s9203_s6 }
 0x2da   : > { %p7314_p7 = pnand %p7312_p1, %p9191_p8 }
 0x2dc   : > { %p7315_p13 = pneg %p7314_p7 }
 0x2de   : > { %p7320_p12 = pnand %p7318_p11, %p7315_p13 }
 0x2e0   : > { %7323 = shalt.err (!%p7320_p12)
}
 0x2e1   : > { %s7324_s3 = scalar_lea.vmem %s975_s27, 16  ;;  %s7331_s1 = scalar_lea.vmem %s975_s27, 32 }
 0x2e2   : > { %p7325_p2 = scmp.ne.s32.totalorder %s975_s27, %s7324_s3  ;;  %p7332_p0 = scmp.lt.s32.totalorder %s975_s27, %s975_s27 }
 0x2e3   : > { %p7333_p3 = scmp.lt.s32.totalorder %s7331_s1, %s7324_s3 }
 0x2e4   : > { %p7327_p4 = pnand %p7325_p2, %p9191_p8 }
 0x2e5   : > { %p7334_p5 = por %p7333_p3, %p7332_p0 }
 0x2e6   : > { %p7328_p10 = pneg %p7327_p4 }
 0x2e8   : > { %p7335_p9 = pnand %p7334_p5, %p7328_p10 }
 0x2ea   : > { %7338 = shalt.err (!%p7335_p9)
}
 0x2eb   : > { %6389 = dma.hbm_to_vmem [thread:$0]  (!%p9192_p6), %s9203_s6, 16, %s975_s27, [#allocation42]  }
 0x2ec   : > { %s9204_s8 = sld [smem:[#allocation99_spill]] }
 0x2f2   : > { %s9205_s24 = smov %s9204_s8  ;;  %s7339_s19 = scalar_lea.hbm %s9204_s8, 16 }
 0x2f3   : > { %p7340_p1 = scmp.ne.s32.totalorder %s9205_s24, %s7339_s19  ;;  %p7346_p11 = scmp.lt.u32.totalorder %s7339_s19, %s9205_s24 }
 0x2f5   : > { %p7342_p7 = pnand %p7340_p1, %p9191_p8 }
 0x2f7   : > { %p7343_p13 = pneg %p7342_p7 }
 0x2f9   : > { %p7348_p12 = pnand %p7346_p11, %p7343_p13 }
 0x2fb   : > { %7351 = shalt.err (!%p7348_p12)
}
 0x2fc   : > { %s7352_s7 = scalar_lea.vmem %s986_s29, 16  ;;  %s7359_s27 = scalar_lea.vmem %s986_s29, 32 }
 0x2fd   : > { %p7353_p2 = scmp.ne.s32.totalorder %s986_s29, %s7352_s7  ;;  %p7360_p0 = scmp.lt.s32.totalorder %s986_s29, %s986_s29 }
 0x2fe   : > { %p7361_p3 = scmp.lt.s32.totalorder %s7359_s27, %s7352_s7 }
 0x2ff   : > { %p7355_p4 = pnand %p7353_p2, %p9191_p8 }
 0x300   : > { %p7362_p5 = por %p7361_p3, %p7360_p0 }
 0x301   : > { %p7356_p10 = pneg %p7355_p4 }
 0x303   : > { %p7363_p9 = pnand %p7362_p5, %p7356_p10 }
 0x305   : > { %7366 = shalt.err (!%p7363_p9)
}
 0x306   : > { %6392 = dma.hbm_to_vmem [thread:$0]  (!%p9192_p6), %s9205_s24, 16, %s986_s29, [#allocation45]  }
 0x307   : > { %s9124_s11 = sshll.u32 %s8083_s0, 4  ;;  %s5624_s10 = sshll.u32 %s7583_s30, 8 }
 0x308   : > { %s9206_s13 = sld [smem:[#allocation72_spill]]  ;;  %s1000_s2 = scalar_lea.vmem [#allocation2], %s9124_s11 }
 0x309   : > { %s1007_s3 = sshll.u32 %s1000_s2, 4  ;;  %s9207_s27 = sld [smem:[#allocation74_spill]]  ;;  %s8407_s3 = int_to_ptr.vmem [resolvable:$true] %s1007_s3 }
 0x30a   : > { %s997_s9 = scalar_lea.sflag [#allocation3], %s8083_s0  ;;  %p9208_p6 = scmp.ne.s32.totalorder %s9183_s22, 0 }
 0x30e   : > { %s8403_s14 = scalar_lea.hbm %s9206_s13, %s5624_s10  ;;  %s7372_s6 = scalar_lea.hbm %s9206_s13, 512 }
 0x30f   : > { %s8412_s29 = scalar_lea.hbm %s9207_s27, %s5624_s10  ;;  %s7367_s18 = scalar_lea.hbm %s8403_s14, 256 }
 0x310   : > { %p7368_p8 = scmp.ne.s32.totalorder %s8403_s14, %s7367_s18  ;;  %p7373_p13 = scmp.lt.u32.totalorder %s8403_s14, %s9206_s13 }
 0x311   : > { %p7374_p11 = scmp.lt.u32.totalorder %s7372_s6, %s7367_s18  ;;  %p7376_p2 = scmp.lt.u32.totalorder %s7367_s18, %s8403_s14 }
 0x312   : > { %p7370_p1 = pnand %p7368_p8, %p9208_p6 }
 0x313   : > { %p7375_p12 = por %p7374_p11, %p7373_p13 }
 0x314   : > { %p7371_p7 = pneg %p7370_p1 }
 0x315   : > { %p7377_p4 = por %p7376_p2, %p7375_p12 }
 0x317   : > { %p7378_p10 = pnand %p7377_p4, %p7371_p7 }
 0x319   : > { %7381 = shalt.err (!%p7378_p10)
}
 0x31a   : > { %s7382_s10 = scalar_lea.vmem %s8407_s3, 256  ;;  %s7612_s2 = smov [#allocation2]  }
 0x31b   : > { %p7383_p0 = scmp.ne.s32.totalorder %s8407_s3, %s7382_s10  ;;  %s7387_s1 = sshll.u32 %s7612_s2, 4  ;;  %s7388_s1 = int_to_ptr.vmem [resolvable:$false] %s7387_s1 }
 0x31c   : > { %s7389_s16 = scalar_lea.vmem %s7388_s1, 512  ;;  %p7390_p9 = scmp.lt.s32.totalorder %s8407_s3, %s7388_s1 }
 0x31d   : > { %p7385_p3 = pnand %p7383_p0, %p9208_p6  ;;  %p7391_p8 = scmp.lt.s32.totalorder %s7389_s16, %s7382_s10 }
 0x31f   : > { %p7386_p5 = pneg %p7385_p3  ;;  %p7392_p1 = por %p7391_p8, %p7390_p9 }
 0x321   : > { %p7393_p13 = pnand %p7392_p1, %p7386_p5 }
 0x323   : > { %7396 = shalt.err (!%p7393_p13)
}
 0x324   : > { %p9209_p7 = scmp.ne.s32.totalorder %s9181_s4, 0  ;;  %s9210_s6 = sshll.u32 %s8155_s21, 4  ;;  %s8443_s6 = int_to_ptr.vmem [resolvable:$true] %s9210_s6 }
 0x325   : > { %s9211_s11 = sshll.u32 %s8083_s0, 4  ;;  %s7397_s8 = scalar_lea.hbm %s8412_s29, 256 }
 0x326   : > { %6396 = dma.hbm_to_vmem [thread:$0]  (!%p9209_p7), %s8403_s14, 256, %s8407_s3, %s997_s9, %s9185_s20, %s9185_s20, %s9184_s17  }
 0x327   : > { %s1043_s7 = scalar_lea.vmem [#allocation7], %s9211_s11  ;;  %p7398_p11 = scmp.ne.s32.totalorder %s8412_s29, %s7397_s8 }
 0x328   : > { %s1050_s18 = sshll.u32 %s1043_s7, 4  ;;  %s7402_s2 = scalar_lea.hbm %s9207_s27, 512  ;;  %s8447_s18 = int_to_ptr.vmem [resolvable:$true] %s1050_s18 }
 0x329   : > { %p7400_p12 = pnand %p7398_p11, %p9208_p6  ;;  %p7403_p4 = scmp.lt.u32.totalorder %s8412_s29, %s9207_s27 }
 0x32a   : > { %p7404_p10 = scmp.lt.u32.totalorder %s7402_s2, %s7397_s8  ;;  %p7406_p3 = scmp.lt.u32.totalorder %s7397_s8, %s8412_s29 }
 0x32b   : > { %p7401_p2 = pneg %p7400_p12 }
 0x32c   : > { %p7405_p0 = por %p7404_p10, %p7403_p4 }
 0x32e   : > { %p7407_p5 = por %p7406_p3, %p7405_p0 }
 0x330   : > { %p7408_p9 = pnand %p7407_p5, %p7401_p2 }
 0x332   : > { %7411 = shalt.err (!%p7408_p9)
}
 0x333   : > { %s7412_s21 = scalar_lea.vmem %s8447_s18, 256  ;;  %s7613_s0 = smov [#allocation7]  }
 0x334   : > { %p7413_p8 = scmp.ne.s32.totalorder %s8447_s18, %s7412_s21  ;;  %s7417_s14 = sshll.u32 %s7613_s0, 4  ;;  %s7418_s14 = int_to_ptr.vmem [resolvable:$false] %s7417_s14 }
 0x335   : > { %s7419_s3 = scalar_lea.vmem %s7418_s14, 512  ;;  %p7420_p11 = scmp.lt.s32.totalorder %s8447_s18, %s7418_s14 }
 0x336   : > { %p7415_p1 = pnand %p7413_p8, %p9208_p6  ;;  %p7421_p12 = scmp.lt.s32.totalorder %s7419_s3, %s7412_s21 }
 0x338   : > { %p7416_p13 = pneg %p7415_p1  ;;  %p7422_p4 = por %p7421_p12, %p7420_p11 }
 0x33a   : > { %p7423_p10 = pnand %p7422_p4, %p7416_p13 }
 0x33c   : > { %7426 = shalt.err (!%p7423_p10)
}
 0x33d   : > { %6402 = dma.hbm_to_vmem [thread:$0]  (!%p9209_p7), %s8412_s29, 256, %s8447_s18, %s8113_s15, %s9185_s20, %s9185_s20, %s9184_s17  }
 0x33e   : > { %s9212_s9 = sand.u32 1, %s7583_s30   ;;  %s7427_s7 = scalar_lea.hbm %s8151_s12, 512 }
 0x33f   : > { %s8476_s11 = scalar_lea.sflag [#allocation9], %s9212_s9  ;;  %p7428_p2 = scmp.ne.s32.totalorder %s8151_s12, %s7427_s7 }
 0x340   : > { %s7432_s10 = scalar_lea.hbm %s9187_s28, 1024  ;;  %p7433_p5 = scmp.lt.u32.totalorder %s8151_s12, %s9187_s28 }
 0x341   : > { %p7430_p0 = pnand %p7428_p2, %p9208_p6  ;;  %p7434_p9 = scmp.lt.u32.totalorder %s7432_s10, %s7427_s7 }
 0x342   : > { %p7436_p1 = scmp.lt.u32.totalorder %s7427_s7, %s8151_s12 }
 0x343   : > { %p7431_p3 = pneg %p7430_p0  ;;  %p7435_p8 = por %p7434_p9, %p7433_p5 }
 0x345   : > { %p7437_p13 = por %p7436_p1, %p7435_p8 }
 0x347   : > { %p7438_p11 = pnand %p7437_p13, %p7431_p3 }
 0x349   : > { %7441 = shalt.err (!%p7438_p11)
}
 0x34a   : > { %s7442_s15 = scalar_lea.vmem %s8443_s6, 512  ;;  %s7614_s29 = smov [#allocation8]  }
 0x34b   : > { %p7443_p12 = scmp.ne.s32.totalorder %s8443_s6, %s7442_s15  ;;  %s7447_s18 = sshll.u32 %s7614_s29, 4  ;;  %s7448_s18 = int_to_ptr.vmem [resolvable:$false] %s7447_s18 }
 0x34c   : > { %s7449_s16 = scalar_lea.vmem %s7448_s18, 1024  ;;  %p7450_p2 = scmp.lt.s32.totalorder %s8443_s6, %s7448_s18 }
 0x34d   : > { %p7445_p4 = pnand %p7443_p12, %p9208_p6  ;;  %p7451_p0 = scmp.lt.s32.totalorder %s7449_s16, %s7442_s15 }
 0x34f   : > { %p7446_p10 = pneg %p7445_p4  ;;  %p7452_p5 = por %p7451_p0, %p7450_p2 }
 0x351   : > { %p7453_p9 = pnand %p7452_p5, %p7446_p10 }
 0x353   : > { %7456 = shalt.err (!%p7453_p9)
}
 0x354   : > { %6405 = dma.hbm_to_vmem [thread:$0]  (!%p9209_p7), %s8151_s12, 512, %s8443_s6, %s8476_s11, %s9185_s20, %s9185_s20, %s9184_s17  }
 0x355   : > { %s9213_s22 = sld [smem:[#allocation67_spill]] }
 0x35b   : > { %p9214_p6 = scmp.ne.s32.totalorder %s9213_s22, 0 }
 0x35c   : > { %s8506_s21 = sand.u32 (!%p9214_p6), 1, %s7575_s5   ;;  %p9215_p3 = scmp.ne.s32.totalorder (!%p9214_p6), %s9176_s26, 0 }
 0x35d   : > { %1084 = sbr.rel (%p9214_p6) target bundleno = 6391 (0x18f7), region = 132  ;;  %s8509_s0 = sshll.u32 (!%p9214_p6), %s8506_s21, 4 }
 0x35e   : > { %s1087_s4 = scalar_lea.sflag (!%p9214_p6), [#allocation3], %s8506_s21  ;;  %s1090_s14 = scalar_lea.vmem (!%p9214_p6), [#allocation2], %s8509_s0 }
 0x364   : > { %7502 = dma.done.wait (%p9215_p3), %s1087_s4, 256  }
 0x365   : > { %7504 = vsyncadd (%p9215_p3), %s1087_s4, 4294967040  ;;  %s9216_s17 = sld [smem:[#allocation66_spill]]  ;;  %s5498_s12 = sshll.u32 %s8506_s21, 5 }
 0x366   : > { %s8519_s3 = scalar_lea.vmem [#allocation5], %s5498_s12 }
 0x36b   : > { %s1095_s20 = sand.u32 1, %s9216_s17  }
 0x36c   : > { %s1096_s6 = scalar_lea.sflag [#allocation6], %s1095_s20 }
 0x36d   : > { %7506 = dma.done.wait (%p9215_p3), %s1096_s6, 768  }
 0x36e   : > { %7508 = vsyncadd (%p9215_p3), %s1096_s6, 4294966528  ;;  %s1108_s9 = scalar_lea.vmem [#allocation7], %s8509_s0  ;;  %s1114_s11 = scalar_lea.sflag [#allocation9], %s1095_s20 }
 0x36f   : > { %s8526_s7 = scalar_lea.vmem [#allocation8], %s5498_s12 }
 0x370   : > { %7510 = dma.done.wait (%p9215_p3), %s1114_s11, 512  }
 0x371   : > { %7512 = vsyncadd (%p9215_p3), %s1114_s11, 4294966784  ;;  %p9217_p7 = scmp.eq.s32.totalorder %s9216_s17, 0 }
 0x373   : > { %7514 = dma.done.wait (%p9217_p7), [#allocation9], 512   ;;  %p9218_p8 = pmov %p9217_p7 }
 0x374   : > { %p9219_p1 = pmov %p9217_p7 }
 0x375   : > { %7516 = vsyncadd (%p9218_p8), [#allocation9], 4294966784 }
 0x376   : > { %7518 = dma.done.wait (%p9219_p1), [#allocation12], 528   ;;  %p9220_p13 = pmov %p9219_p1 }
 0x377   : > { %p9221_p11 = pmov %p9219_p1 }
 0x378   : > { %7520 = vsyncadd (%p9220_p13), [#allocation12], 4294966768 }
 0x379   : > { %7522 = dma.done.wait (%p9221_p11), [#allocation15], 528   ;;  %p9222_p12 = pmov %p9219_p1 }
 0x37a   : > { %p9223_p4 = pmov %p9219_p1 }
 0x37b   : > { %7524 = vsyncadd (%p9222_p12), [#allocation15], 4294966768 }
 0x37c   : > { %7526 = dma.done.wait (%p9223_p4), [#allocation18], 528   ;;  %p9224_p10 = pmov %p9219_p1 }
 0x37d   : > { %p9225_p2 = pmov %p9219_p1 }
 0x37e   : > { %7528 = vsyncadd (%p9224_p10), [#allocation18], 4294966768 }
 0x37f   : > { %7530 = dma.done.wait (%p9225_p2), [#allocation21], 528   ;;  %p9226_p0 = pmov %p9219_p1 }
 0x381   : > { %7532 = vsyncadd (%p9226_p0), [#allocation21], 4294966768  ;;  %p9227_p5 = pmov %p9226_p0 }
 0x382   : > { %p9228_p9 = pmov %p9226_p0 }
 0x383   : > { %7534 = dma.done.wait (%p9227_p5), [#allocation24], 528  }
 0x384   : > { %7536 = vsyncadd (%p9228_p9), [#allocation24], 4294966768  ;;  %p9229_p6 = pmov %p9226_p0 }
 0x385   : > { %p9230_p3 = pmov %p9226_p0 }
 0x386   : > { %7538 = dma.done.wait (%p9229_p6), [#allocation27], 528  }
 0x387   : > { %7540 = vsyncadd (%p9230_p3), [#allocation27], 4294966768  ;;  %p9231_p7 = pmov %p9226_p0 }
 0x388   : > { %p9232_p8 = pmov %p9226_p0 }
 0x389   : > { %7542 = dma.done.wait (%p9231_p7), [#allocation30], 528  }
 0x38a   : > { %7544 = vsyncadd (%p9232_p8), [#allocation30], 4294966768  ;;  %p9233_p1 = pmov %p9226_p0 }
 0x38b   : > { %p9234_p13 = pmov %p9226_p0 }
 0x38c   : > { %7546 = dma.done.wait (%p9233_p1), [#allocation33], 1040  }
 0x38d   : > { %7548 = vsyncadd (%p9234_p13), [#allocation33], 4294966256  ;;  %p9235_p11 = pmov %p9226_p0 }
 0x38e   : > { %p9236_p12 = pmov %p9226_p0 }
 0x38f   : > { %7550 = dma.done.wait (%p9235_p11), [#allocation36], 32  }
 0x390   : > { %7552 = vsyncadd (%p9236_p12), [#allocation36], 4294967264  ;;  %p9237_p4 = pmov %p9226_p0 }
 0x391   : > { %p9238_p10 = pmov %p9226_p0 }
 0x392   : > { %7554 = dma.done.wait (%p9237_p4), [#allocation39], 32  }
 0x393   : > { %7556 = vsyncadd (%p9238_p10), [#allocation39], 4294967264  ;;  %p9239_p2 = pmov %p9226_p0 }
 0x395   : > { %7558 = dma.done.wait (%p9239_p2), [#allocation42], 32  }
 0x396   : > { %7560 = vsyncadd (%p9226_p0), [#allocation42], 4294967264  ;;  %p9240_p5 = pmov %p9226_p0 }
 0x397   : > { %p9241_p9 = pmov %p9226_p0 }
 0x398   : > { %7562 = dma.done.wait (%p9240_p5), [#allocation45], 16  }
 0x399   : > { %7564 = vsyncadd (%p9241_p9), [#allocation45], 4294967280  ;;  %v1320_v0 = vld [vmem:[#allocation10] sm:$0xff]  ;;  %v1321_v1 = vld [vmem:[#allocation10 + $0x8] sm:$0xff]  ;;  %vm1331_vm0 = vcmask 261120   ;;  %v7615_v12 = vmov 0.0  }
 0x39a   : > { %v1322_v2 = vld [vmem:[#allocation10 + $0x10] sm:$0xff]  ;;  %v6078_v3 = vpack.c.bf16 %v1321_v1, %v1320_v0  ;;  %v1323_v4 = vld [vmem:[#allocation10 + $0x18] sm:$0xff]  ;;  %5795 = vmatprep.subr.mxu0 %v7615_v12  ;;  %v5526_v13 = vld [vmem:[#allocation11] ss:$0 sm:$0xff]  ;;  %vm7616_vm1 = vmmov 0   ;;  %s7617_s26 = smov 104  }
 0x39b   : > { %v8586_v5 = vld [vmem:[%s1090_s14] sm:$0xff]  ;;  %v6082_v7 = vpack.c.bf16 %v1323_v4, %v1322_v2  ;;  %v8597_v9 = vld [vmem:[%s1090_s14 + $0x8] sm:$0xff]  ;;  %5797 = vmatprep.mubr.msk.f32.mxu0 %vm7616_vm1, %v7615_v12  ;;  %s7618_s8 = smov 120   ;;  %s7619_s19 = smov 96   ;;  %vm1524_vm2 = vcmask 64512   ;;  %vm2176_vm3 = vcmask 130048  }
 0x39c   : > { %v8590_v6 = vld [vmem:[%s1108_s9] sm:$0xff]  ;;  %6079 = vmatprep.subr.bf16.mxu1 %v6078_v3  ;;  %v8601_v10 = vld [vmem:[%s1108_s9 + $0x8] sm:$0xff]  ;;  %s7620_s10 = smov 112   ;;  %s7621_s2 = smov 16   ;;  %vm2178_vm4 = vcmask 195584   ;;  %vm8792_vm5 = vmpackc.low %vm1524_vm2, %vm1524_vm2  ;;  %vm4944_vm6 = vcmask 523264  }
 0x39d   : > { %v1318_v8 = vadd.f32 %v8590_v6, %v8586_v5  ;;  %6081 = vmatpush3.bf16.msra.mxu1 %v6078_v3  ;;  %v1319_v11 = vadd.f32 %v8601_v10, %v8597_v9  ;;  %v1413_v14 = vld [vmem:[#allocation13] sm:$0xff]  ;;  %v1414_v15 = vld [vmem:[#allocation13 + $0x8] sm:$0xff]  ;;  %v1415_v16 = vld [vmem:[#allocation13 + $0x10] sm:$0xff]  ;;  %s7622_s1 = smov 24   ;;  %s7623_s15 = smov 8  }
 0x39e   : > { %6083 = vmatprep.subr.bf16.mxu1 %v6082_v7  ;;  %v6086_v17 = vpack.c.bf16 %v1414_v15, %v1413_v14  ;;  %v1416_v18 = vld [vmem:[#allocation13 + $0x18] sm:$0xff]  ;;  %v5529_v28 = vld [vmem:[#allocation14] ss:$0 sm:$0xff]  ;;  %s9244_s29 = sld [smem:[#allocation70_spill]]  ;;  %s5630_s18 = sshll.u32 %s9216_s17, 8 }
 0x39f   : > { %5781 = vmatprep.mubr.msk.f32.mxu1 %vm1331_vm0, %v1318_v8  ;;  %v6090_v20 = vpack.c.bf16 %v1416_v18, %v1415_v16  ;;  %s1300_s16 = scalar_lea.vmem [#allocation46], %s8509_s0  ;;  %s9245_s20 = sld [smem:[#allocation100_spill]] }
 0x3a0   : > { %s5088_s22 = sshll.u32 %s1300_s16, 4  ;;  %s5075_s17 = scalar_lea.sflag [#allocation4], %s8506_s21  ;;  %s8984_s22 = int_to_ptr.vmem [resolvable:$true] %s5088_s22 }
 0x3a1   : > { %6085 = vmatpush3.bf16.msra.mxu1 %v6082_v7  ;;  %s7457_s0 = scalar_lea.vmem %s8984_s22, 256  ;;  %s7625_s6 = smov [#allocation46]  }
 0x3a2   : > { %6087 = vmatprep.subr.bf16.mxu1 %v6086_v17  ;;  %p7458_p6 = scmp.ne.s32.totalorder %s8984_s22, %s7457_s0 }
 0x3a4   : > { %5782 = vmatmul.mubr.msk.f32.vlgmr.msra.gmra.mrb[0].mxu1 %vm1331_vm0, %v1319_v11  ;;  %p9246_p3 = scmp.ne.s32.totalorder %s9244_s29, 0 }
 0x3a5   : > { %5792 = vmatprep.mubr.msk.f32.mxu1 %vm1331_vm0, %v8586_v5  ;;  %6089 = vmatpush3.bf16.msra.mxu1 %v6086_v17  ;;  %s8982_s12 = scalar_lea.hbm %s9245_s20, %s5630_s18 }
 0x3a6   : > { %6091 = vmatprep.subr.bf16.mxu1 %v6090_v20  ;;  %p7459_p7 = pnand %p7458_p6, %p9246_p3 }
 0x3a8   : > { %p7460_p8 = pneg %p7459_p7 }
 0x3a9   : > { %6093 = vmatpush3.bf16.msra.mxu1 %v6090_v20 }
 0x3aa   : > { %5800 = vmatprep.subr.mxu1 %v7615_v12 }
 0x3ac   : > { %5793 = vmatmul.mubr.msk.f32.vlgmr.msra.gmra.mrb[2].mxu1 %vm1331_vm0, %v8597_v9 }
 0x3ad   : > { %5802 = vmatprep.mubr.msk.f32.mxu1 %vm7616_vm1, %v7615_v12 }
 0x477   : > { %v5783_v19 = vpop.f32.mrb[0].mxu1 }
 0x478   : > { %v8611_v21 = vadd.f32 %v5783_v19, %v5526_v13  ;;  %v1404_v22 = vpop.f32.mrb[1].mxu1 }
 0x479   : > { %v1405_v23 = vadd.f32 %v5526_v13, %v1404_v22 }
 0x47b   : > { %1510 = vrot.lane.b32.xlu1 %v1405_v23, %s7617_s26  ;;  %1506 = vrot.lane.b32.xlu0 %v1405_v23, %s7618_s8 }
 0x47f   : > { %1522 = vrot.lane.b32.xlu1 %v1405_v23, %s7619_s19  ;;  %1508 = vrot.lane.b32.xlu0 %v1405_v23, %s7620_s10  ;;  %v5794_v29 = vpop.f32.mrb[2].mxu1 }
 0x480   : > { %v8630_v30 = vadd.f32 %v5794_v29, %v5529_v28  ;;  %v1496_v31 = vpop.f32.mrb[3].mxu1 }
 0x481   : > { %v1497_v35 = vadd.f32 %v5529_v28, %v1496_v31 }
 0x4ed   : > { %v1511_v24 = vpop.permute.xlu1 %1510  ;;  %v1507_v25 = vpop.permute.xlu0 %1506 }
 0x4ee   : > { %1599 = vrot.lane.b32.xlu0 %v1507_v25, %s7619_s19 }
 0x4f1   : > { %v1523_v26 = vpop.permute.xlu1 %1522  ;;  %v1509_v27 = vpop.permute.xlu0 %1508 }
 0x4f2   : > { %5796 = vmatpush3.xpose.msk.msra.mxu0 %vm1524_vm2, %v1523_v26  ;;  %1751 = vrot.lane.b32.xlu0 %v1511_v24, %s7619_s19 }
 0x4f3   : > { %1675 = vrot.lane.b32.xlu1 %v1509_v27, %s7619_s19  ;;  %5805 = vmatprep.subr.mxu0 %v7615_v12 }
 0x4f5   : > { %5798 = vmatmul.mubr.msk.f32.vlgmr.msra.gmra.mrb[0].mxu0 %vm1524_vm2, %v1405_v23 }
 0x4f6   : > { %5807 = vmatprep.mubr.msk.f32.mxu0 %vm7616_vm1, %v7615_v12 }
 0x560   : > { %v1600_v32 = vpop.permute.xlu0 %1599 }
 0x561   : > { %5801 = vmatpush3.xpose.msk.msra.mxu1 %vm1524_vm2, %v1600_v32 }
 0x562   : > { %5810 = vmatprep.subr.mxu1 %v7615_v12 }
 0x564   : > { %5803 = vmatmul.mubr.msk.f32.vlgmr.msra.gmra.mrb[4].mxu1 %vm1524_vm2, %v1507_v25  ;;  %v1752_v33 = vpop.permute.xlu0 %1751 }
 0x565   : > { %v1676_v34 = vpop.permute.xlu1 %1675  ;;  %5811 = vmatpush3.xpose.msk.msra.mxu1 %vm1524_vm2, %v1752_v33  ;;  %5812 = vmatprep.mubr.msk.f32.mxu1 %vm7616_vm1, %v7615_v12 }
 0x566   : > { %5806 = vmatpush3.xpose.msk.msra.mxu0 %vm1524_vm2, %v1676_v34  ;;  %5820 = vmatprep.subr.mxu1 %v7615_v12 }
 0x567   : > { %5815 = vmatprep.subr.mxu0 %v7615_v12 }
 0x568   : > { %5813 = vmatmul.mubr.msk.f32.vlgmr.msra.gmra.mrb[6].mxu1 %vm1524_vm2, %v1511_v24 }
 0x569   : > { %5808 = vmatmul.mubr.msk.f32.vlgmr.msra.gmra.mrb[2].mxu0 %vm1524_vm2, %v1509_v27  ;;  %5822 = vmatprep.mubr.msk.f32.mxu1 %vm7616_vm1, %v7615_v12 }
 0x56a   : > { %5816 = vmatpush3.msra.mxu0 %v1497_v35  ;;  %5817 = vmatprep.mubr.msk.f32.mxu0 %vm7616_vm1, %v7615_v12 }
 0x56b   : > { %5825 = vmatprep.subr.mxu0 %v7615_v12 }
 0x5c8   : > { %v1595_v36 = vpop.f32.mrb[0].mxu0 }
 0x5c9   : > { %v5799_v37 = vpop.f32.mrb[1].mxu0  ;;  %v1827_v38 = vsel %vm1524_vm2, %v1595_v36, -inf }
 0x5ca   : > { %1828 = vmax.xlane.f32.xlu1 %v1827_v38 }
 0x637   : > { %v1671_v39 = vpop.f32.mrb[4].mxu1 }
 0x638   : > { %v5804_v40 = vpop.f32.mrb[5].mxu1  ;;  %v1830_v41 = vsel %vm1524_vm2, %v1671_v39, -inf }
 0x639   : > { %1831 = vmax.xlane.f32.xlu0 %v1830_v41 }
 0x63b   : > { %v1823_v42 = vpop.f32.mrb[6].mxu1 }
 0x63c   : > { %v1747_v43 = vpop.f32.mrb[2].mxu0  ;;  %v5814_v44 = vpop.f32.mrb[7].mxu1  ;;  %v1836_v45 = vsel %vm1524_vm2, %v1823_v42, -inf }
 0x63d   : > { %v5809_v46 = vpop.f32.mrb[3].mxu0  ;;  %v1833_v47 = vsel %vm1524_vm2, %v1747_v43, -inf  ;;  %1837 = vmax.xlane.f32.xlu1 %v1836_v45 }
 0x63e   : > { %1834 = vmax.xlane.f32.xlu0 %v1833_v47 }
 0x64e   : > { %2183 = vrot.lane.b32.xlu1 %v8611_v21, %s7620_s10 }
 0x652   : > { %2185 = vrot.lane.b32.xlu1 %v8611_v21, %s7617_s26 }
 0x654   : > { %2181 = vrot.lane.b32.xlu0 %v8611_v21, %s7618_s8 }
 0x656   : > { %1513 = vrot.lane.b32.xlu1 %v1497_v35, %s7618_s8 }
 0x657   : > { %v1829_v48 = vpop.xlane.xlu1 %1828 }
 0x658   : > { %1516 = vrot.lane.b32.xlu0 %v1497_v35, %s7620_s10  ;;  %v1839_v49 = vsub.f32 %v1595_v36, %v1829_v48 }
 0x65a   : > { %1519 = vrot.lane.b32.xlu1 %v1497_v35, %s7617_s26  ;;  %v1843_v50 = vmul.f32 1.442695, %v1839_v49 }
 0x65c   : > { %6589 = vpow2.f32 %v1843_v50 }
 0x666   : > { %v6590_v51 = vpop.eup %6589 }
 0x667   : > { %v1851_v52 = vsel %vm1524_vm2, %v6590_v51, 0.0 }
 0x677   : > { %1852 = vadd.xlane.f32.xlu0 %v1851_v52 }
 0x6c6   : > { %v1832_v53 = vpop.xlane.xlu0 %1831 }
 0x6c7   : > { %v1840_v54 = vsub.f32 %v1671_v39, %v1832_v53 }
 0x6c9   : > { %v1845_v55 = vmul.f32 1.442695, %v1840_v54 }
 0x6ca   : > { %v1838_v56 = vpop.xlane.xlu1 %1837 }
 0x6cb   : > { %6591 = vpow2.f32 %v1845_v55  ;;  %v1842_v57 = vsub.f32 %v1823_v42, %v1838_v56  ;;  %v1835_v58 = vpop.xlane.xlu0 %1834 }
 0x6cc   : > { %v1841_v59 = vsub.f32 %v1747_v43, %v1835_v58 }
 0x6cd   : > { %v1849_v60 = vmul.f32 1.442695, %v1842_v57 }
 0x6ce   : > { %v1847_v61 = vmul.f32 1.442695, %v1841_v59  ;;  %v8662_v62 = vpop.permute.xlu1 %2183 }
 0x6cf   : > { %v2182_v11 = vpop.permute.xlu0 %2181 }
 0x6d0   : > { %6593 = vpow2.f32 %v1847_v61 }
 0x6d1   : > { %6595 = vpow2.f32 %v1849_v60 }
 0x6d2   : > { %v8664_v63 = vpop.permute.xlu1 %2185 }
 0x6d3   : > { %v1517_v13 = vpop.permute.xlu0 %1516 }
 0x6d5   : > { %v6592_v0 = vpop.eup %6591 }
 0x6d6   : > { %v1514_v1 = vpop.permute.xlu1 %1513  ;;  %v1854_v2 = vsel %vm1524_vm2, %v6592_v0, 0.0 }
 0x6d7   : > { %5821 = vmatpush3.msra.mxu1 %v1514_v1  ;;  %1855 = vadd.xlane.f32.xlu1 %v1854_v2 }
 0x6d8   : > { %5830 = vmatprep.subr.mxu1 %v7615_v12 }
 0x6da   : > { %v6594_v3 = vpop.eup %6593  ;;  %v1520_v17 = vpop.permute.xlu1 %1519 }
 0x6db   : > { %v1857_v4 = vsel %vm1524_vm2, %v6594_v3, 0.0  ;;  %v6596_v7 = vpop.eup %6595 }
 0x6dc   : > { %1858 = vadd.xlane.f32.xlu0 %v1857_v4  ;;  %v1860_v8 = vsel %vm1524_vm2, %v6596_v7, 0.0 }
 0x6e0   : > { %1861 = vadd.xlane.f32.xlu0 %v1860_v8 }
 0x6e8   : > { %2197 = vrot.lane.b32.xlu1 %v8611_v21, %s7619_s19 }
 0x6ec   : > { %2349 = vrot.lane.b32.xlu1 %v8662_v62, %s7619_s19 }
 0x6f6   : > { %2273 = vrot.lane.b32.xlu0 %v2182_v11, %s7619_s19 }
 0x6fa   : > { %2425 = vrot.lane.b32.xlu0 %v8664_v63, %s7619_s19 }
 0x704   : > { %v1853_v14 = vpop.xlane.xlu0 %1852 }
 0x705   : > { %6597 = vrcp.f32 %v1853_v14 }
 0x70f   : > { %v6598_v15 = vpop.eup %6597 }
 0x710   : > { %v1867_v16 = vmul.f32 %v6598_v15, %v6590_v51 }
 0x712   : > { %5818 = vmatmul.mubr.msk.f32.vlgmr.msra.gmra.mrb[4].mxu0 %vm1524_vm2, %v1867_v16 }
 0x713   : > { %5826 = vmatpush3.msra.mxu0 %v1517_v13  ;;  %5827 = vmatprep.mubr.msk.f32.mxu0 %vm7616_vm1, %v7615_v12 }
 0x714   : > { %5835 = vmatprep.subr.mxu0 %v7615_v12 }
 0x764   : > { %v1856_v18 = vpop.xlane.xlu1 %1855 }
 0x765   : > { %6599 = vrcp.f32 %v1856_v18 }
 0x768   : > { %v2198_v25 = vpop.permute.xlu1 %2197 }
 0x769   : > { %v1859_v19 = vpop.xlane.xlu0 %1858 }
 0x76a   : > { %6601 = vrcp.f32 %v1859_v19 }
 0x76c   : > { %v2350_v31 = vpop.permute.xlu1 %2349 }
 0x76d   : > { %v1862_v20 = vpop.xlane.xlu0 %1861 }
 0x76e   : > { %6603 = vrcp.f32 %v1862_v20 }
 0x76f   : > { %v6600_v22 = vpop.eup %6599 }
 0x770   : > { %v1868_v23 = vmul.f32 %v6600_v22, %v6592_v0 }
 0x771   : > { %v2274_v29 = vpop.permute.xlu0 %2273 }
 0x772   : > { %5823 = vmatmul.mubr.msk.f32.vlgmr.msra.gmra.mrb[8].mxu1 %vm1524_vm2, %v1868_v23 }
 0x773   : > { %5831 = vmatpush3.msra.mxu1 %v1520_v17  ;;  %5832 = vmatprep.mubr.msk.f32.mxu1 %vm7616_vm1, %v7615_v12 }
 0x774   : > { %v6602_v24 = vpop.eup %6601  ;;  %5840 = vmatprep.subr.mxu1 %v7615_v12 }
 0x775   : > { %v1869_v26 = vmul.f32 %v6602_v24, %v6594_v3  ;;  %v2426_v32 = vpop.permute.xlu0 %2425 }
 0x777   : > { %5828 = vmatmul.mubr.msk.f32.vlgmr.msra.gmra.mrb[6].mxu0 %vm1524_vm2, %v1869_v26 }
 0x778   : > { %v6604_v27 = vpop.eup %6603  ;;  %5836 = vmatpush3.xpose.msk.msra.mxu0 %vm1524_vm2, %v2198_v25  ;;  %5837 = vmatprep.mubr.msk.f32.mxu0 %vm7616_vm1, %v7615_v12 }
 0x779   : > { %v1870_v28 = vmul.f32 %v6604_v27, %v6596_v7  ;;  %5845 = vmatprep.subr.mxu0 %v7615_v12 }
 0x77b   : > { %5833 = vmatmul.mubr.msk.f32.vlgmr.msra.gmra.mrb[10].mxu1 %vm1524_vm2, %v1870_v28  ;;  %5838 = vmatmul.mubr.msk.f32.vlgmr.msra.gmra.mrb[8].mxu0 %vm1524_vm2, %v8611_v21 }
 0x77c   : > { %5841 = vmatpush3.xpose.msk.msra.mxu1 %vm1524_vm2, %v2274_v29  ;;  %5846 = vmatpush3.xpose.msk.msra.mxu0 %vm1524_vm2, %v2350_v31 }
 0x77d   : > { %5842 = vmatprep.mubr.msk.f32.mxu1 %vm7616_vm1, %v7615_v12  ;;  %5847 = vmatprep.mubr.msk.f32.mxu0 %vm7616_vm1, %v7615_v12 }
 0x77e   : > { %5850 = vmatprep.subr.mxu1 %v7615_v12  ;;  %5855 = vmatprep.subr.mxu0 %v7615_v12 }
 0x77f   : > { %5843 = vmatmul.mubr.msk.f32.vlgmr.msra.gmra.mrb[12].mxu1 %vm1524_vm2, %v2182_v11  ;;  %5848 = vmatmul.mubr.msk.f32.vlgmr.msra.gmra.mrb[10].mxu0 %vm1524_vm2, %v8662_v62 }
 0x780   : > { %5851 = vmatpush3.xpose.msk.msra.mxu1 %vm1524_vm2, %v2426_v32  ;;  %5856 = vmatpush3.msra.mxu0 %v8630_v30 }
 0x781   : > { %5852 = vmatprep.mubr.msk.f32.mxu1 %vm7616_vm1, %v7615_v12  ;;  %5860 = vmatprep.subr.mxu1 %v7615_v12 }
 0x782   : > { %5857 = vmatprep.mubr.msk.f32.mxu0 %vm7616_vm1, %v7615_v12  ;;  %5865 = vmatprep.subr.mxu0 %v7615_v12 }
 0x783   : > { %5853 = vmatmul.mubr.msk.f32.vlgmr.msra.gmra.mrb[14].mxu1 %vm1524_vm2, %v8664_v63 }
 0x784   : > { %5862 = vmatprep.mubr.msk.f32.mxu1 %vm7616_vm1, %v7615_v12 }
 0x7e5   : > { %v8716_v21 = vpop.f32.mrb[4].mxu0 }
 0x7e6   : > { %v5819_v33 = vpop.f32.mrb[5].mxu0 }
 0x845   : > { %v2013_v34 = vpop.f32.mrb[8].mxu1 }
 0x846   : > { %v5824_v35 = vpop.f32.mrb[9].mxu1 }
 0x847   : > { %v2853_v35 = vld [vmem:[#allocation16 + $0x8] sm:$0xff] }
 0x84a   : > { %v2086_v36 = vpop.f32.mrb[6].mxu0 }
 0x84b   : > { %v5829_v37 = vpop.f32.mrb[7].mxu0 }
 0x84c   : > { %v2854_v37 = vld [vmem:[#allocation16 + $0x10] sm:$0xff] }
 0x84e   : > { %v2159_v38 = vpop.f32.mrb[10].mxu1  ;;  %v2269_v39 = vpop.f32.mrb[8].mxu0 }
 0x84f   : > { %v5834_v40 = vpop.f32.mrb[11].mxu1  ;;  %v5839_v41 = vpop.f32.mrb[9].mxu0  ;;  %v2501_v42 = vsel %vm1524_vm2, %v2269_v39, -inf }
 0x850   : > { %2502 = vmax.xlane.f32.xlu1 %v2501_v42 }
 0x852   : > { %v2345_v43 = vpop.f32.mrb[12].mxu1  ;;  %v2421_v44 = vpop.f32.mrb[10].mxu0 }
 0x853   : > { %v5844_v45 = vpop.f32.mrb[13].mxu1  ;;  %v5849_v46 = vpop.f32.mrb[11].mxu0  ;;  %v2504_v47 = vsel %vm1524_vm2, %v2345_v43, -inf  ;;  %v2507_v50 = vsel %vm1524_vm2, %v2421_v44, -inf }
 0x854   : > { %2505 = vmax.xlane.f32.xlu0 %v2504_v47 }
 0x856   : > { %v2497_v48 = vpop.f32.mrb[14].mxu1 }
 0x857   : > { %v5854_v49 = vpop.f32.mrb[15].mxu1  ;;  %v2510_v51 = vsel %vm1524_vm2, %v2497_v48, -inf }
 0x858   : > { %2508 = vmax.xlane.f32.xlu0 %v2507_v50  ;;  %2511 = vmax.xlane.f32.xlu1 %v2510_v51 }
 0x869   : > { %2191 = vrot.lane.b32.xlu1 %v8630_v30, %s7620_s10 }
 0x8dd   : > { %v2503_v52 = vpop.xlane.xlu1 %2502 }
 0x8de   : > { %v2513_v53 = vsub.f32 %v2269_v39, %v2503_v52 }
 0x8e0   : > { %v2517_v54 = vmul.f32 1.442695, %v2513_v53 }
 0x8e1   : > { %v2506_v55 = vpop.xlane.xlu0 %2505 }
 0x8e2   : > { %6605 = vpow2.f32 %v2517_v54  ;;  %v2514_v56 = vsub.f32 %v2345_v43, %v2506_v55  ;;  %v5556_v54 = vld [vmem:[#allocation17] ss:$0 sm:$0xff] }
 0x8e4   : > { %v2519_v57 = vmul.f32 1.442695, %v2514_v56 }
 0x8e5   : > { %v2512_v58 = vpop.xlane.xlu1 %2511  ;;  %v2509_v59 = vpop.xlane.xlu0 %2508 }
 0x8e6   : > { %6607 = vpow2.f32 %v2519_v57  ;;  %v2516_v60 = vsub.f32 %v2497_v48, %v2512_v58  ;;  %v2515_v61 = vsub.f32 %v2421_v44, %v2509_v59 }
 0x8e8   : > { %v2523_v62 = vmul.f32 1.442695, %v2516_v60  ;;  %v2521_v63 = vmul.f32 1.442695, %v2515_v61 }
 0x8e9   : > { %v2192_v13 = vpop.permute.xlu1 %2191 }
 0x8ea   : > { %6609 = vpow2.f32 %v2523_v62 }
 0x8eb   : > { %6611 = vpow2.f32 %v2521_v63 }
 0x8ec   : > { %v6606_v0 = vpop.eup %6605 }
 0x8ed   : > { %v2525_v1 = vsel %vm1524_vm2, %v6606_v0, 0.0 }
 0x8ee   : > { %2526 = vadd.xlane.f32.xlu0 %v2525_v1 }
 0x8f0   : > { %v6608_v2 = vpop.eup %6607 }
 0x8f1   : > { %v2528_v3 = vsel %vm1524_vm2, %v6608_v2, 0.0 }
 0x8f2   : > { %2529 = vadd.xlane.f32.xlu1 %v2528_v3 }
 0x8f4   : > { %v6610_v4 = vpop.eup %6609 }
 0x8f5   : > { %v6612_v7 = vpop.eup %6611  ;;  %v2534_v8 = vsel %vm1524_vm2, %v6610_v4, 0.0 }
 0x8f6   : > { %2535 = vadd.xlane.f32.xlu1 %v2534_v8  ;;  %v2531_v11 = vsel %vm1524_vm2, %v6612_v7, 0.0 }
 0x8f7   : > { %2532 = vadd.xlane.f32.xlu0 %v2531_v11  ;;  %v3089_v11 = vld [vmem:[#allocation22] sm:$0xff] }
 0x907   : > { %2194 = vrot.lane.b32.xlu1 %v8630_v30, %s7617_s26 }
 0x90b   : > { %2168 = vrot.lane.b32.xlu1 %v2086_v36, %s7621_s2 }
 0x90d   : > { %2188 = vrot.lane.b32.xlu0 %v8630_v30, %s7618_s8 }
 0x90f   : > { %2172 = vrot.lane.b32.xlu1 %v2159_v38, %s7622_s1  ;;  %v2855_v38 = vld [vmem:[#allocation16 + $0x18] sm:$0xff] }
 0x910   : > { %v6098_v39 = vpack.c.bf16 %v2855_v38, %v2854_v37 }
 0x911   : > { %2164 = vrot.lane.b32.xlu0 %v2013_v34, %s7623_s15 }
 0x97b   : > { %v2527_v14 = vpop.xlane.xlu0 %2526 }
 0x97c   : > { %6613 = vrcp.f32 %v2527_v14 }
 0x97f   : > { %v2530_v15 = vpop.xlane.xlu1 %2529 }
 0x980   : > { %6615 = vrcp.f32 %v2530_v15  ;;  %v3091_v15 = vld [vmem:[#allocation22 + $0x10] sm:$0xff] }
 0x983   : > { %v2536_v16 = vpop.xlane.xlu1 %2535 }
 0x984   : > { %6617 = vrcp.f32 %v2536_v16  ;;  %v2533_v17 = vpop.xlane.xlu0 %2532  ;;  %v3092_v16 = vld [vmem:[#allocation22 + $0x18] sm:$0xff] }
 0x985   : > { %6619 = vrcp.f32 %v2533_v17  ;;  %v6114_v17 = vpack.c.bf16 %v3092_v16, %v3091_v15 }
 0x986   : > { %v6614_v18 = vpop.eup %6613 }
 0x987   : > { %v2541_v19 = vmul.f32 %v6614_v18, %v6606_v0  ;;  %v2195_v20 = vpop.permute.xlu1 %2194  ;;  %v1310_v18 = vld [vmem:[%s8519_s3] sm:$0xff] }
 0x988   : > { %v2189_v22 = vpop.permute.xlu0 %2188 }
 0x989   : > { %5861 = vmatpush3.msra.mxu1 %v2189_v22  ;;  %5858 = vmatmul.mubr.msk.f32.vlgmr.msra.gmra.mrb[12].mxu0 %vm1524_vm2, %v2541_v19  ;;  %v1314_v19 = vld [vmem:[%s8526_s7] sm:$0xff]  ;;  %v8765_v22 = vld [vmem:[%s8519_s3 + $0x8] sm:$0xff] }
 0x98a   : > { %v6616_v30 = vpop.eup %6615  ;;  %5866 = vmatpush3.msra.mxu0 %v2192_v13  ;;  %5870 = vmatprep.subr.mxu1 %v7615_v12  ;;  %v3090_v13 = vld [vmem:[#allocation22 + $0x8] sm:$0xff] }
 0x98b   : > { %v2542_v23 = vmul.f32 %v6616_v30, %v6608_v2  ;;  %v2169_v24 = vpop.permute.xlu1 %2168  ;;  %5867 = vmatprep.mubr.msk.f32.mxu0 %vm7616_vm1, %v7615_v12  ;;  %v6110_v14 = vpack.c.bf16 %v3090_v13, %v3089_v11  ;;  %v1315_v30 = vld [vmem:[%s8526_s7 + $0x8] sm:$0xff] }
 0x98c   : > { %v2165_v25 = vpop.permute.xlu0 %2164 }
 0x98d   : > { %v2175_v26 = vsel %vm1524_vm2, %v8716_v21, %v2165_v25  ;;  %5863 = vmatmul.mubr.msk.f32.vlgmr.msra.gmra.mrb[16].mxu1 %vm1524_vm2, %v2542_v23  ;;  %v2852_v21 = vld [vmem:[#allocation16] sm:$0xff]  ;;  %v3086_v23 = vadd.f32 %v1315_v30, %v8765_v22  ;;  %v2994_v25 = vld [vmem:[#allocation19 + $0x8] sm:$0xff] }
 0x98e   : > { %v6618_v27 = vpop.eup %6617  ;;  %5871 = vmatpush3.msra.mxu1 %v2195_v20  ;;  %5872 = vmatprep.mubr.msk.f32.mxu1 %vm7616_vm1, %v7615_v12  ;;  %v2177_v32 = vsel %vm2176_vm3, %v2175_v26, %v2169_v24  ;;  %v6094_v36 = vpack.c.bf16 %v2853_v35, %v2852_v21  ;;  %v3085_v20 = vadd.f32 %v1314_v19, %v1310_v18  ;;  %v2993_v24 = vld [vmem:[#allocation19] sm:$0xff] }
 0x98f   : > { %v6620_v28 = vpop.eup %6619  ;;  %v2544_v29 = vmul.f32 %v6618_v27, %v6610_v4  ;;  %v2173_v31 = vpop.permute.xlu1 %2172  ;;  %v6102_v26 = vpack.c.bf16 %v2994_v25, %v2993_v24  ;;  %v2995_v27 = vld [vmem:[#allocation19 + $0x10] sm:$0xff] }
 0x990   : > { %v2543_v33 = vmul.f32 %v6620_v28, %v6612_v7  ;;  %v2179_v34 = vsel %vm2178_vm4, %v2177_v32, %v2173_v31  ;;  %6095 = vmatprep.subr.bf16.mxu0 %v6094_v36  ;;  %v2996_v28 = vld [vmem:[#allocation19 + $0x18] sm:$0xff]  ;;  %v7624_v31 = vmov 0.0|0.0   ;;  %v1312_v32 = vld [vmem:[%s8519_s3 + $0x10] sm:$0xff] }
 0x991   : > { %5873 = vmatmul.mubr.msk.f32.vlgmr.msra.gmra.mrb[18].mxu1 %vm1524_vm2, %v2544_v29  ;;  %6103 = vmatprep.subr.bf16.mxu1 %v6102_v26  ;;  %v6106_v29 = vpack.c.bf16 %v2996_v28, %v2995_v27 }
 0x992   : > { %5868 = vmatmul.mubr.msk.f32.vlgmr.msra.gmra.mrb[14].mxu0 %vm1524_vm2, %v2543_v33  ;;  %6105 = vmatpush3.bf16.msra.mxu1 %v6102_v26  ;;  %v1316_v33 = vld [vmem:[%s8526_s7 + $0x10] sm:$0xff] }
 0x993   : > { %5883 = vmatprep.mubr.msk.f32.mxu0 %vm1331_vm0, %v2179_v34  ;;  %6097 = vmatpush3.bf16.msra.mxu0 %v6094_v36  ;;  %v3087_v34 = vadd.f32 %v1316_v33, %v1312_v32 }
 0x994   : > { %6099 = vmatprep.subr.bf16.mxu0 %v6098_v39  ;;  %6107 = vmatprep.subr.bf16.mxu1 %v6106_v29 }
 0x996   : > { %6109 = vmatpush3.bf16.msra.mxu1 %v6106_v29 }
 0x997   : > { %6101 = vmatpush3.bf16.msra.mxu0 %v6098_v39 }
 0x998   : > { %6111 = vmatprep.subr.bf16.mxu0 %v6110_v14 }
 0xa5c   : > { %v2614_v40 = vpop.f32.mrb[12].mxu0 }
 0xa5d   : > { %v5859_v41 = vpop.f32.mrb[13].mxu0 }
 0xa5e   : > { %v5559_v41 = vld [vmem:[#allocation37] ss:$0 sm:$0xff] }
 0xa60   : > { %v2687_v42 = vpop.f32.mrb[16].mxu1 }
 0xa61   : > { %2838 = vrot.lane.b32.xlu0 %v2687_v42, %s7623_s15  ;;  %v5864_v43 = vpop.f32.mrb[17].mxu1 }
 0xa62   : > { %v5560_v43 = vld [vmem:[#allocation38] ss:$0 sm:$0xff] }
 0xa64   : > { %v2833_v44 = vpop.f32.mrb[18].mxu1 }
 0xa65   : > { %v2760_v45 = vpop.f32.mrb[14].mxu0  ;;  %2846 = vrot.lane.b32.xlu1 %v2833_v44, %s7622_s1  ;;  %v5874_v46 = vpop.f32.mrb[19].mxu1 }
 0xa66   : > { %v5869_v47 = vpop.f32.mrb[15].mxu0  ;;  %2842 = vrot.lane.b32.xlu0 %v2760_v45, %s7621_s2 }
 0xad3   : > { %v2839_v48 = vpop.permute.xlu0 %2838 }
 0xad4   : > { %v2849_v50 = vsel %vm1524_vm2, %v2614_v40, %v2839_v48 }
 0xad7   : > { %v2847_v49 = vpop.permute.xlu1 %2846 }
 0xad8   : > { %v2843_v51 = vpop.permute.xlu0 %2842 }
 0xad9   : > { %v2850_v52 = vsel %vm2176_vm3, %v2849_v50, %v2843_v51 }
 0xada   : > { %v2851_v53 = vsel %vm2178_vm4, %v2850_v52, %v2847_v49  ;;  %v8786_v52 = vld [vmem:[#allocation23] ss:$0 sm:$0xff] }
 0xadb   : > { %5884 = vmatmul.mubr.msk.f32.vlgmr.msra.gmra.mrb[16].mxu0 %vm1331_vm0, %v2851_v53 }
 0xadc   : > { %6113 = vmatpush3.bf16.msra.mxu0 %v6110_v14  ;;  %5905 = vmatprep.mubr.msk.f32.mxu0 %vm1331_vm0, %v3085_v20 }
 0xadd   : > { %6115 = vmatprep.subr.bf16.mxu0 %v6114_v17 }
 0xae0   : > { %6117 = vmatpush3.bf16.msra.mxu0 %v6114_v17 }
 0xae1   : > { %6126 = vmatprep.subr.bf16.mxu0 %v7624_v31 }
 0xae3   : > { %5906 = vmatmul.mubr.msk.f32.vlgmr.msra.gmra.mrb[18].mxu0 %vm1331_vm0, %v3086_v23  ;;  %v5569_v23 = vld [vmem:[#allocation26] ss:$0 sm:$0xff] }
 0xae4   : > { %5908 = vmatprep.mubr.msk.f32.mxu0 %vm1331_vm0, %v3087_v34 }
 0xbae   : > { %v5885_v55 = vpop.f32.mrb[16].mxu0 }
 0xbaf   : > { %v2941_v56 = vadd.f32 %v5885_v55, %v5556_v54  ;;  %v2935_v57 = vpop.f32.mrb[17].mxu0 }
 0xbb0   : > { %v2936_v58 = vadd.f32 %v5556_v54, %v2935_v57 }
 0xbb1   : > { %v2945_v59 = vadd.f32 %v2941_v56, %v8597_v9 }
 0xbb2   : > { %v2944_v60 = vadd.f32 %v2936_v58, %v8586_v5  ;;  %v1313_v58 = vld [vmem:[%s8519_s3 + $0x18] sm:$0xff]  ;;  %s7461_s3 = sshll.u32 %s7625_s6, 4  ;;  %s7462_s3 = int_to_ptr.vmem [resolvable:$false] %s7461_s3 }
 0xbb3   : > { %v2951_v61 = vsel %vm1331_vm0, %v2945_v59, 0.0  ;;  %s7463_s9 = scalar_lea.vmem %s7462_s3, 512  ;;  %p7464_p1 = scmp.lt.s32.totalorder %s8984_s22, %s7462_s3 }
 0xbb4   : > { %2952 = vadd.xlane.f32.xlu1 %v2951_v61  ;;  %v2948_v62 = vsel %vm1331_vm0, %v2944_v60, 0.0  ;;  %v3197_v61 = vld [vmem:[#allocation25] sm:$0xff]  ;;  %p7465_p13 = scmp.lt.s32.totalorder %s7463_s9, %s7457_s0 }
 0xbb5   : > { %2949 = vadd.xlane.f32.xlu0 %v2948_v62  ;;  %v3198_v62 = vld [vmem:[#allocation25 + $0x8] sm:$0xff] }
 0xbb6   : > { %v5907_v53 = vpop.f32.mrb[18].mxu0  ;;  %p7466_p11 = por %p7465_p13, %p7464_p1 }
 0xbb7   : > { %v3184_v54 = vadd.f32 %v5907_v53, %v8786_v52  ;;  %v3178_v55 = vpop.f32.mrb[19].mxu0 }
 0xbb8   : > { %p7467_p12 = pnand %p7466_p11, %p7460_p8 }
 0xc41   : > { %v2953_v63 = vpop.xlane.xlu1 %2952 }
 0xc42   : > { %v2956_v0 = vmul.f32 0.03125, %v2953_v63  ;;  %v2950_v1 = vpop.xlane.xlu0 %2949  ;;  %v3199_v63 = vld [vmem:[#allocation25 + $0x10] sm:$0xff] }
 0xc43   : > { %v2955_v2 = vmul.f32 0.03125, %v2950_v1  ;;  %v3200_v1 = vld [vmem:[#allocation25 + $0x18] sm:$0xff] }
 0xc44   : > { %v2958_v3 = vsub.f32 %v2945_v59, %v2956_v0  ;;  %v1317_v59 = vld [vmem:[%s8526_s7 + $0x18] sm:$0xff]  ;;  %v6118_v0 = vpack.c.bf16 %v3198_v62, %v3197_v61 }
 0xc45   : > { %v2957_v4 = vsub.f32 %v2944_v60, %v2955_v2  ;;  %v3088_v60 = vadd.f32 %v1317_v59, %v1313_v58  ;;  %v6122_v2 = vpack.c.bf16 %v3200_v1, %v3199_v63 }
 0xc46   : > { %v2960_v9 = vmul.f32 %v2958_v3, %v2958_v3  ;;  %6119 = vmatprep.subr.bf16.mxu1 %v6118_v0 }
 0xc47   : > { %v2959_v7 = vmul.f32 %v2957_v4, %v2957_v4  ;;  %5909 = vmatmul.mubr.msk.f32.gmra.mrb[20].mxu0 %vm1331_vm0, %v3088_v60 }
 0xc48   : > { %v2964_v5 = vsel %vm1331_vm0, %v2960_v9, 0.0  ;;  %5929 = vmatprep.mubr.msk.f32.mxu0 %vm7616_vm1, %v7615_v12 }
 0xc49   : > { %v2961_v8 = vsel %vm1331_vm0, %v2959_v7, 0.0 }
 0xc4a   : > { %2962 = vadd.xlane.f32.xlu0 %v2961_v8 }
 0xc4e   : > { %2965 = vadd.xlane.f32.xlu0 %v2964_v5  ;;  %v5561_v5 = vld [vmem:[#allocation20] ss:$0 sm:$0xff] }
 0xcd7   : > { %v2963_v21 = vpop.xlane.xlu0 %2962 }
 0xcd8   : > { %v2967_v35 = vmul.f32 0.03125, %v2963_v21 }
 0xcda   : > { %v2969_v36 = vadd.f32 1e-05, %v2967_v35 }
 0xcdb   : > { %v2966_v37 = vpop.xlane.xlu0 %2965 }
 0xcdc   : > { %6621 = vrsqrt.f32 %v2969_v36  ;;  %v2968_v38 = vmul.f32 0.03125, %v2966_v37 }
 0xcde   : > { %v2970_v39 = vadd.f32 1e-05, %v2968_v38 }
 0xce0   : > { %6623 = vrsqrt.f32 %v2970_v39 }
 0xce6   : > { %v6622_v40 = vpop.eup %6621 }
 0xce7   : > { %v2973_v42 = vmul.f32 %v6622_v40, %v2957_v4 }
 0xce9   : > { %v2981_v44 = vmul.f32 %v5559_v41, %v2973_v42 }
 0xcea   : > { %v6624_v45 = vpop.eup %6623 }
 0xceb   : > { %v2974_v46 = vmul.f32 %v6624_v45, %v2958_v3  ;;  %v8775_v47 = vadd.f32 %v5560_v43, %v2981_v44 }
 0xced   : > { %v2982_v48 = vmul.f32 %v5559_v41, %v2974_v46  ;;  %v2991_v49 = vadd.f32 %v8775_v47, %v8590_v6  ;;  %v3179_v6 = vadd.f32 %v8786_v52, %v3178_v55 }
 0xcef   : > { %v8779_v50 = vadd.f32 %v5560_v43, %v2982_v48  ;;  %5894 = vmatprep.mubr.msk.f32.mxu1 %vm1331_vm0, %v2991_v49  ;;  %v6529_v57 = vpack.i.bf16 %v3184_v54, %v3179_v6 }
 0xcf1   : > { %v2992_v51 = vadd.f32 %v8779_v50, %v8601_v10  ;;  %v6127_v10 = vpack.c.bf16 %v3184_v54, %v3179_v6  ;;  %6530 = vrot.lane.b32.xlu1 %v6529_v57, %s7618_s8  ;;  %6535 = vrot.lane.b32.xlu0 %v6529_v57, %s7620_s10 }
 0xcf3   : > { %5895 = vmatmul.mubr.msk.f32.vlgmr.msra.gmra.mrb[20].mxu1 %vm1331_vm0, %v2992_v51  ;;  %6129 = vmatpush3.bf16.xpose.msk.msra.mxu0 %vm8792_vm5, %v6127_v10 }
 0xcf4   : > { %5919 = vmatprep.mubr.msk.f32.mxu1 %vm1331_vm0, %v1310_v18  ;;  %6134 = vmatprep.subr.bf16.mxu0 %v7624_v31 }
 0xcf5   : > { %6121 = vmatpush3.bf16.msra.mxu1 %v6118_v0 }
 0xcf6   : > { %6123 = vmatprep.subr.bf16.mxu1 %v6122_v2 }
 0xcf9   : > { %6125 = vmatpush3.bf16.msra.mxu1 %v6122_v2 }
 0xcfa   : > { %6130 = vmatprep.subr.bf16.mxu1 %v7624_v31 }
 0xcfc   : > { %5920 = vmatmul.mubr.msk.f32.vlgmr.msra.gmra.mrb[22].mxu1 %vm1331_vm0, %v8765_v22 }
 0xcfd   : > { %5922 = vmatprep.mubr.msk.f32.mxu1 %vm1331_vm0, %v1312_v32 }
 0xd00   : > { %5923 = vmatmul.mubr.msk.f32.gmra.mrb[24].mxu1 %vm1331_vm0, %v1313_v58 }
 0xd01   : > { %5936 = vmatprep.mubr.msk.f32.mxu1 %vm7616_vm1, %v7615_v12 }
 0xd1a   : > { %v5910_v19 = vpop.f32.mrb[20].mxu0 }
 0xd1b   : > { %v3188_v20 = vpop.f32.mrb[21].mxu0  ;;  %v8858_v61 = vadd.f32 %v5910_v19, %v8786_v52 }
 0xd1c   : > { %v8861_v62 = vadd.f32 %v8786_v52, %v3188_v20 }
 0xd1e   : > { %v6559_v63 = vpack.i.bf16 %v8858_v61, %v8861_v62 }
 0xd63   : > { %v6531_v3 = vpop.permute.xlu1 %6530  ;;  %v6536_v9 = vpop.permute.xlu0 %6535 }
 0xd64   : > { %v6533_v4 = vunpack.i.h.bf16 %v6531_v3  ;;  %v6532_v7 = vunpack.i.l.bf16 %v6531_v3  ;;  %v6538_v11 = vunpack.i.h.bf16 %v6536_v9  ;;  %v6537_v13 = vunpack.i.l.bf16 %v6536_v9 }
 0xd66   : > { %v6131_v8 = vpack.c.bf16 %v6533_v4, %v6532_v7  ;;  %v6135_v18 = vpack.c.bf16 %v6538_v11, %v6537_v13 }
 0xd68   : > { %6133 = vmatpush3.bf16.xpose.msk.msra.mxu1 %vm8792_vm5, %v6131_v8 }
 0xd69   : > { %6138 = vmatprep.subr.bf16.mxu1 %v7624_v31 }
 0xdc6   : > { %v5896_v14 = vpop.f32.mrb[20].mxu1 }
 0xdc7   : > { %v8816_v15 = vadd.f32 %v5896_v14, %v5561_v5  ;;  %v3076_v16 = vpop.f32.mrb[21].mxu1 }
 0xdc8   : > { %v3077_v17 = vadd.f32 %v5561_v5, %v3076_v16 }
 0xdca   : > { %3308 = vrot.lane.b32.xlu0 %v3077_v17, %s7620_s10  ;;  %3306 = vrot.lane.b32.xlu1 %v3077_v17, %s7618_s8 }
 0xdcb   : > { %5930 = vmatmul.mubr.msk.f32.vlgmr.msra.gmra.mrb[22].mxu0 %vm1524_vm2, %v3077_v17 }
 0xdcc   : > { %6137 = vmatpush3.bf16.xpose.msk.msra.mxu0 %vm8792_vm5, %v6135_v18  ;;  %5943 = vmatprep.mubr.msk.f32.mxu0 %vm7616_vm1, %v7615_v12 }
 0xdcd   : > { %6142 = vmatprep.subr.bf16.mxu0 %v7624_v31 }
 0xdce   : > { %6540 = vrot.lane.b32.xlu1 %v6529_v57, %s7617_s26 }
 0xdcf   : > { %v5921_v22 = vpop.f32.mrb[22].mxu1 }
 0xdd0   : > { %v3286_v30 = vpop.f32.mrb[23].mxu1  ;;  %v3292_v27 = vadd.f32 %v5921_v22, %v5569_v23 }
 0xdd1   : > { %v3287_v28 = vadd.f32 %v5569_v23, %v3286_v30 }
 0xdd2   : > { %3310 = vrot.lane.b32.xlu1 %v3077_v17, %s7617_s26 }
 0xdd3   : > { %v5924_v24 = vpop.f32.mrb[24].mxu1  ;;  %v6143_v32 = vpack.c.bf16 %v3292_v27, %v3287_v28  ;;  %v6544_v6 = vpack.i.bf16 %v3292_v27, %v3287_v28 }
 0xdd4   : > { %v8828_v25 = vadd.f32 %v5924_v24, %v5569_v23  ;;  %v3296_v26 = vpop.f32.mrb[25].mxu1 }
 0xdd5   : > { %v8830_v29 = vadd.f32 %v5569_v23, %v3296_v26 }
 0xdd7   : > { %v6171_v39 = vpack.c.bf16 %v8828_v25, %v8830_v29  ;;  %v8849_v40 = vpack.i.bf16 %v8828_v25, %v8830_v29 }
 0xe3c   : > { %v3307_v33 = vpop.permute.xlu1 %3306  ;;  %v3309_v34 = vpop.permute.xlu0 %3308 }
 0xe3d   : > { %5937 = vmatmul.mubr.msk.f32.vlgmr.msra.gmra.mrb[26].mxu1 %vm1524_vm2, %v3307_v33  ;;  %5944 = vmatmul.mubr.msk.f32.vlgmr.msra.gmra.mrb[24].mxu0 %vm1524_vm2, %v3309_v34 }
 0xe3e   : > { %5950 = vmatprep.mubr.msk.f32.mxu1 %vm7616_vm1, %v7615_v12  ;;  %6144 = vmatpush3.bf16.msra.mxu0 %v6143_v32 }
 0xe3f   : > { %5957 = vmatprep.mubr.msk.f32.mxu0 %vm7616_vm1, %v7615_v12  ;;  %6148 = vmatprep.subr.bf16.mxu0 %v7624_v31 }
 0xe40   : > { %v6541_v21 = vpop.permute.xlu1 %6540 }
 0xe41   : > { %v6543_v35 = vunpack.i.h.bf16 %v6541_v21  ;;  %v6542_v36 = vunpack.i.l.bf16 %v6541_v21 }
 0xe43   : > { %v6139_v37 = vpack.c.bf16 %v6543_v35, %v6542_v36 }
 0xe44   : > { %v3311_v38 = vpop.permute.xlu1 %3310 }
 0xe45   : > { %6141 = vmatpush3.bf16.xpose.msk.msra.mxu1 %vm8792_vm5, %v6139_v37 }
 0xe46   : > { %6145 = vmatprep.subr.bf16.mxu1 %v7624_v31 }
 0xe4c   : > { %5951 = vmatmul.mubr.msk.f32.vlgmr.msra.gmra.mrb[28].mxu1 %vm1524_vm2, %v3311_v38 }
 0xe4d   : > { %5964 = vmatprep.mubr.msk.f32.mxu1 %vm7616_vm1, %v7615_v12 }
 0xe9e   : > { %v3418_v41 = vpop.f32.mrb[22].mxu0 }
 0xe9f   : > { %v5931_v42 = vpop.f32.mrb[23].mxu0  ;;  %v3650_v43 = vsel %vm2176_vm3, %v3418_v41, -inf }
 0xea0   : > { %3651 = vmax.xlane.f32.xlu0 %v3650_v43 }
 0xf10   : > { %v3494_v44 = vpop.f32.mrb[26].mxu1  ;;  %v3570_v45 = vpop.f32.mrb[24].mxu0 }
 0xf11   : > { %v5938_v46 = vpop.f32.mrb[27].mxu1  ;;  %v5945_v48 = vpop.f32.mrb[25].mxu0  ;;  %v3653_v49 = vsel %vm2176_vm3, %v3494_v44, -inf  ;;  %v3656_v51 = vsel %vm2176_vm3, %v3570_v45, -inf }
 0xf12   : > { %3654 = vmax.xlane.f32.xlu1 %v3653_v49  ;;  %3657 = vmax.xlane.f32.xlu0 %v3656_v51 }
 0xf1f   : > { %v3646_v53 = vpop.f32.mrb[28].mxu1 }
 0xf20   : > { %v5952_v54 = vpop.f32.mrb[29].mxu1  ;;  %v3659_v55 = vsel %vm2176_vm3, %v3646_v53, -inf }
 0xf21   : > { %3660 = vmax.xlane.f32.xlu0 %v3659_v55 }
 0xf23   : > { %6545 = vrot.lane.b32.xlu1 %v6544_v6, %s7618_s8 }
 0xf2d   : > { %v3652_v10 = vpop.xlane.xlu0 %3651 }
 0xf2e   : > { %v3662_v57 = vsub.f32 %v3418_v41, %v3652_v10 }
 0xf30   : > { %v3666_v58 = vmul.f32 1.442695, %v3662_v57 }
 0xf32   : > { %6625 = vpow2.f32 %v3666_v58 }
 0xf3c   : > { %v6626_v59 = vpop.eup %6625 }
 0xf3d   : > { %v3674_v60 = vsel %vm2176_vm3, %v6626_v59, 0.0 }
 0xf47   : > { %3675 = vadd.xlane.f32.xlu1 %v3674_v60 }
 0xf58   : > { %6555 = vrot.lane.b32.xlu1 %v6544_v6, %s7617_s26 }
 0xf5c   : > { %6560 = vrot.lane.b32.xlu1 %v6559_v63, %s7618_s8 }
 0xf9f   : > { %v3655_v0 = vpop.xlane.xlu1 %3654  ;;  %v3658_v1 = vpop.xlane.xlu0 %3657 }
 0xfa0   : > { %v3663_v2 = vsub.f32 %v3494_v44, %v3655_v0  ;;  %v3664_v3 = vsub.f32 %v3570_v45, %v3658_v1  ;;  %v6155_v45 = vpack.c.bf16 %v8858_v61, %v8861_v62 }
 0xfa2   : > { %v3668_v4 = vmul.f32 1.442695, %v3663_v2  ;;  %v3670_v7 = vmul.f32 1.442695, %v3664_v3 }
 0xfa3   : > { %v6546_v8 = vpop.permute.xlu1 %6545 }
 0xfa4   : > { %6627 = vpow2.f32 %v3668_v4  ;;  %v6548_v9 = vunpack.i.h.bf16 %v6546_v8  ;;  %v6547_v5 = vunpack.i.l.bf16 %v6546_v8 }
 0xfa5   : > { %6629 = vpow2.f32 %v3670_v7 }
 0xfa6   : > { %v6146_v52 = vpack.c.bf16 %v6548_v9, %v6547_v5 }
 0xfa8   : > { %6147 = vmatpush3.bf16.msra.mxu1 %v6146_v52 }
 0xfa9   : > { %6151 = vmatprep.subr.bf16.mxu1 %v7624_v31 }
 0xfae   : > { %v6628_v11 = vpop.eup %6627  ;;  %v3661_v17 = vpop.xlane.xlu0 %3660 }
 0xfaf   : > { %v6630_v13 = vpop.eup %6629  ;;  %v3677_v14 = vsel %vm2176_vm3, %v6628_v11, 0.0  ;;  %v3665_v18 = vsub.f32 %v3646_v53, %v3661_v17 }
 0xfb0   : > { %3678 = vadd.xlane.f32.xlu0 %v3677_v14  ;;  %v3680_v16 = vsel %vm2176_vm3, %v6630_v13, 0.0 }
 0xfb1   : > { %3681 = vadd.xlane.f32.xlu1 %v3680_v16  ;;  %v3672_v19 = vmul.f32 1.442695, %v3665_v18 }
 0xfc2   : > { %6570 = vrot.lane.b32.xlu1 %v6559_v63, %s7617_s26 }
 0xfc6   : > { %4004 = vrot.lane.b32.xlu1 %v8816_v15, %s7620_s10  ;;  %6550 = vrot.lane.b32.xlu0 %v6544_v6, %s7620_s10 }
 0xfd4   : > { %v3676_v20 = vpop.xlane.xlu1 %3675 }
 0xfd5   : > { %6631 = vrcp.f32 %v3676_v20 }
 0xfd6   : > { %6633 = vpow2.f32 %v3672_v19 }
 0xfd8   : > { %v6556_v26 = vpop.permute.xlu1 %6555 }
 0xfd9   : > { %v6558_v36 = vunpack.i.h.bf16 %v6556_v26  ;;  %v6557_v37 = vunpack.i.l.bf16 %v6556_v26 }
 0xfdb   : > { %v6152_v43 = vpack.c.bf16 %v6558_v36, %v6557_v37 }
 0xfdc   : > { %v6561_v27 = vpop.permute.xlu1 %6560 }
 0xfdd   : > { %v6563_v54 = vunpack.i.h.bf16 %v6561_v27  ;;  %v6562_v55 = vunpack.i.l.bf16 %v6561_v27 }
 0xfdf   : > { %v6632_v22 = vpop.eup %6631 }
 0xfe0   : > { %v3690_v30 = vmul.f32 %v6632_v22, %v6626_v59  ;;  %v6634_v23 = vpop.eup %6633 }
 0xfe1   : > { %v3683_v24 = vsel %vm2176_vm3, %v6634_v23, 0.0 }
 0xfe2   : > { %5958 = vmatmul.mubr.msk.f32.vlgmr.msra.gmra.mrb[26].mxu0 %vm2176_vm3, %v3690_v30 }
 0xfe3   : > { %5971 = vmatprep.mubr.msk.f32.mxu0 %vm7616_vm1, %v7615_v12 }
 0xfe5   : > { %3684 = vadd.xlane.f32.xlu0 %v3683_v24 }
 0xffb   : > { %6565 = vrot.lane.b32.xlu0 %v6559_v63, %s7620_s10 }
 0xfff   : > { %4002 = vrot.lane.b32.xlu0 %v8816_v15, %s7618_s8 }
0x1003   : > { %4006 = vrot.lane.b32.xlu0 %v8816_v15, %s7617_s26 }
0x103d   : > { %v3679_v28 = vpop.xlane.xlu0 %3678 }
0x103e   : > { %v3682_v32 = vpop.xlane.xlu1 %3681  ;;  %6635 = vrcp.f32 %v3679_v28 }
0x103f   : > { %6637 = vrcp.f32 %v3682_v32 }
0x1041   : > { %v6551_v33 = vpop.permute.xlu0 %6550 }
0x1042   : > { %v6553_v34 = vunpack.i.h.bf16 %v6551_v33  ;;  %v6552_v21 = vunpack.i.l.bf16 %v6551_v33  ;;  %v6571_v6 = vpop.permute.xlu1 %6570 }
0x1043   : > { %v6573_v59 = vunpack.i.h.bf16 %v6571_v6  ;;  %v6572_v60 = vunpack.i.l.bf16 %v6571_v6 }
0x1044   : > { %v6149_v35 = vpack.c.bf16 %v6553_v34, %v6552_v21 }
0x1045   : > { %v6167_v61 = vpack.c.bf16 %v6573_v59, %v6572_v60 }
0x1046   : > { %6150 = vmatpush3.bf16.msra.mxu0 %v6149_v35  ;;  %v4005_v58 = vpop.permute.xlu1 %4004 }
0x1047   : > { %6154 = vmatprep.subr.bf16.mxu0 %v7624_v31 }
0x1048   : > { %v6636_v38 = vpop.eup %6635 }
0x1049   : > { %v6638_v41 = vpop.eup %6637  ;;  %v3691_v42 = vmul.f32 %v6636_v38, %v6628_v11 }
0x104a   : > { %v3692_v44 = vmul.f32 %v6638_v41, %v6630_v13 }
0x104b   : > { %5965 = vmatmul.mubr.msk.f32.vlgmr.msra.gmra.mrb[30].mxu1 %vm2176_vm3, %v3691_v42 }
0x104c   : > { %5972 = vmatmul.mubr.msk.f32.vlgmr.msra.gmra.mrb[28].mxu0 %vm2176_vm3, %v3692_v44  ;;  %6153 = vmatpush3.bf16.msra.mxu1 %v6152_v43 }
0x104d   : > { %5985 = vmatprep.mubr.msk.f32.mxu0 %vm7616_vm1, %v7615_v12  ;;  %5978 = vmatprep.mubr.msk.f32.mxu1 %vm7616_vm1, %v7615_v12 }
0x104e   : > { %6158 = vmatprep.subr.bf16.mxu1 %v7624_v31 }
0x104f   : > { %6157 = vmatpush3.bf16.xpose.msk.msra.mxu0 %vm8792_vm5, %v6155_v45 }
0x1050   : > { %6162 = vmatprep.subr.bf16.mxu0 %v7624_v31 }
0x1056   : > { %5986 = vmatmul.mubr.msk.f32.vlgmr.msra.gmra.mrb[30].mxu0 %vm1524_vm2, %v8816_v15  ;;  %v6159_v15 = vpack.c.bf16 %v6563_v54, %v6562_v55 }
0x1057   : > { %5999 = vmatprep.mubr.msk.f32.mxu0 %vm7616_vm1, %v7615_v12 }
0x1072   : > { %v3685_v46 = vpop.xlane.xlu0 %3684 }
0x1073   : > { %6639 = vrcp.f32 %v3685_v46 }
0x1076   : > { %v6566_v48 = vpop.permute.xlu0 %6565 }
0x1077   : > { %v6568_v49 = vunpack.i.h.bf16 %v6566_v48  ;;  %v6567_v51 = vunpack.i.l.bf16 %v6566_v48 }
0x1079   : > { %v6163_v53 = vpack.c.bf16 %v6568_v49, %v6567_v51 }
0x107a   : > { %v4003_v62 = vpop.permute.xlu0 %4002 }
0x107b   : > { %6165 = vmatpush3.bf16.xpose.msk.msra.mxu0 %vm8792_vm5, %v6163_v53 }
0x107c   : > { %6170 = vmatprep.subr.bf16.mxu0 %v7624_v31 }
0x107d   : > { %v6640_v10 = vpop.eup %6639 }
0x107e   : > { %v3693_v57 = vmul.f32 %v6640_v10, %v6634_v23  ;;  %v4007_v63 = vpop.permute.xlu0 %4006 }
0x1080   : > { %5979 = vmatmul.mubr.msk.f32.vlgmr.msra.gmra.mrb[32].mxu1 %vm2176_vm3, %v3693_v57 }
0x1081   : > { %6161 = vmatpush3.bf16.xpose.msk.msra.mxu1 %vm8792_vm5, %v6159_v15  ;;  %5992 = vmatprep.mubr.msk.f32.mxu1 %vm7616_vm1, %v7615_v12 }
0x1082   : > { %6000 = vmatmul.mubr.msk.f32.vlgmr.msra.gmra.mrb[32].mxu0 %vm1524_vm2, %v4005_v58  ;;  %6166 = vmatprep.subr.bf16.mxu1 %v7624_v31 }
0x1083   : > { %6172 = vmatpush3.bf16.msra.mxu0 %v6171_v39  ;;  %6013 = vmatprep.mubr.msk.f32.mxu0 %vm7616_vm1, %v7615_v12 }
0x1084   : > { %6176 = vmatprep.subr.bf16.mxu0 %v7624_v31 }
0x1088   : > { %5993 = vmatmul.mubr.msk.f32.vlgmr.msra.gmra.mrb[34].mxu1 %vm1524_vm2, %v4003_v62 }
0x1089   : > { %6169 = vmatpush3.bf16.xpose.msk.msra.mxu1 %vm8792_vm5, %v6167_v61  ;;  %6006 = vmatprep.mubr.msk.f32.mxu1 %vm7616_vm1, %v7615_v12 }
0x108a   : > { %6173 = vmatprep.subr.bf16.mxu1 %v7624_v31 }
0x1090   : > { %6007 = vmatmul.mubr.msk.f32.vlgmr.msra.gmra.mrb[36].mxu1 %vm1524_vm2, %v4007_v63 }
0x1091   : > { %6020 = vmatprep.mubr.msk.f32.mxu1 %vm7616_vm1, %v7615_v12 }
0x10b5   : > { %v8925_v25 = vpop.f32.mrb[26].mxu0 }
0x10b6   : > { %v5959_v29 = vpop.f32.mrb[27].mxu0 }
0x111e   : > { %v3836_v39 = vpop.f32.mrb[30].mxu1 }
0x111f   : > { %v3909_v0 = vpop.f32.mrb[28].mxu0  ;;  %v5966_v1 = vpop.f32.mrb[31].mxu1 }
0x1120   : > { %v5973_v2 = vpop.f32.mrb[29].mxu0 }
0x1129   : > { %v4114_v56 = vpop.f32.mrb[30].mxu0 }
0x112a   : > { %v5987_v3 = vpop.f32.mrb[31].mxu0  ;;  %v4346_v4 = vsel %vm2176_vm3, %v4114_v56, -inf }
0x112b   : > { %4347 = vmax.xlane.f32.xlu1 %v4346_v4 }
0x1153   : > { %v3982_v7 = vpop.f32.mrb[32].mxu1 }
0x1154   : > { %v5980_v8 = vpop.f32.mrb[33].mxu1 }
0x1155   : > { %v4266_v9 = vpop.f32.mrb[32].mxu0  ;;  %v4697_v8 = vld [vmem:[#allocation28] sm:$0xff] }
0x1156   : > { %v6001_v5 = vpop.f32.mrb[33].mxu0  ;;  %v4352_v14 = vsel %vm2176_vm3, %v4266_v9, -inf }
0x115b   : > { %v4190_v52 = vpop.f32.mrb[34].mxu1 }
0x115c   : > { %v5994_v11 = vpop.f32.mrb[35].mxu1  ;;  %v4349_v13 = vsel %vm2176_vm3, %v4190_v52, -inf }
0x115d   : > { %4350 = vmax.xlane.f32.xlu0 %v4349_v13  ;;  %v4699_v11 = vld [vmem:[#allocation28 + $0x10] sm:$0xff]  ;;  %v4700_v13 = vld [vmem:[#allocation28 + $0x18] sm:$0xff] }
0x1161   : > { %4353 = vmax.xlane.f32.xlu0 %v4352_v14 }
0x1163   : > { %v4342_v16 = vpop.f32.mrb[36].mxu1 }
0x1164   : > { %v6008_v17 = vpop.f32.mrb[37].mxu1  ;;  %v4355_v18 = vsel %vm2176_vm3, %v4342_v16, -inf }
0x1165   : > { %4356 = vmax.xlane.f32.xlu1 %v4355_v18 }
0x1176   : > { %6580 = vrot.lane.b32.xlu1 %v8849_v40, %s7620_s10 }
0x11b8   : > { %v4348_v19 = vpop.xlane.xlu1 %4347 }
0x11b9   : > { %v4358_v20 = vsub.f32 %v4114_v56, %v4348_v19 }
0x11bb   : > { %v4362_v22 = vmul.f32 1.442695, %v4358_v20 }
0x11bd   : > { %6641 = vpow2.f32 %v4362_v22 }
0x11c7   : > { %v6642_v30 = vpop.eup %6641 }
0x11c8   : > { %v4370_v23 = vsel %vm2176_vm3, %v6642_v30, 0.0 }
0x11c9   : > { %4371 = vadd.xlane.f32.xlu0 %v4370_v23 }
0x11ea   : > { %v4351_v24 = vpop.xlane.xlu0 %4350 }
0x11eb   : > { %v4359_v26 = vsub.f32 %v4190_v52, %v4351_v24 }
0x11ed   : > { %v4364_v27 = vmul.f32 1.442695, %v4359_v26 }
0x11ee   : > { %v4354_v28 = vpop.xlane.xlu0 %4353 }
0x11ef   : > { %6643 = vpow2.f32 %v4364_v27  ;;  %v4360_v32 = vsub.f32 %v4266_v9, %v4354_v28  ;;  %v4698_v9 = vld [vmem:[#allocation28 + $0x8] sm:$0xff]  ;;  %v5606_v28 = vld [vmem:[#allocation29] ss:$0 sm:$0xff] }
0x11f0   : > { %v6182_v5 = vpack.c.bf16 %v4698_v9, %v4697_v8 }
0x11f1   : > { %v4366_v33 = vmul.f32 1.442695, %v4360_v32 }
0x11f2   : > { %v4357_v34 = vpop.xlane.xlu1 %4356 }
0x11f3   : > { %6645 = vpow2.f32 %v4366_v33  ;;  %v4361_v21 = vsub.f32 %v4342_v16, %v4357_v34 }
0x11f5   : > { %v4368_v35 = vmul.f32 1.442695, %v4361_v21 }
0x11f6   : > { %v6581_v45 = vpop.permute.xlu1 %6580 }
0x11f7   : > { %6647 = vpow2.f32 %v4368_v35  ;;  %v6583_v46 = vunpack.i.h.bf16 %v6581_v45  ;;  %v6582_v48 = vunpack.i.l.bf16 %v6581_v45 }
0x11f9   : > { %v6644_v36 = vpop.eup %6643  ;;  %v6177_v53 = vpack.c.bf16 %v6583_v46, %v6582_v48 }
0x11fa   : > { %v4373_v37 = vsel %vm2176_vm3, %v6644_v36, 0.0 }
0x11fb   : > { %4374 = vadd.xlane.f32.xlu1 %v4373_v37 }
0x11fd   : > { %v6646_v38 = vpop.eup %6645 }
0x11fe   : > { %v4376_v41 = vsel %vm2176_vm3, %v6646_v38, 0.0 }
0x11ff   : > { %4377 = vadd.xlane.f32.xlu0 %v4376_v41 }
0x1201   : > { %v6648_v42 = vpop.eup %6647 }
0x1202   : > { %v4379_v43 = vsel %vm2176_vm3, %v6648_v42, 0.0 }
0x1203   : > { %4380 = vadd.xlane.f32.xlu1 %v4379_v43 }
0x1214   : > { %6585 = vrot.lane.b32.xlu1 %v8849_v40, %s7617_s26 }
0x1215   : > { %6575 = vrot.lane.b32.xlu0 %v8849_v40, %s7618_s8 }
0x1218   : > { %3991 = vrot.lane.b32.xlu1 %v3909_v0, %s7621_s2 }
0x1219   : > { %3987 = vrot.lane.b32.xlu0 %v3836_v39, %s7623_s15 }
0x121c   : > { %3995 = vrot.lane.b32.xlu1 %v3982_v7, %s7622_s1 }
0x1256   : > { %v4372_v44 = vpop.xlane.xlu0 %4371 }
0x1257   : > { %6649 = vrcp.f32 %v4372_v44 }
0x1261   : > { %v6650_v49 = vpop.eup %6649 }
0x1262   : > { %v4386_v51 = vmul.f32 %v6650_v49, %v6642_v30 }
0x1264   : > { %6014 = vmatmul.mubr.msk.f32.vlgmr.msra.gmra.mrb[34].mxu0 %vm2176_vm3, %v4386_v51 }
0x1265   : > { %6178 = vmatpush3.bf16.msra.mxu0 %v6177_v53  ;;  %6027 = vmatprep.mubr.msk.f32.mxu0 %vm7616_vm1, %v7615_v12  ;;  %v4836_v53 = vld [vmem:[#allocation31 + $0x8] sm:$0xff] }
0x1266   : > { %6183 = vmatprep.subr.bf16.mxu0 %v6182_v5 }
0x1288   : > { %v4375_v40 = vpop.xlane.xlu1 %4374 }
0x1289   : > { %6651 = vrcp.f32 %v4375_v40 }
0x128c   : > { %v4378_v54 = vpop.xlane.xlu0 %4377 }
0x128d   : > { %6653 = vrcp.f32 %v4378_v54  ;;  %v4837_v54 = vld [vmem:[#allocation31 + $0x10] sm:$0xff] }
0x1290   : > { %v4381_v55 = vpop.xlane.xlu1 %4380  ;;  %v6576_v6 = vpop.permute.xlu0 %6575 }
0x1291   : > { %6655 = vrcp.f32 %v4381_v55  ;;  %v6578_v10 = vunpack.i.h.bf16 %v6576_v6  ;;  %v6577_v57 = vunpack.i.l.bf16 %v6576_v6  ;;  %v4838_v55 = vld [vmem:[#allocation31 + $0x18] sm:$0xff] }
0x1292   : > { %v6194_v6 = vpack.c.bf16 %v4838_v55, %v4837_v54  ;;  %v5617_v54 = vld [vmem:[#allocation43] ss:$0 sm:$0xff] }
0x1293   : > { %v6652_v15 = vpop.eup %6651  ;;  %v6174_v58 = vpack.c.bf16 %v6578_v10, %v6577_v57  ;;  %v4929_v10 = vld [vmem:[#allocation34] sm:$0xff]  ;;  %v4930_v57 = vld [vmem:[#allocation34 + $0x8] sm:$0xff] }
0x1294   : > { %v6586_v59 = vpop.permute.xlu1 %6585  ;;  %v4387_v62 = vmul.f32 %v6652_v15, %v6644_v36  ;;  %v3988_v0 = vpop.permute.xlu0 %3987  ;;  %v4931_v15 = vld [vmem:[#allocation34 + $0x10] sm:$0xff] }
0x1295   : > { %v6588_v60 = vunpack.i.h.bf16 %v6586_v59  ;;  %v6587_v61 = vunpack.i.l.bf16 %v6586_v59  ;;  %6175 = vmatpush3.bf16.msra.mxu1 %v6174_v58  ;;  %v3998_v56 = vsel %vm1524_vm2, %v8925_v25, %v3988_v0  ;;  %v6186_v25 = vpack.c.bf16 %v4700_v13, %v4699_v11  ;;  %v4932_v59 = vld [vmem:[#allocation34 + $0x18] sm:$0xff]  ;;  %v4935_v13 = vld [vmem:[#allocation34 + $0x30] sm:$0xff] }
0x1296   : > { %6179 = vmatprep.subr.bf16.mxu1 %v7624_v31  ;;  %v6198_v58 = vpack.c.bf16 %v4930_v57, %v4929_v10  ;;  %v5618_v10 = vld [vmem:[#allocation44] ss:$0 sm:$0xff] }
0x1297   : > { %v6654_v63 = vpop.eup %6653  ;;  %v6180_v29 = vpack.c.bf16 %v6588_v60, %v6587_v61  ;;  %v6202_v60 = vpack.c.bf16 %v4932_v59, %v4931_v15  ;;  %v4933_v61 = vld [vmem:[#allocation34 + $0x20] sm:$0xff] }
0x1298   : > { %v4388_v39 = vmul.f32 %v6654_v63, %v6646_v38  ;;  %v3992_v1 = vpop.permute.xlu1 %3991  ;;  %6021 = vmatmul.mubr.msk.f32.vlgmr.msra.gmra.mrb[38].mxu1 %vm2176_vm3, %v4387_v62  ;;  %v4934_v62 = vld [vmem:[#allocation34 + $0x28] sm:$0xff] }
0x1299   : > { %6181 = vmatpush3.bf16.msra.mxu1 %v6180_v29  ;;  %6034 = vmatprep.mubr.msk.f32.mxu1 %vm7616_vm1, %v7615_v12  ;;  %v3999_v31 = vsel %vm2176_vm3, %v3998_v56, %v3992_v1  ;;  %v6206_v63 = vpack.c.bf16 %v4934_v62, %v4933_v61 }
0x129a   : > { %6028 = vmatmul.mubr.msk.f32.vlgmr.msra.gmra.mrb[36].mxu0 %vm2176_vm3, %v4388_v39 }
0x129b   : > { %v6656_v2 = vpop.eup %6655  ;;  %6185 = vmatpush3.bf16.msra.mxu0 %v6182_v5 }
0x129c   : > { %v4389_v3 = vmul.f32 %v6656_v2, %v6648_v42  ;;  %v3996_v4 = vpop.permute.xlu1 %3995  ;;  %6187 = vmatprep.subr.bf16.mxu0 %v6186_v25 }
0x129d   : > { %v4000_v7 = vsel %vm2178_vm4, %v3999_v31, %v3996_v4  ;;  %v5609_v31 = vld [vmem:[#allocation40] ss:$0 sm:$0xff] }
0x129e   : > { %6035 = vmatmul.mubr.msk.f32.vlgmr.msra.gmra.mrb[40].mxu1 %vm2176_vm3, %v4389_v3  ;;  %6045 = vmatprep.mubr.msk.f32.mxu0 %vm1331_vm0, %v4000_v7  ;;  %v5610_v7 = vld [vmem:[#allocation41] ss:$0 sm:$0xff] }
0x129f   : > { %6189 = vmatpush3.bf16.msra.mxu0 %v6186_v25  ;;  %v4936_v25 = vld [vmem:[#allocation34 + $0x38] sm:$0xff] }
0x12a0   : > { %6199 = vmatprep.subr.bf16.mxu0 %v6198_v58 }
0x1337   : > { %v4459_v12 = vpop.f32.mrb[34].mxu0 }
0x1338   : > { %v6015_v52 = vpop.f32.mrb[35].mxu0 }
0x136b   : > { %v4532_v14 = vpop.f32.mrb[38].mxu1 }
0x136c   : > { %4683 = vrot.lane.b32.xlu0 %v4532_v14, %s7623_s15  ;;  %v6022_v16 = vpop.f32.mrb[39].mxu1  ;;  %v6210_v14 = vpack.c.bf16 %v4936_v25, %v4935_v13 }
0x136d   : > { %v4605_v17 = vpop.f32.mrb[36].mxu0  ;;  %v5611_v16 = vld [vmem:[#allocation32] ss:$0 sm:$0xff] }
0x136e   : > { %v6029_v18 = vpop.f32.mrb[37].mxu0 }
0x1370   : > { %4687 = vrot.lane.b32.xlu0 %v4605_v17, %s7621_s2 }
0x1371   : > { %v4678_v19 = vpop.f32.mrb[40].mxu1 }
0x1372   : > { %4691 = vrot.lane.b32.xlu1 %v4678_v19, %s7622_s1  ;;  %v6036_v20 = vpop.f32.mrb[41].mxu1 }
0x13de   : > { %v4684_v22 = vpop.permute.xlu0 %4683 }
0x13df   : > { %v4694_v30 = vsel %vm1524_vm2, %v4459_v12, %v4684_v22 }
0x13e2   : > { %v4688_v23 = vpop.permute.xlu0 %4687 }
0x13e3   : > { %v4695_v24 = vsel %vm2176_vm3, %v4694_v30, %v4688_v23  ;;  %v5614_v23 = vld [vmem:[#allocation35] ss:$0 sm:$0xff] }
0x13e4   : > { %v4692_v26 = vpop.permute.xlu1 %4691 }
0x13e5   : > { %v4696_v27 = vsel %vm2178_vm4, %v4695_v24, %v4692_v26 }
0x13e6   : > { %6046 = vmatmul.mubr.msk.f32.vlgmr.msra.gmra.mrb[38].mxu0 %vm1331_vm0, %v4696_v27 }
0x13e7   : > { %6201 = vmatpush3.bf16.msra.mxu0 %v6198_v58 }
0x13e8   : > { %6203 = vmatprep.subr.bf16.mxu0 %v6202_v60 }
0x13eb   : > { %6205 = vmatpush3.bf16.msra.mxu0 %v6202_v60 }
0x13ec   : > { %6207 = vmatprep.subr.bf16.mxu0 %v6206_v63 }
0x13ef   : > { %6209 = vmatpush3.bf16.msra.mxu0 %v6206_v63 }
0x13f0   : > { %6211 = vmatprep.subr.bf16.mxu0 %v6210_v14 }
0x13f3   : > { %6213 = vmatpush3.bf16.msra.mxu0 %v6210_v14 }
0x14b9   : > { %v6047_v32 = vpop.f32.mrb[38].mxu0 }
0x14ba   : > { %v4786_v33 = vadd.f32 %v6047_v32, %v5606_v28  ;;  %v4780_v34 = vpop.f32.mrb[39].mxu0 }
0x14bb   : > { %v4781_v21 = vadd.f32 %v5606_v28, %v4780_v34 }
0x14bc   : > { %v4790_v35 = vadd.f32 %v4786_v33, %v8779_v50 }
0x14bd   : > { %v4789_v36 = vadd.f32 %v4781_v21, %v8775_v47  ;;  %v4835_v47 = vld [vmem:[#allocation31] sm:$0xff] }
0x14be   : > { %v4796_v37 = vsel %vm1331_vm0, %v4790_v35, 0.0  ;;  %v6190_v40 = vpack.c.bf16 %v4836_v53, %v4835_v47 }
0x14bf   : > { %4797 = vadd.xlane.f32.xlu1 %v4796_v37  ;;  %v4793_v38 = vsel %vm1331_vm0, %v4789_v36, 0.0 }
0x14c0   : > { %4794 = vadd.xlane.f32.xlu0 %v4793_v38  ;;  %6191 = vmatprep.subr.bf16.mxu1 %v6190_v40 }
0x14c1   : > { %6193 = vmatpush3.bf16.msra.mxu1 %v6190_v40 }
0x14c2   : > { %6195 = vmatprep.subr.bf16.mxu1 %v6194_v6 }
0x14c5   : > { %6197 = vmatpush3.bf16.msra.mxu1 %v6194_v6 }
0x154c   : > { %v4798_v41 = vpop.xlane.xlu1 %4797 }
0x154d   : > { %v4800_v42 = vmul.f32 0.03125, %v4798_v41  ;;  %v4795_v43 = vpop.xlane.xlu0 %4794 }
0x154e   : > { %v4799_v44 = vmul.f32 0.03125, %v4795_v43 }
0x154f   : > { %v4802_v45 = vsub.f32 %v4790_v35, %v4800_v42 }
0x1550   : > { %v4801_v46 = vsub.f32 %v4789_v36, %v4799_v44 }
0x1551   : > { %v4804_v51 = vmul.f32 %v4802_v45, %v4802_v45 }
0x1552   : > { %v4803_v48 = vmul.f32 %v4801_v46, %v4801_v46 }
0x1553   : > { %v4808_v50 = vsel %vm1331_vm0, %v4804_v51, 0.0 }
0x1554   : > { %v4805_v49 = vsel %vm1331_vm0, %v4803_v48, 0.0 }
0x1555   : > { %4806 = vadd.xlane.f32.xlu0 %v4805_v49 }
0x1559   : > { %4809 = vadd.xlane.f32.xlu0 %v4808_v50 }
0x15e2   : > { %v4807_v29 = vpop.xlane.xlu0 %4806 }
0x15e3   : > { %v4811_v39 = vmul.f32 0.03125, %v4807_v29 }
0x15e5   : > { %v4813_v0 = vadd.f32 1e-05, %v4811_v39 }
0x15e6   : > { %v4810_v1 = vpop.xlane.xlu0 %4809 }
0x15e7   : > { %6657 = vrsqrt.f32 %v4813_v0  ;;  %v4812_v2 = vmul.f32 0.03125, %v4810_v1 }
0x15e9   : > { %v4814_v56 = vadd.f32 1e-05, %v4812_v2 }
0x15eb   : > { %6659 = vrsqrt.f32 %v4814_v56 }
0x15f1   : > { %v6658_v3 = vpop.eup %6657 }
0x15f2   : > { %v4817_v4 = vmul.f32 %v6658_v3, %v4801_v46 }
0x15f4   : > { %v4825_v8 = vmul.f32 %v5609_v31, %v4817_v4 }
0x15f5   : > { %v6660_v9 = vpop.eup %6659 }
0x15f6   : > { %v4818_v5 = vmul.f32 %v6660_v9, %v4802_v45  ;;  %v4833_v12 = vadd.f32 %v5610_v7, %v4825_v8 }
0x15f8   : > { %v4826_v52 = vmul.f32 %v5609_v31, %v4818_v5  ;;  %6056 = vmatprep.mubr.msk.f32.mxu1 %vm1331_vm0, %v4833_v12 }
0x15fa   : > { %v4834_v11 = vadd.f32 %v5610_v7, %v4826_v52 }
0x15fc   : > { %6057 = vmatmul.mubr.msk.f32.vlgmr.msra.gmra.mrb[42].mxu1 %vm1331_vm0, %v4834_v11 }
0x16cf   : > { %v6058_v17 = vpop.f32.mrb[42].mxu1 }
0x16d0   : > { %v4924_v18 = vadd.f32 %v6058_v17, %v5611_v16  ;;  %v4918_v19 = vpop.f32.mrb[43].mxu1 }
0x16d1   : > { %v4919_v20 = vadd.f32 %v5611_v16, %v4918_v19 }
0x16d2   : > { %v4928_v30 = vmax.f32 %v4924_v18, 0.0 }
0x16d3   : > { %v4927_v22 = vmax.f32 %v4919_v20, 0.0 }
0x16d5   : > { %6075 = vmatprep.mubr.msk.f32.mxu0 %vm4944_vm6, %v4927_v22 }
0x16d6   : > { %6076 = vmatmul.mubr.msk.f32.vlgmr.msra.gmra.mrb[40].mxu0 %vm4944_vm6, %v4928_v30 }
0x17a9   : > { %v6077_v24 = vpop.f32.mrb[40].mxu0 }
0x17aa   : > { %v5023_v26 = vadd.f32 %v6077_v24, %v5614_v23  ;;  %v5017_v27 = vpop.f32.mrb[41].mxu0 }
0x17ab   : > { %v5018_v28 = vadd.f32 %v5614_v23, %v5017_v27 }
0x17ac   : > { %v5027_v32 = vadd.f32 %v5023_v26, %v4834_v11 }
0x17ad   : > { %v5026_v33 = vadd.f32 %v5018_v28, %v4833_v12 }
0x17ae   : > { %v5033_v34 = vsel %vm1331_vm0, %v5027_v32, 0.0 }
0x17af   : > { %5034 = vadd.xlane.f32.xlu0 %v5033_v34  ;;  %v5030_v21 = vsel %vm1331_vm0, %v5026_v33, 0.0 }
0x17b0   : > { %5031 = vadd.xlane.f32.xlu1 %v5030_v21 }
0x183c   : > { %v5035_v35 = vpop.xlane.xlu0 %5034 }
0x183d   : > { %v5037_v36 = vmul.f32 0.03125, %v5035_v35  ;;  %v5032_v37 = vpop.xlane.xlu1 %5031 }
0x183e   : > { %v5036_v38 = vmul.f32 0.03125, %v5032_v37 }
0x183f   : > { %v5039_v41 = vsub.f32 %v5027_v32, %v5037_v36 }
0x1840   : > { %v5038_v42 = vsub.f32 %v5026_v33, %v5036_v38 }
0x1841   : > { %v5041_v43 = vmul.f32 %v5039_v41, %v5039_v41 }
0x1842   : > { %v5040_v44 = vmul.f32 %v5038_v42, %v5038_v42 }
0x1843   : > { %v5045_v45 = vsel %vm1331_vm0, %v5041_v43, 0.0 }
0x1844   : > { %5046 = vadd.xlane.f32.xlu0 %v5045_v45  ;;  %v5042_v46 = vsel %vm1331_vm0, %v5040_v44, 0.0 }
0x1845   : > { %5043 = vadd.xlane.f32.xlu1 %v5042_v46 }
0x18d1   : > { %v5047_v48 = vpop.xlane.xlu0 %5046 }
0x18d2   : > { %v5049_v49 = vmul.f32 0.03125, %v5047_v48  ;;  %v5044_v51 = vpop.xlane.xlu1 %5043 }
0x18d3   : > { %v5048_v50 = vmul.f32 0.03125, %v5044_v51 }
0x18d4   : > { %v5051_v47 = vadd.f32 1e-05, %v5049_v49 }
0x18d5   : > { %v5050_v53 = vadd.f32 1e-05, %v5048_v50 }
0x18d6   : > { %6661 = vrsqrt.f32 %v5051_v47 }
0x18d7   : > { %6663 = vrsqrt.f32 %v5050_v53 }
0x18e0   : > { %v6662_v40 = vpop.eup %6661 }
0x18e1   : > { %v6664_v55 = vpop.eup %6663  ;;  %v5055_v6 = vmul.f32 %v6662_v40, %v5039_v41 }
0x18e2   : > { %v5054_v57 = vmul.f32 %v6664_v55, %v5038_v42 }
0x18e3   : > { %v5063_v15 = vmul.f32 %v5617_v54, %v5055_v6 }
0x18e4   : > { %v5062_v58 = vmul.f32 %v5617_v54, %v5054_v57 }
0x18e5   : > { %v5071_v59 = vadd.f32 %v5618_v10, %v5063_v15 }
0x18e6   : > { %v5070_v60 = vadd.f32 %v5618_v10, %v5062_v58 }
0x18e7   : > { %5073 = vst.msk [vmem:[%s1300_s16 + $0x8] sm:$0xff] %vm1331_vm0, %v5071_v59 }
0x18e8   : > { %5072 = vst.msk [vmem:[%s1300_s16] sm:$0xff] %vm1331_vm0, %v5070_v60 }
0x18e9   : > { %7470 = shalt.err (!%p7467_p12)
}
0x18ea   : > { %s7471_s11 = scalar_lea.hbm %s8982_s12, 256  ;;  %s7475_s8 = scalar_lea.hbm %s9245_s20, 512 }
0x18eb   : > { %p7472_p4 = scmp.ne.s32.totalorder %s8982_s12, %s7471_s11  ;;  %p7476_p0 = scmp.lt.u32.totalorder %s8982_s12, %s9245_s20 }
0x18ec   : > { %p7477_p5 = scmp.lt.u32.totalorder %s7475_s8, %s7471_s11  ;;  %p7479_p6 = scmp.lt.u32.totalorder %s7471_s11, %s8982_s12 }
0x18ed   : > { %p7473_p10 = pnand %p7472_p4, %p9246_p3 }
0x18ee   : > { %p7478_p9 = por %p7477_p5, %p7476_p0 }
0x18ef   : > { %p7474_p2 = pneg %p7473_p10 }
0x18f0   : > { %p7480_p7 = por %p7479_p6, %p7478_p9 }
0x18f2   : > { %p7481_p8 = pnand %p7480_p7, %p7474_p2 }
0x18f4   : > { %7484 = shalt.err (!%p7481_p8)
}
0x18f5   : > { %s7626_s2 = smov 128  }
0x18f6   : > { %6318 = dma.vmem_to_hbm [thread:$0]  (%p9246_p3), %s8984_s22, 256, %s8982_s12, %s5075_s17, %s7626_s2, %s7626_s2, %s7623_s15  }
0x18f7 PF: > { %s9247_s1 = sld [smem:[#allocation64_spill]]  ;;  %s9248_s18 = sld [smem:[#allocation71_spill]] }
0x18f8   : > { %p9250_p13 = scmp.ge.s32.totalorder %s7583_s30, 2 }
0x18fd   : > { %s5103_s16 = sand.u32 1, %s9247_s1   ;;  %p9249_p1 = scmp.ne.s32.totalorder %s9248_s18, 0 }
0x18fe   : > { %s5104_s4 = scalar_lea.sflag [#allocation4], %s5103_s16 }
0x18ff   : > { %p6407_p11 = pnand %p9250_p13, %p9249_p1 }
0x1901   : > { %7566 = dma.done.wait (!%p6407_p11), %s5104_s4, 256  }
0x1902   : > { %7568 = vsyncadd (!%p6407_p11), %s5104_s4, 4294967040  ;;  %s9251_s30 = sld [smem:[#allocation68_spill]]  ;;  %s9252_s29 = sld [smem:[#allocation65_spill]] }
0x1903   : > { %s9253_s9 = sld [smem:[#allocation69_spill]]  ;;  %s9254_s8 = smov %s7575_s5 }
0x1908   : > { %p59_p12 = scmp.ge.s32.totalorder %s9251_s30, 4   ;;  %s9255_s5 = smov %s9252_s29 }
0x190a   :  { %61 = sbr.rel (!%p59_p12) target bundleno = 51 (0x33), region = 310 }
0x1911   :  { %5109 = vsyncpa [#allocation3], 1 }
0x1912   :  { %5111 = vsyncpa [#allocation3 + $0x1], 1 }
0x1913   :  { %5112 = vsyncpa [#allocation6], 1 }
0x1914   :  { %5114 = vsyncpa [#allocation6 + $0x1], 1 }
0x1915   :  { %5115 = vsyncpa [#allocation9], 1 }
0x1916   :  { %5117 = vsyncpa [#allocation9 + $0x1], 1 }
0x1917   :  { %5118 = vsyncpa [#allocation12], 1 }
0x1918   :  { %5119 = vsyncpa [#allocation15], 1 }
0x1919   :  { %5120 = vsyncpa [#allocation18], 1 }
0x191a   :  { %5121 = vsyncpa [#allocation21], 1 }
0x191b   :  { %5122 = vsyncpa [#allocation24], 1 }
0x191c   :  { %5123 = vsyncpa [#allocation27], 1 }
0x191d   :  { %5124 = vsyncpa [#allocation30], 1 }
0x191e   :  { %5125 = vsyncpa [#allocation33], 1 }
0x191f   :  { %5126 = vsyncpa [#allocation36], 1 }
0x1920   :  { %5127 = vsyncpa [#allocation39], 1 }
0x1921   :  { %5128 = vsyncpa [#allocation42], 1 }
0x1922   :  { %5129 = vsyncpa [#allocation45], 1 }
0x1923   :  { %5130 = vsyncpa [#allocation4], 1 }
0x1924   :  { %5132 = vsyncpa [#allocation4 + $0x1], 1 }

</bundles_post_ra>
